<compile_context>
chip_gen: v5e
topology: v5e:2x2
jax: 0.10.0
libtpu: 0.0.40
codegen_flags: <defaults>
</compile_context>

<pallas_src>
import math
import functools

import jax
import jax.numpy as jnp
import numpy as np
from jax.experimental import pallas as pl
from jax.experimental.pallas import tpu as pltpu


# --------------------------- config (small, synthetic) ----------------------
class Config:
    n_dec_vocab = 100
    n_dec_seq = 8          # S
    d_hidn = 32            # D
    n_head = 4             # H
    d_head = 8             # Dh
    d_ff = 64              # F
    n_layer = 2            # L
    i_pad = 0
    layer_norm_epsilon = 1e-6
    proj_drop = 0.0        # dropout is identity at inference


CFG = Config()

VEC_ROWS = 8       # packed small-parameter rows per layer
VEC_LANES = 128    # lane-padded width of the packed slab


# --------------------------- helpers (plain JAX glue) ------------------------
def get_sinusoid_encoding_table(n_seq, d_hidn):
    def cal_angle(position, i_hidn):
        return position / np.power(10000, 2 * (i_hidn // 2) / d_hidn)

    table = np.array(
        [[cal_angle(p, i) for i in range(d_hidn)] for p in range(n_seq)],
        dtype=np.float64,
    )
    table[:, 0::2] = np.sin(table[:, 0::2])
    table[:, 1::2] = np.cos(table[:, 1::2])
    return jnp.asarray(table, dtype=jnp.float32)


def build_additive_attn_mask(dec_inputs, i_pad):
    # (B, S, S) additive mask: -1e9 where masked (pad key or causal future),
    # 0.0 where visible.  Equivalent to the torch masked_fill(-1e9) path.
    B, S = dec_inputs.shape
    pad = (dec_inputs == i_pad).astype(jnp.float32)              # (B, S) keys
    pad_mask = jnp.broadcast_to(pad[:, None, :], (B, S, S))      # (B, Sq, Sk)
    causal = jnp.triu(jnp.ones((S, S), jnp.float32), k=1)        # strict upper
    masked = ((pad_mask + causal[None, :, :]) > 0).astype(jnp.float32)
    return masked * jnp.float32(-1e9)


# --------------------------- in-kernel math helpers ---------------------------
def _layer_norm(x, g, b, eps):
    mu = jnp.mean(x, axis=-1, keepdims=True)
    var = jnp.mean((x - mu) ** 2, axis=-1, keepdims=True)
    return (x - mu) * jax.lax.rsqrt(var + eps) * g + b


def _gelu_exact(x):
    # Matches torch.nn.functional.gelu (erf form).
    return 0.5 * x * (1.0 + jax.lax.erf(x / jnp.sqrt(2.0).astype(x.dtype)))


# --------------------------- fused decoder-stack kernel -----------------------
def gpt_decoder_kernel(
    x_ref, maskadd_ref,
    wqkv_ref, wo_ref, w1_ref, w2_ref, vec_ref,
    out_ref, prob_ref,
    *, batch, seq, n_layer, n_head, d_head, d_ff, eps,
):
    # x_ref:       (B, S, D)
    # maskadd_ref: (B, S, S)            -- additive mask (-1e9 / 0)
    # wqkv_ref:    (L, D, 3*HD)
    # wo_ref:      (L, HD, D)
    # w1_ref:      (L, D, F)
    # w2_ref:      (L, F, D)
    # vec_ref:     (L, VEC_ROWS, VEC_LANES) packed biases / LN params
    # out_ref:     (B, S, D)
    # prob_ref:    (B, L*H, S, S)
    B, S = batch, seq
    HD = n_head * d_head
    F = d_ff
    scale = 1.0 / math.sqrt(d_head)

    # Fold batch into the row axis so projections / FFN run on (B*S, D) rows.
    x = x_ref[...]
    D = x.shape[-1]
    x = x.reshape(B * S, D)

    for l in range(n_layer):          # static unroll over layers
        wqkv = wqkv_ref[l]            # (D, 3*HD)
        wo = wo_ref[l]                # (HD, D)
        w1 = w1_ref[l]                # (D, F)
        w2 = w2_ref[l]                # (F, D)
        vec = vec_ref[l]              # (VEC_ROWS, VEC_LANES)

        bqkv = vec[0:1, :3 * HD]      # (1, 3*HD)
        bo = vec[1:2, :D]             # (1, D)
        b1 = vec[2:3, :F]             # (1, F)
        b2 = vec[3:4, :D]             # (1, D)
        ln1g = vec[4:5, :D]
        ln1b = vec[5:6, :D]
        ln2g = vec[6:7, :D]
        ln2b = vec[7:8, :D]

        # Fused QKV projection: one matmul for all batch rows, heads, q/k/v.
        qkv = jnp.dot(x, wqkv, preferred_element_type=jnp.float32) + bqkv  # (B*S, 3*HD)

        # Per-(batch, head) attention; output projection folded into the head
        # loop so no concatenate of head slices is ever materialized.
        attn_rows = []
        for b in range(B):            # static unroll over batch
            qkv_b = qkv[b * S:(b + 1) * S]                              # (S, 3*HD)
            mask_add = maskadd_ref[b]                                   # (S, S)
            attn_b = jnp.zeros((S, D), jnp.float32)
            for h in range(n_head):   # static unroll over heads
                q = qkv_b[:, h * d_head:(h + 1) * d_head]                   # (S, Dh)
                k = qkv_b[:, HD + h * d_head:HD + (h + 1) * d_head]         # (S, Dh)
                v = qkv_b[:, 2 * HD + h * d_head:2 * HD + (h + 1) * d_head] # (S, Dh)

                s = jnp.dot(q, k.T, preferred_element_type=jnp.float32) * scale
                s = s + mask_add                                        # additive mask
                m = jnp.max(s, axis=-1, keepdims=True)
                e = jnp.exp(s - m)
                p = e * pl.reciprocal(jnp.sum(e, axis=-1, keepdims=True),
                                      approx=True)

                prob_ref[b, l * n_head + h] = p                         # (S, S)

                ctx = jnp.dot(p, v, preferred_element_type=jnp.float32) # (S, Dh)
                attn_b = attn_b + jnp.dot(
                    ctx, wo[h * d_head:(h + 1) * d_head, :],
                    preferred_element_type=jnp.float32,
                )
            attn_rows.append(attn_b)
        attn = jnp.concatenate(attn_rows, axis=0)                       # (B*S, D)

        h1 = _layer_norm(x + attn + bo, ln1g, ln1b, eps)

        # FFN (Conv1d k=1 == matmul), on all batch rows at once.
        ff = jnp.dot(h1, w1, preferred_element_type=jnp.float32) + b1
        ff = _gelu_exact(ff)
        ff = jnp.dot(ff, w2, preferred_element_type=jnp.float32) + b2

        x = _layer_norm(h1 + ff, ln2g, ln2b, eps)

    out_ref[...] = x.reshape(B, S, D)


def gpt_decoder(x, mask_add, packed, cfg):
    B, S, D = x.shape
    L, H, Dh, F = cfg.n_layer, cfg.n_head, cfg.d_head, cfg.d_ff
    HD = H * Dh

    kernel = functools.partial(
        gpt_decoder_kernel,
        batch=B, seq=S, n_layer=L, n_head=H, d_head=Dh, d_ff=F,
        eps=cfg.layer_norm_epsilon,
    )

    def full(shape):
        nd = len(shape)
        return pl.BlockSpec(shape, lambda i, _nd=nd: (0,) * _nd)

    in_specs = [
        full((B, S, D)),                    # x (whole batch, resident)
        full((B, S, S)),                    # additive mask
        full((L, D, 3 * HD)),               # fused QKV weights
        full((L, HD, D)),                   # output projection
        full((L, D, F)),                    # FFN conv1 (as matmul)
        full((L, F, D)),                    # FFN conv2 (as matmul)
        full((L, VEC_ROWS, VEC_LANES)),     # packed small params
    ]
    out_specs = [
        full((B, S, D)),
        full((B, L * H, S, S)),
    ]
    out_shape = (
        jax.ShapeDtypeStruct((B, S, D), jnp.float32),
        jax.ShapeDtypeStruct((B, L * H, S, S), jnp.float32),
    )

    return pl.pallas_call(
        kernel,
        out_shape=out_shape,
        grid_spec=pltpu.PrefetchScalarGridSpec(
            num_scalar_prefetch=0,
            grid=(1,),                       # whole problem in one step (fits VMEM easily)
            in_specs=in_specs,
            out_specs=out_specs,
        ),
        compiler_params=pltpu.CompilerParams(
            dimension_semantics=("arbitrary",),
        ),
    )(
        x, mask_add,
        packed["wqkv"], packed["wo"], packed["w1"], packed["w2"], packed["vec"],
    )


# --------------------------- parameter init / packing ------------------------
def init_params(cfg, key):
    D, HD, F = cfg.d_hidn, cfg.n_head * cfg.d_head, cfg.d_ff
    params = {}
    key, k_emb = jax.random.split(key)
    params["tok_emb"] = 0.02 * jax.random.normal(
        k_emb, (cfg.n_dec_vocab, D), jnp.float32
    )
    params["pos_emb"] = get_sinusoid_encoding_table(cfg.n_dec_seq + 1, D)

    layers = []
    for _ in range(cfg.n_layer):
        key, *ks = jax.random.split(key, 7)
        layers.append({
            "wq": 0.02 * jax.random.normal(ks[0], (D, HD), jnp.float32),
            "bq": jnp.zeros((HD,), jnp.float32),
            "wk": 0.02 * jax.random.normal(ks[1], (D, HD), jnp.float32),
            "bk": jnp.zeros((HD,), jnp.float32),
            "wv": 0.02 * jax.random.normal(ks[2], (D, HD), jnp.float32),
            "bv": jnp.zeros((HD,), jnp.float32),
            "wo": 0.02 * jax.random.normal(ks[3], (HD, D), jnp.float32),
            "bo": jnp.zeros((D,), jnp.float32),
            "ln1_g": jnp.ones((D,), jnp.float32),
            "ln1_b": jnp.zeros((D,), jnp.float32),
            "w1": 0.02 * jax.random.normal(ks[4], (D, F), jnp.float32),
            "b1": jnp.zeros((F,), jnp.float32),
            "w2": 0.02 * jax.random.normal(ks[5], (F, D), jnp.float32),
            "b2": jnp.zeros((D,), jnp.float32),
            "ln2_g": jnp.ones((D,), jnp.float32),
            "ln2_b": jnp.zeros((D,), jnp.float32),
        })
    params["layers"] = layers
    return params


def pack_layer_params(layers, cfg):
    """Stack per-layer weights with a leading L axis and pack all the small
    vectors (biases, LN params) into one lane-padded (L, 8, 128) slab."""
    def row(v):
        v = v.reshape(-1)
        return jnp.pad(v, (0, VEC_LANES - v.shape[0]))

    wqkv = jnp.stack(
        [jnp.concatenate([lp["wq"], lp["wk"], lp["wv"]], axis=1) for lp in layers]
    )                                                              # (L, D, 3*HD)
    wo = jnp.stack([lp["wo"] for lp in layers])                    # (L, HD, D)
    w1 = jnp.stack([lp["w1"] for lp in layers])                    # (L, D, F)
    w2 = jnp.stack([lp["w2"] for lp in layers])                    # (L, F, D)
    vec = jnp.stack([
        jnp.stack([
            row(jnp.concatenate([lp["bq"], lp["bk"], lp["bv"]])),  # row 0: bqkv
            row(lp["bo"]),                                         # row 1
            row(lp["b1"]),                                         # row 2
            row(lp["b2"]),                                         # row 3
            row(lp["ln1_g"]), row(lp["ln1_b"]),                    # rows 4-5
            row(lp["ln2_g"]), row(lp["ln2_b"]),                    # rows 6-7
        ])
        for lp in layers
    ])                                                             # (L, 8, 128)
    return {"wqkv": wqkv, "wo": wo, "w1": w1, "w2": w2, "vec": vec}


# --------------------------- full GPT forward --------------------------------
def gpt_forward(dec_inputs, params, cfg):
    B, S = dec_inputs.shape
    # positions: arange(S)+1, zeroed at pad tokens (row 0 of sinusoid table)
    positions = jnp.broadcast_to(jnp.arange(S, dtype=jnp.int32) + 1, (B, S))
    positions = jnp.where(dec_inputs == cfg.i_pad, 0, positions)

    # Embedding gathers stay in plain JAX (no clean Pallas gather path here).
    # TODO(synk): token/position embedding gather kept as XLA ops, not Pallas.
    x = jnp.take(params["tok_emb"], dec_inputs, axis=0) + jnp.take(
        params["pos_emb"], positions, axis=0
    )
    mask_add = build_additive_attn_mask(dec_inputs, cfg.i_pad)
    packed = pack_layer_params(params["layers"], cfg)

    out, probs = gpt_decoder(x, mask_add, packed, cfg)
    probs = probs.reshape(B, cfg.n_layer, cfg.n_head, S, S)
    attn_probs = [probs[:, l] for l in range(cfg.n_layer)]
    return out, attn_probs


# --------------------------- main --------------------------------------------
if __name__ == "__main__":
    key = jax.random.PRNGKey(0)
    key, k_ids, k_par = jax.random.split(key, 3)

    B, S = 2, CFG.n_dec_seq
    dec_inputs = jax.random.randint(
        k_ids, (B, S), 1, CFG.n_dec_vocab, dtype=jnp.int32
    )
    # make one padded position to exercise the pad-mask path
    dec_inputs = dec_inputs.at[0, -1].set(CFG.i_pad)

    params = init_params(CFG, k_par)

    fwd = jax.jit(functools.partial(gpt_forward, cfg=CFG))
    dec_outputs, dec_self_attn_probs = fwd(dec_inputs, params)
    jax.block_until_ready(dec_outputs)
    for p in dec_self_attn_probs:
        jax.block_until_ready(p)

    assert dec_outputs.shape == (B, S, CFG.d_hidn)
    assert dec_self_attn_probs[0].shape == (B, CFG.n_head, S, S)
    assert len(dec_self_attn_probs) == CFG.n_layer
    print("KERNEL_OK")
</pallas_src>

<mosaic_0001>
module attributes {stable_mosaic.version = 11 : i64} {
  func.func @gpt_decoder_kernel(%arg0: i32, %arg1: memref<2x8x32xf32, #tpu.memory_space<vmem>>, %arg2: memref<2x8x8xf32, #tpu.memory_space<vmem>>, %arg3: memref<2x32x96xf32, #tpu.memory_space<vmem>>, %arg4: memref<2x32x32xf32, #tpu.memory_space<vmem>>, %arg5: memref<2x32x64xf32, #tpu.memory_space<vmem>>, %arg6: memref<2x64x32xf32, #tpu.memory_space<vmem>>, %arg7: memref<2x8x128xf32, #tpu.memory_space<vmem>>, %arg8: memref<2x8x32xf32, #tpu.memory_space<vmem>>, %arg9: memref<2x8x8x8xf32, #tpu.memory_space<vmem>>) attributes {dimension_semantics = [#tpu.dimension_semantics<arbitrary>], iteration_bounds = array<i64: 1>, scalar_prefetch = 0 : i64, scratch_operands = 0 : i64, tpu.core_type = #tpu.core_type<tc>, window_params = [{pipeline_mode = #tpu.pipeline_mode<synchronous>, transform_indices = @transform_0, window_bounds = array<i64: 2, 8, 32>}, {pipeline_mode = #tpu.pipeline_mode<synchronous>, transform_indices = @transform_1, window_bounds = array<i64: 2, 8, 8>}, {pipeline_mode = #tpu.pipeline_mode<synchronous>, transform_indices = @transform_2, window_bounds = array<i64: 2, 32, 96>}, {pipeline_mode = #tpu.pipeline_mode<synchronous>, transform_indices = @transform_3, window_bounds = array<i64: 2, 32, 32>}, {pipeline_mode = #tpu.pipeline_mode<synchronous>, transform_indices = @transform_4, window_bounds = array<i64: 2, 32, 64>}, {pipeline_mode = #tpu.pipeline_mode<synchronous>, transform_indices = @transform_5, window_bounds = array<i64: 2, 64, 32>}, {pipeline_mode = #tpu.pipeline_mode<synchronous>, transform_indices = @transform_6, window_bounds = array<i64: 2, 8, 128>}, {pipeline_mode = #tpu.pipeline_mode<synchronous>, transform_indices = @transform_7, window_bounds = array<i64: 2, 8, 32>}, {pipeline_mode = #tpu.pipeline_mode<synchronous>, transform_indices = @transform_8, window_bounds = array<i64: 2, 8, 8, 8>}]} {
    %c0 = arith.constant 0 : index
    %c0_0 = arith.constant 0 : index
    %c0_1 = arith.constant 0 : index
    %0 = vector.load %arg1[%c0, %c0_0, %c0_1] : memref<2x8x32xf32, #tpu.memory_space<vmem>>, vector<2x8x32xf32>
    %1 = vector.shape_cast %0 : vector<2x8x32xf32> to vector<16x32xf32>
    %c0_2 = arith.constant 0 : index
    %c0_3 = arith.constant 0 : index
    %c0_4 = arith.constant 0 : index
    %2 = vector.load %arg3[%c0_2, %c0_3, %c0_4] : memref<2x32x96xf32, #tpu.memory_space<vmem>>, vector<1x32x96xf32>
    %3 = vector.shape_cast %2 : vector<1x32x96xf32> to vector<32x96xf32>
    %c0_5 = arith.constant 0 : index
    %c0_6 = arith.constant 0 : index
    %c0_7 = arith.constant 0 : index
    %4 = vector.load %arg4[%c0_5, %c0_6, %c0_7] : memref<2x32x32xf32, #tpu.memory_space<vmem>>, vector<1x32x32xf32>
    %5 = vector.shape_cast %4 : vector<1x32x32xf32> to vector<32x32xf32>
    %c0_8 = arith.constant 0 : index
    %c0_9 = arith.constant 0 : index
    %c0_10 = arith.constant 0 : index
    %6 = vector.load %arg5[%c0_8, %c0_9, %c0_10] : memref<2x32x64xf32, #tpu.memory_space<vmem>>, vector<1x32x64xf32>
    %7 = vector.shape_cast %6 : vector<1x32x64xf32> to vector<32x64xf32>
    %c0_11 = arith.constant 0 : index
    %c0_12 = arith.constant 0 : index
    %c0_13 = arith.constant 0 : index
    %8 = vector.load %arg6[%c0_11, %c0_12, %c0_13] : memref<2x64x32xf32, #tpu.memory_space<vmem>>, vector<1x64x32xf32>
    %9 = vector.shape_cast %8 : vector<1x64x32xf32> to vector<64x32xf32>
    %c0_14 = arith.constant 0 : index
    %c0_15 = arith.constant 0 : index
    %c0_16 = arith.constant 0 : index
    %10 = vector.load %arg7[%c0_14, %c0_15, %c0_16] : memref<2x8x128xf32, #tpu.memory_space<vmem>>, vector<1x8x128xf32>
    %11 = vector.shape_cast %10 : vector<1x8x128xf32> to vector<8x128xf32>
    %12 = vector.extract_strided_slice %11 {offsets = [0, 0], sizes = [1, 96], strides = [1, 1]} : vector<8x128xf32> to vector<1x96xf32>
    %13 = vector.extract_strided_slice %11 {offsets = [1, 0], sizes = [1, 32], strides = [1, 1]} : vector<8x128xf32> to vector<1x32xf32>
    %14 = vector.extract_strided_slice %11 {offsets = [2, 0], sizes = [1, 64], strides = [1, 1]} : vector<8x128xf32> to vector<1x64xf32>
    %15 = vector.extract_strided_slice %11 {offsets = [3, 0], sizes = [1, 32], strides = [1, 1]} : vector<8x128xf32> to vector<1x32xf32>
    %16 = vector.extract_strided_slice %11 {offsets = [4, 0], sizes = [1, 32], strides = [1, 1]} : vector<8x128xf32> to vector<1x32xf32>
    %17 = vector.extract_strided_slice %11 {offsets = [5, 0], sizes = [1, 32], strides = [1, 1]} : vector<8x128xf32> to vector<1x32xf32>
    %18 = vector.extract_strided_slice %11 {offsets = [6, 0], sizes = [1, 32], strides = [1, 1]} : vector<8x128xf32> to vector<1x32xf32>
    %19 = vector.extract_strided_slice %11 {offsets = [7, 0], sizes = [1, 32], strides = [1, 1]} : vector<8x128xf32> to vector<1x32xf32>
    %cst = arith.constant dense<0.000000e+00> : vector<16x96xf32>
    %20 = tpu.matmul %1, %3, %cst {dimension_numbers = #tpu.dot_dimension_numbers<[1], [0], [0], [1], [0, 0, 1, 1], [], []>} : vector<16x32xf32>, vector<32x96xf32>, vector<16x96xf32> -> vector<16x96xf32>
    %21 = vector.broadcast %12 : vector<1x96xf32> to vector<16x96xf32>
    %22 = arith.addf %20, %21 : vector<16x96xf32>
    %23 = vector.extract_strided_slice %22 {offsets = [0, 0], sizes = [8, 96], strides = [1, 1]} : vector<16x96xf32> to vector<8x96xf32>
    %c0_17 = arith.constant 0 : index
    %c0_18 = arith.constant 0 : index
    %c0_19 = arith.constant 0 : index
    %24 = vector.load %arg2[%c0_17, %c0_18, %c0_19] : memref<2x8x8xf32, #tpu.memory_space<vmem>>, vector<1x8x8xf32>
    %25 = vector.shape_cast %24 : vector<1x8x8xf32> to vector<8x8xf32>
    %cst_20 = arith.constant 0.000000e+00 : f32
    %26 = vector.broadcast %cst_20 : f32 to vector<8x32xf32>
    %27 = vector.extract_strided_slice %23 {offsets = [0, 0], sizes = [8, 8], strides = [1, 1]} : vector<8x96xf32> to vector<8x8xf32>
    %28 = vector.extract_strided_slice %23 {offsets = [0, 32], sizes = [8, 8], strides = [1, 1]} : vector<8x96xf32> to vector<8x8xf32>
    %29 = vector.extract_strided_slice %23 {offsets = [0, 64], sizes = [8, 8], strides = [1, 1]} : vector<8x96xf32> to vector<8x8xf32>
    %30 = tpu.transpose %28, [1, 0] : vector<8x8xf32> -> vector<8x8xf32>
    %cst_21 = arith.constant dense<0.000000e+00> : vector<8x8xf32>
    %31 = tpu.matmul %27, %30, %cst_21 {dimension_numbers = #tpu.dot_dimension_numbers<[1], [0], [0], [1], [0, 0, 1, 1], [], []>} : vector<8x8xf32>, vector<8x8xf32>, vector<8x8xf32> -> vector<8x8xf32>
    %cst_22 = arith.constant 0.353553385 : f32
    %32 = vector.broadcast %cst_22 : f32 to vector<8x8xf32>
    %33 = arith.mulf %31, %32 : vector<8x8xf32>
    %34 = arith.addf %33, %25 : vector<8x8xf32>
    %cst_23 = arith.constant dense<0xFF800000> : vector<8xf32>
    %35 = vector.multi_reduction <maximumf>, %34, %cst_23 [1] : vector<8x8xf32> to vector<8xf32>
    %36 = vector.shape_cast %35 : vector<8xf32> to vector<8x1xf32>
    %37 = vector.broadcast %36 : vector<8x1xf32> to vector<8x8xf32>
    %38 = arith.subf %34, %37 : vector<8x8xf32>
    %39 = math.exp %38 : vector<8x8xf32>
    %cst_24 = arith.constant dense<0.000000e+00> : vector<8xf32>
    %40 = vector.multi_reduction <add>, %39, %cst_24 [1] : vector<8x8xf32> to vector<8xf32>
    %41 = vector.shape_cast %40 : vector<8xf32> to vector<8x1xf32>
    %42 = tpu.reciprocal %41 {approx = true} : vector<8x1xf32> -> vector<8x1xf32>
    %43 = vector.broadcast %42 : vector<8x1xf32> to vector<8x8xf32>
    %44 = arith.mulf %39, %43 : vector<8x8xf32>
    %c0_25 = arith.constant 0 : index
    %c0_26 = arith.constant 0 : index
    %c0_27 = arith.constant 0 : index
    %c0_28 = arith.constant 0 : index
    %45 = vector.load %arg9[%c0_25, %c0_26, %c0_27, %c0_28] : memref<2x8x8x8xf32, #tpu.memory_space<vmem>>, vector<1x1x8x8xf32>
    %46 = vector.shape_cast %45 : vector<1x1x8x8xf32> to vector<8x8xf32>
    %47 = vector.shape_cast %44 : vector<8x8xf32> to vector<1x1x8x8xf32>
    tpu.vector_store %arg9[%c0_25, %c0_26, %c0_27, %c0_28], %47 {strides = array<i32>} : memref<2x8x8x8xf32, #tpu.memory_space<vmem>>, vector<1x1x8x8xf32>,
    %cst_29 = arith.constant dense<0.000000e+00> : vector<8x8xf32>
    %48 = tpu.matmul %44, %29, %cst_29 {dimension_numbers = #tpu.dot_dimension_numbers<[1], [0], [0], [1], [0, 0, 1, 1], [], []>} : vector<8x8xf32>, vector<8x8xf32>, vector<8x8xf32> -> vector<8x8xf32>
    %49 = vector.extract_strided_slice %5 {offsets = [0, 0], sizes = [8, 32], strides = [1, 1]} : vector<32x32xf32> to vector<8x32xf32>
    %cst_30 = arith.constant dense<0.000000e+00> : vector<8x32xf32>
    %50 = tpu.matmul %48, %49, %cst_30 {dimension_numbers = #tpu.dot_dimension_numbers<[1], [0], [0], [1], [0, 0, 1, 1], [], []>} : vector<8x8xf32>, vector<8x32xf32>, vector<8x32xf32> -> vector<8x32xf32>
    %51 = arith.addf %26, %50 : vector<8x32xf32>
    %52 = vector.extract_strided_slice %23 {offsets = [0, 8], sizes = [8, 8], strides = [1, 1]} : vector<8x96xf32> to vector<8x8xf32>
    %53 = vector.extract_strided_slice %23 {offsets = [0, 40], sizes = [8, 8], strides = [1, 1]} : vector<8x96xf32> to vector<8x8xf32>
    %54 = vector.extract_strided_slice %23 {offsets = [0, 72], sizes = [8, 8], strides = [1, 1]} : vector<8x96xf32> to vector<8x8xf32>
    %55 = tpu.transpose %53, [1, 0] : vector<8x8xf32> -> vector<8x8xf32>
    %cst_31 = arith.constant dense<0.000000e+00> : vector<8x8xf32>
    %56 = tpu.matmul %52, %55, %cst_31 {dimension_numbers = #tpu.dot_dimension_numbers<[1], [0], [0], [1], [0, 0, 1, 1], [], []>} : vector<8x8xf32>, vector<8x8xf32>, vector<8x8xf32> -> vector<8x8xf32>
    %cst_32 = arith.constant 0.353553385 : f32
    %57 = vector.broadcast %cst_32 : f32 to vector<8x8xf32>
    %58 = arith.mulf %56, %57 : vector<8x8xf32>
    %59 = arith.addf %58, %25 : vector<8x8xf32>
    %cst_33 = arith.constant dense<0xFF800000> : vector<8xf32>
    %60 = vector.multi_reduction <maximumf>, %59, %cst_33 [1] : vector<8x8xf32> to vector<8xf32>
    %61 = vector.shape_cast %60 : vector<8xf32> to vector<8x1xf32>
    %62 = vector.broadcast %61 : vector<8x1xf32> to vector<8x8xf32>
    %63 = arith.subf %59, %62 : vector<8x8xf32>
    %64 = math.exp %63 : vector<8x8xf32>
    %cst_34 = arith.constant dense<0.000000e+00> : vector<8xf32>
    %65 = vector.multi_reduction <add>, %64, %cst_34 [1] : vector<8x8xf32> to vector<8xf32>
    %66 = vector.shape_cast %65 : vector<8xf32> to vector<8x1xf32>
    %67 = tpu.reciprocal %66 {approx = true} : vector<8x1xf32> -> vector<8x1xf32>
    %68 = vector.broadcast %67 : vector<8x1xf32> to vector<8x8xf32>
    %69 = arith.mulf %64, %68 : vector<8x8xf32>
    %c0_35 = arith.constant 0 : index
    %c1 = arith.constant 1 : index
    %c0_36 = arith.constant 0 : index
    %c0_37 = arith.constant 0 : index
    %70 = vector.load %arg9[%c0_35, %c1, %c0_36, %c0_37] : memref<2x8x8x8xf32, #tpu.memory_space<vmem>>, vector<1x1x8x8xf32>
    %71 = vector.shape_cast %70 : vector<1x1x8x8xf32> to vector<8x8xf32>
    %72 = vector.shape_cast %69 : vector<8x8xf32> to vector<1x1x8x8xf32>
    tpu.vector_store %arg9[%c0_35, %c1, %c0_36, %c0_37], %72 {strides = array<i32>} : memref<2x8x8x8xf32, #tpu.memory_space<vmem>>, vector<1x1x8x8xf32>,
    %cst_38 = arith.constant dense<0.000000e+00> : vector<8x8xf32>
    %73 = tpu.matmul %69, %54, %cst_38 {dimension_numbers = #tpu.dot_dimension_numbers<[1], [0], [0], [1], [0, 0, 1, 1], [], []>} : vector<8x8xf32>, vector<8x8xf32>, vector<8x8xf32> -> vector<8x8xf32>
    %74 = vector.extract_strided_slice %5 {offsets = [8, 0], sizes = [8, 32], strides = [1, 1]} : vector<32x32xf32> to vector<8x32xf32>
    %cst_39 = arith.constant dense<0.000000e+00> : vector<8x32xf32>
    %75 = tpu.matmul %73, %74, %cst_39 {dimension_numbers = #tpu.dot_dimension_numbers<[1], [0], [0], [1], [0, 0, 1, 1], [], []>} : vector<8x8xf32>, vector<8x32xf32>, vector<8x32xf32> -> vector<8x32xf32>
    %76 = arith.addf %51, %75 : vector<8x32xf32>
    %77 = vector.extract_strided_slice %23 {offsets = [0, 16], sizes = [8, 8], strides = [1, 1]} : vector<8x96xf32> to vector<8x8xf32>
    %78 = vector.extract_strided_slice %23 {offsets = [0, 48], sizes = [8, 8], strides = [1, 1]} : vector<8x96xf32> to vector<8x8xf32>
    %79 = vector.extract_strided_slice %23 {offsets = [0, 80], sizes = [8, 8], strides = [1, 1]} : vector<8x96xf32> to vector<8x8xf32>
    %80 = tpu.transpose %78, [1, 0] : vector<8x8xf32> -> vector<8x8xf32>
    %cst_40 = arith.constant dense<0.000000e+00> : vector<8x8xf32>
    %81 = tpu.matmul %77, %80, %cst_40 {dimension_numbers = #tpu.dot_dimension_numbers<[1], [0], [0], [1], [0, 0, 1, 1], [], []>} : vector<8x8xf32>, vector<8x8xf32>, vector<8x8xf32> -> vector<8x8xf32>
    %cst_41 = arith.constant 0.353553385 : f32
    %82 = vector.broadcast %cst_41 : f32 to vector<8x8xf32>
    %83 = arith.mulf %81, %82 : vector<8x8xf32>
    %84 = arith.addf %83, %25 : vector<8x8xf32>
    %cst_42 = arith.constant dense<0xFF800000> : vector<8xf32>
    %85 = vector.multi_reduction <maximumf>, %84, %cst_42 [1] : vector<8x8xf32> to vector<8xf32>
    %86 = vector.shape_cast %85 : vector<8xf32> to vector<8x1xf32>
    %87 = vector.broadcast %86 : vector<8x1xf32> to vector<8x8xf32>
    %88 = arith.subf %84, %87 : vector<8x8xf32>
    %89 = math.exp %88 : vector<8x8xf32>
    %cst_43 = arith.constant dense<0.000000e+00> : vector<8xf32>
    %90 = vector.multi_reduction <add>, %89, %cst_43 [1] : vector<8x8xf32> to vector<8xf32>
    %91 = vector.shape_cast %90 : vector<8xf32> to vector<8x1xf32>
    %92 = tpu.reciprocal %91 {approx = true} : vector<8x1xf32> -> vector<8x1xf32>
    %93 = vector.broadcast %92 : vector<8x1xf32> to vector<8x8xf32>
    %94 = arith.mulf %89, %93 : vector<8x8xf32>
    %c0_44 = arith.constant 0 : index
    %c2 = arith.constant 2 : index
    %c0_45 = arith.constant 0 : index
    %c0_46 = arith.constant 0 : index
    %95 = vector.load %arg9[%c0_44, %c2, %c0_45, %c0_46] : memref<2x8x8x8xf32, #tpu.memory_space<vmem>>, vector<1x1x8x8xf32>
    %96 = vector.shape_cast %95 : vector<1x1x8x8xf32> to vector<8x8xf32>
    %97 = vector.shape_cast %94 : vector<8x8xf32> to vector<1x1x8x8xf32>
    tpu.vector_store %arg9[%c0_44, %c2, %c0_45, %c0_46], %97 {strides = array<i32>} : memref<2x8x8x8xf32, #tpu.memory_space<vmem>>, vector<1x1x8x8xf32>,
    %cst_47 = arith.constant dense<0.000000e+00> : vector<8x8xf32>
    %98 = tpu.matmul %94, %79, %cst_47 {dimension_numbers = #tpu.dot_dimension_numbers<[1], [0], [0], [1], [0, 0, 1, 1], [], []>} : vector<8x8xf32>, vector<8x8xf32>, vector<8x8xf32> -> vector<8x8xf32>
    %99 = vector.extract_strided_slice %5 {offsets = [16, 0], sizes = [8, 32], strides = [1, 1]} : vector<32x32xf32> to vector<8x32xf32>
    %cst_48 = arith.constant dense<0.000000e+00> : vector<8x32xf32>
    %100 = tpu.matmul %98, %99, %cst_48 {dimension_numbers = #tpu.dot_dimension_numbers<[1], [0], [0], [1], [0, 0, 1, 1], [], []>} : vector<8x8xf32>, vector<8x32xf32>, vector<8x32xf32> -> vector<8x32xf32>
    %101 = arith.addf %76, %100 : vector<8x32xf32>
    %102 = vector.extract_strided_slice %23 {offsets = [0, 24], sizes = [8, 8], strides = [1, 1]} : vector<8x96xf32> to vector<8x8xf32>
    %103 = vector.extract_strided_slice %23 {offsets = [0, 56], sizes = [8, 8], strides = [1, 1]} : vector<8x96xf32> to vector<8x8xf32>
    %104 = vector.extract_strided_slice %23 {offsets = [0, 88], sizes = [8, 8], strides = [1, 1]} : vector<8x96xf32> to vector<8x8xf32>
    %105 = tpu.transpose %103, [1, 0] : vector<8x8xf32> -> vector<8x8xf32>
    %cst_49 = arith.constant dense<0.000000e+00> : vector<8x8xf32>
    %106 = tpu.matmul %102, %105, %cst_49 {dimension_numbers = #tpu.dot_dimension_numbers<[1], [0], [0], [1], [0, 0, 1, 1], [], []>} : vector<8x8xf32>, vector<8x8xf32>, vector<8x8xf32> -> vector<8x8xf32>
    %cst_50 = arith.constant 0.353553385 : f32
    %107 = vector.broadcast %cst_50 : f32 to vector<8x8xf32>
    %108 = arith.mulf %106, %107 : vector<8x8xf32>
    %109 = arith.addf %108, %25 : vector<8x8xf32>
    %cst_51 = arith.constant dense<0xFF800000> : vector<8xf32>
    %110 = vector.multi_reduction <maximumf>, %109, %cst_51 [1] : vector<8x8xf32> to vector<8xf32>
    %111 = vector.shape_cast %110 : vector<8xf32> to vector<8x1xf32>
    %112 = vector.broadcast %111 : vector<8x1xf32> to vector<8x8xf32>
    %113 = arith.subf %109, %112 : vector<8x8xf32>
    %114 = math.exp %113 : vector<8x8xf32>
    %cst_52 = arith.constant dense<0.000000e+00> : vector<8xf32>
    %115 = vector.multi_reduction <add>, %114, %cst_52 [1] : vector<8x8xf32> to vector<8xf32>
    %116 = vector.shape_cast %115 : vector<8xf32> to vector<8x1xf32>
    %117 = tpu.reciprocal %116 {approx = true} : vector<8x1xf32> -> vector<8x1xf32>
    %118 = vector.broadcast %117 : vector<8x1xf32> to vector<8x8xf32>
    %119 = arith.mulf %114, %118 : vector<8x8xf32>
    %c0_53 = arith.constant 0 : index
    %c3 = arith.constant 3 : index
    %c0_54 = arith.constant 0 : index
    %c0_55 = arith.constant 0 : index
    %120 = vector.load %arg9[%c0_53, %c3, %c0_54, %c0_55] : memref<2x8x8x8xf32, #tpu.memory_space<vmem>>, vector<1x1x8x8xf32>
    %121 = vector.shape_cast %120 : vector<1x1x8x8xf32> to vector<8x8xf32>
    %122 = vector.shape_cast %119 : vector<8x8xf32> to vector<1x1x8x8xf32>
    tpu.vector_store %arg9[%c0_53, %c3, %c0_54, %c0_55], %122 {strides = array<i32>} : memref<2x8x8x8xf32, #tpu.memory_space<vmem>>, vector<1x1x8x8xf32>,
    %cst_56 = arith.constant dense<0.000000e+00> : vector<8x8xf32>
    %123 = tpu.matmul %119, %104, %cst_56 {dimension_numbers = #tpu.dot_dimension_numbers<[1], [0], [0], [1], [0, 0, 1, 1], [], []>} : vector<8x8xf32>, vector<8x8xf32>, vector<8x8xf32> -> vector<8x8xf32>
    %124 = vector.extract_strided_slice %5 {offsets = [24, 0], sizes = [8, 32], strides = [1, 1]} : vector<32x32xf32> to vector<8x32xf32>
    %cst_57 = arith.constant dense<0.000000e+00> : vector<8x32xf32>
    %125 = tpu.matmul %123, %124, %cst_57 {dimension_numbers = #tpu.dot_dimension_numbers<[1], [0], [0], [1], [0, 0, 1, 1], [], []>} : vector<8x8xf32>, vector<8x32xf32>, vector<8x32xf32> -> vector<8x32xf32>
    %126 = arith.addf %101, %125 : vector<8x32xf32>
    %127 = vector.extract_strided_slice %22 {offsets = [8, 0], sizes = [8, 96], strides = [1, 1]} : vector<16x96xf32> to vector<8x96xf32>
    %c1_58 = arith.constant 1 : index
    %c0_59 = arith.constant 0 : index
    %c0_60 = arith.constant 0 : index
    %128 = vector.load %arg2[%c1_58, %c0_59, %c0_60] : memref<2x8x8xf32, #tpu.memory_space<vmem>>, vector<1x8x8xf32>
    %129 = vector.shape_cast %128 : vector<1x8x8xf32> to vector<8x8xf32>
    %cst_61 = arith.constant 0.000000e+00 : f32
    %130 = vector.broadcast %cst_61 : f32 to vector<8x32xf32>
    %131 = vector.extract_strided_slice %127 {offsets = [0, 0], sizes = [8, 8], strides = [1, 1]} : vector<8x96xf32> to vector<8x8xf32>
    %132 = vector.extract_strided_slice %127 {offsets = [0, 32], sizes = [8, 8], strides = [1, 1]} : vector<8x96xf32> to vector<8x8xf32>
    %133 = vector.extract_strided_slice %127 {offsets = [0, 64], sizes = [8, 8], strides = [1, 1]} : vector<8x96xf32> to vector<8x8xf32>
    %134 = tpu.transpose %132, [1, 0] : vector<8x8xf32> -> vector<8x8xf32>
    %cst_62 = arith.constant dense<0.000000e+00> : vector<8x8xf32>
    %135 = tpu.matmul %131, %134, %cst_62 {dimension_numbers = #tpu.dot_dimension_numbers<[1], [0], [0], [1], [0, 0, 1, 1], [], []>} : vector<8x8xf32>, vector<8x8xf32>, vector<8x8xf32> -> vector<8x8xf32>
    %cst_63 = arith.constant 0.353553385 : f32
    %136 = vector.broadcast %cst_63 : f32 to vector<8x8xf32>
    %137 = arith.mulf %135, %136 : vector<8x8xf32>
    %138 = arith.addf %137, %129 : vector<8x8xf32>
    %cst_64 = arith.constant dense<0xFF800000> : vector<8xf32>
    %139 = vector.multi_reduction <maximumf>, %138, %cst_64 [1] : vector<8x8xf32> to vector<8xf32>
    %140 = vector.shape_cast %139 : vector<8xf32> to vector<8x1xf32>
    %141 = vector.broadcast %140 : vector<8x1xf32> to vector<8x8xf32>
    %142 = arith.subf %138, %141 : vector<8x8xf32>
    %143 = math.exp %142 : vector<8x8xf32>
    %cst_65 = arith.constant dense<0.000000e+00> : vector<8xf32>
    %144 = vector.multi_reduction <add>, %143, %cst_65 [1] : vector<8x8xf32> to vector<8xf32>
    %145 = vector.shape_cast %144 : vector<8xf32> to vector<8x1xf32>
    %146 = tpu.reciprocal %145 {approx = true} : vector<8x1xf32> -> vector<8x1xf32>
    %147 = vector.broadcast %146 : vector<8x1xf32> to vector<8x8xf32>
    %148 = arith.mulf %143, %147 : vector<8x8xf32>
    %c1_66 = arith.constant 1 : index
    %c0_67 = arith.constant 0 : index
    %c0_68 = arith.constant 0 : index
    %c0_69 = arith.constant 0 : index
    %149 = vector.load %arg9[%c1_66, %c0_67, %c0_68, %c0_69] : memref<2x8x8x8xf32, #tpu.memory_space<vmem>>, vector<1x1x8x8xf32>
    %150 = vector.shape_cast %149 : vector<1x1x8x8xf32> to vector<8x8xf32>
    %151 = vector.shape_cast %148 : vector<8x8xf32> to vector<1x1x8x8xf32>
    tpu.vector_store %arg9[%c1_66, %c0_67, %c0_68, %c0_69], %151 {strides = array<i32>} : memref<2x8x8x8xf32, #tpu.memory_space<vmem>>, vector<1x1x8x8xf32>,
    %cst_70 = arith.constant dense<0.000000e+00> : vector<8x8xf32>
    %152 = tpu.matmul %148, %133, %cst_70 {dimension_numbers = #tpu.dot_dimension_numbers<[1], [0], [0], [1], [0, 0, 1, 1], [], []>} : vector<8x8xf32>, vector<8x8xf32>, vector<8x8xf32> -> vector<8x8xf32>
    %153 = vector.extract_strided_slice %5 {offsets = [0, 0], sizes = [8, 32], strides = [1, 1]} : vector<32x32xf32> to vector<8x32xf32>
    %cst_71 = arith.constant dense<0.000000e+00> : vector<8x32xf32>
    %154 = tpu.matmul %152, %153, %cst_71 {dimension_numbers = #tpu.dot_dimension_numbers<[1], [0], [0], [1], [0, 0, 1, 1], [], []>} : vector<8x8xf32>, vector<8x32xf32>, vector<8x32xf32> -> vector<8x32xf32>
    %155 = arith.addf %130, %154 : vector<8x32xf32>
    %156 = vector.extract_strided_slice %127 {offsets = [0, 8], sizes = [8, 8], strides = [1, 1]} : vector<8x96xf32> to vector<8x8xf32>
    %157 = vector.extract_strided_slice %127 {offsets = [0, 40], sizes = [8, 8], strides = [1, 1]} : vector<8x96xf32> to vector<8x8xf32>
    %158 = vector.extract_strided_slice %127 {offsets = [0, 72], sizes = [8, 8], strides = [1, 1]} : vector<8x96xf32> to vector<8x8xf32>
    %159 = tpu.transpose %157, [1, 0] : vector<8x8xf32> -> vector<8x8xf32>
    %cst_72 = arith.constant dense<0.000000e+00> : vector<8x8xf32>
    %160 = tpu.matmul %156, %159, %cst_72 {dimension_numbers = #tpu.dot_dimension_numbers<[1], [0], [0], [1], [0, 0, 1, 1], [], []>} : vector<8x8xf32>, vector<8x8xf32>, vector<8x8xf32> -> vector<8x8xf32>
    %cst_73 = arith.constant 0.353553385 : f32
    %161 = vector.broadcast %cst_73 : f32 to vector<8x8xf32>
    %162 = arith.mulf %160, %161 : vector<8x8xf32>
    %163 = arith.addf %162, %129 : vector<8x8xf32>
    %cst_74 = arith.constant dense<0xFF800000> : vector<8xf32>
    %164 = vector.multi_reduction <maximumf>, %163, %cst_74 [1] : vector<8x8xf32> to vector<8xf32>
    %165 = vector.shape_cast %164 : vector<8xf32> to vector<8x1xf32>
    %166 = vector.broadcast %165 : vector<8x1xf32> to vector<8x8xf32>
    %167 = arith.subf %163, %166 : vector<8x8xf32>
    %168 = math.exp %167 : vector<8x8xf32>
    %cst_75 = arith.constant dense<0.000000e+00> : vector<8xf32>
    %169 = vector.multi_reduction <add>, %168, %cst_75 [1] : vector<8x8xf32> to vector<8xf32>
    %170 = vector.shape_cast %169 : vector<8xf32> to vector<8x1xf32>
    %171 = tpu.reciprocal %170 {approx = true} : vector<8x1xf32> -> vector<8x1xf32>
    %172 = vector.broadcast %171 : vector<8x1xf32> to vector<8x8xf32>
    %173 = arith.mulf %168, %172 : vector<8x8xf32>
    %c1_76 = arith.constant 1 : index
    %c1_77 = arith.constant 1 : index
    %c0_78 = arith.constant 0 : index
    %c0_79 = arith.constant 0 : index
    %174 = vector.load %arg9[%c1_76, %c1_77, %c0_78, %c0_79] : memref<2x8x8x8xf32, #tpu.memory_space<vmem>>, vector<1x1x8x8xf32>
    %175 = vector.shape_cast %174 : vector<1x1x8x8xf32> to vector<8x8xf32>
    %176 = vector.shape_cast %173 : vector<8x8xf32> to vector<1x1x8x8xf32>
    tpu.vector_store %arg9[%c1_76, %c1_77, %c0_78, %c0_79], %176 {strides = array<i32>} : memref<2x8x8x8xf32, #tpu.memory_space<vmem>>, vector<1x1x8x8xf32>,
    %cst_80 = arith.constant dense<0.000000e+00> : vector<8x8xf32>
    %177 = tpu.matmul %173, %158, %cst_80 {dimension_numbers = #tpu.dot_dimension_numbers<[1], [0], [0], [1], [0, 0, 1, 1], [], []>} : vector<8x8xf32>, vector<8x8xf32>, vector<8x8xf32> -> vector<8x8xf32>
    %178 = vector.extract_strided_slice %5 {offsets = [8, 0], sizes = [8, 32], strides = [1, 1]} : vector<32x32xf32> to vector<8x32xf32>
    %cst_81 = arith.constant dense<0.000000e+00> : vector<8x32xf32>
    %179 = tpu.matmul %177, %178, %cst_81 {dimension_numbers = #tpu.dot_dimension_numbers<[1], [0], [0], [1], [0, 0, 1, 1], [], []>} : vector<8x8xf32>, vector<8x32xf32>, vector<8x32xf32> -> vector<8x32xf32>
    %180 = arith.addf %155, %179 : vector<8x32xf32>
    %181 = vector.extract_strided_slice %127 {offsets = [0, 16], sizes = [8, 8], strides = [1, 1]} : vector<8x96xf32> to vector<8x8xf32>
    %182 = vector.extract_strided_slice %127 {offsets = [0, 48], sizes = [8, 8], strides = [1, 1]} : vector<8x96xf32> to vector<8x8xf32>
    %183 = vector.extract_strided_slice %127 {offsets = [0, 80], sizes = [8, 8], strides = [1, 1]} : vector<8x96xf32> to vector<8x8xf32>
    %184 = tpu.transpose %182, [1, 0] : vector<8x8xf32> -> vector<8x8xf32>
    %cst_82 = arith.constant dense<0.000000e+00> : vector<8x8xf32>
    %185 = tpu.matmul %181, %184, %cst_82 {dimension_numbers = #tpu.dot_dimension_numbers<[1], [0], [0], [1], [0, 0, 1, 1], [], []>} : vector<8x8xf32>, vector<8x8xf32>, vector<8x8xf32> -> vector<8x8xf32>
    %cst_83 = arith.constant 0.353553385 : f32
    %186 = vector.broadcast %cst_83 : f32 to vector<8x8xf32>
    %187 = arith.mulf %185, %186 : vector<8x8xf32>
    %188 = arith.addf %187, %129 : vector<8x8xf32>
    %cst_84 = arith.constant dense<0xFF800000> : vector<8xf32>
    %189 = vector.multi_reduction <maximumf>, %188, %cst_84 [1] : vector<8x8xf32> to vector<8xf32>
    %190 = vector.shape_cast %189 : vector<8xf32> to vector<8x1xf32>
    %191 = vector.broadcast %190 : vector<8x1xf32> to vector<8x8xf32>
    %192 = arith.subf %188, %191 : vector<8x8xf32>
    %193 = math.exp %192 : vector<8x8xf32>
    %cst_85 = arith.constant dense<0.000000e+00> : vector<8xf32>
    %194 = vector.multi_reduction <add>, %193, %cst_85 [1] : vector<8x8xf32> to vector<8xf32>
    %195 = vector.shape_cast %194 : vector<8xf32> to vector<8x1xf32>
    %196 = tpu.reciprocal %195 {approx = true} : vector<8x1xf32> -> vector<8x1xf32>
    %197 = vector.broadcast %196 : vector<8x1xf32> to vector<8x8xf32>
    %198 = arith.mulf %193, %197 : vector<8x8xf32>
    %c1_86 = arith.constant 1 : index
    %c2_87 = arith.constant 2 : index
    %c0_88 = arith.constant 0 : index
    %c0_89 = arith.constant 0 : index
    %199 = vector.load %arg9[%c1_86, %c2_87, %c0_88, %c0_89] : memref<2x8x8x8xf32, #tpu.memory_space<vmem>>, vector<1x1x8x8xf32>
    %200 = vector.shape_cast %199 : vector<1x1x8x8xf32> to vector<8x8xf32>
    %201 = vector.shape_cast %198 : vector<8x8xf32> to vector<1x1x8x8xf32>
    tpu.vector_store %arg9[%c1_86, %c2_87, %c0_88, %c0_89], %201 {strides = array<i32>} : memref<2x8x8x8xf32, #tpu.memory_space<vmem>>, vector<1x1x8x8xf32>,
    %cst_90 = arith.constant dense<0.000000e+00> : vector<8x8xf32>
    %202 = tpu.matmul %198, %183, %cst_90 {dimension_numbers = #tpu.dot_dimension_numbers<[1], [0], [0], [1], [0, 0, 1, 1], [], []>} : vector<8x8xf32>, vector<8x8xf32>, vector<8x8xf32> -> vector<8x8xf32>
    %203 = vector.extract_strided_slice %5 {offsets = [16, 0], sizes = [8, 32], strides = [1, 1]} : vector<32x32xf32> to vector<8x32xf32>
    %cst_91 = arith.constant dense<0.000000e+00> : vector<8x32xf32>
    %204 = tpu.matmul %202, %203, %cst_91 {dimension_numbers = #tpu.dot_dimension_numbers<[1], [0], [0], [1], [0, 0, 1, 1], [], []>} : vector<8x8xf32>, vector<8x32xf32>, vector<8x32xf32> -> vector<8x32xf32>
    %205 = arith.addf %180, %204 : vector<8x32xf32>
    %206 = vector.extract_strided_slice %127 {offsets = [0, 24], sizes = [8, 8], strides = [1, 1]} : vector<8x96xf32> to vector<8x8xf32>
    %207 = vector.extract_strided_slice %127 {offsets = [0, 56], sizes = [8, 8], strides = [1, 1]} : vector<8x96xf32> to vector<8x8xf32>
    %208 = vector.extract_strided_slice %127 {offsets = [0, 88], sizes = [8, 8], strides = [1, 1]} : vector<8x96xf32> to vector<8x8xf32>
    %209 = tpu.transpose %207, [1, 0] : vector<8x8xf32> -> vector<8x8xf32>
    %cst_92 = arith.constant dense<0.000000e+00> : vector<8x8xf32>
    %210 = tpu.matmul %206, %209, %cst_92 {dimension_numbers = #tpu.dot_dimension_numbers<[1], [0], [0], [1], [0, 0, 1, 1], [], []>} : vector<8x8xf32>, vector<8x8xf32>, vector<8x8xf32> -> vector<8x8xf32>
    %cst_93 = arith.constant 0.353553385 : f32
    %211 = vector.broadcast %cst_93 : f32 to vector<8x8xf32>
    %212 = arith.mulf %210, %211 : vector<8x8xf32>
    %213 = arith.addf %212, %129 : vector<8x8xf32>
    %cst_94 = arith.constant dense<0xFF800000> : vector<8xf32>
    %214 = vector.multi_reduction <maximumf>, %213, %cst_94 [1] : vector<8x8xf32> to vector<8xf32>
    %215 = vector.shape_cast %214 : vector<8xf32> to vector<8x1xf32>
    %216 = vector.broadcast %215 : vector<8x1xf32> to vector<8x8xf32>
    %217 = arith.subf %213, %216 : vector<8x8xf32>
    %218 = math.exp %217 : vector<8x8xf32>
    %cst_95 = arith.constant dense<0.000000e+00> : vector<8xf32>
    %219 = vector.multi_reduction <add>, %218, %cst_95 [1] : vector<8x8xf32> to vector<8xf32>
    %220 = vector.shape_cast %219 : vector<8xf32> to vector<8x1xf32>
    %221 = tpu.reciprocal %220 {approx = true} : vector<8x1xf32> -> vector<8x1xf32>
    %222 = vector.broadcast %221 : vector<8x1xf32> to vector<8x8xf32>
    %223 = arith.mulf %218, %222 : vector<8x8xf32>
    %c1_96 = arith.constant 1 : index
    %c3_97 = arith.constant 3 : index
    %c0_98 = arith.constant 0 : index
    %c0_99 = arith.constant 0 : index
    %224 = vector.load %arg9[%c1_96, %c3_97, %c0_98, %c0_99] : memref<2x8x8x8xf32, #tpu.memory_space<vmem>>, vector<1x1x8x8xf32>
    %225 = vector.shape_cast %224 : vector<1x1x8x8xf32> to vector<8x8xf32>
    %226 = vector.shape_cast %223 : vector<8x8xf32> to vector<1x1x8x8xf32>
    tpu.vector_store %arg9[%c1_96, %c3_97, %c0_98, %c0_99], %226 {strides = array<i32>} : memref<2x8x8x8xf32, #tpu.memory_space<vmem>>, vector<1x1x8x8xf32>,
    %cst_100 = arith.constant dense<0.000000e+00> : vector<8x8xf32>
    %227 = tpu.matmul %223, %208, %cst_100 {dimension_numbers = #tpu.dot_dimension_numbers<[1], [0], [0], [1], [0, 0, 1, 1], [], []>} : vector<8x8xf32>, vector<8x8xf32>, vector<8x8xf32> -> vector<8x8xf32>
    %228 = vector.extract_strided_slice %5 {offsets = [24, 0], sizes = [8, 32], strides = [1, 1]} : vector<32x32xf32> to vector<8x32xf32>
    %cst_101 = arith.constant dense<0.000000e+00> : vector<8x32xf32>
    %229 = tpu.matmul %227, %228, %cst_101 {dimension_numbers = #tpu.dot_dimension_numbers<[1], [0], [0], [1], [0, 0, 1, 1], [], []>} : vector<8x8xf32>, vector<8x32xf32>, vector<8x32xf32> -> vector<8x32xf32>
    %230 = arith.addf %205, %229 : vector<8x32xf32>
    %231 = tpu.concatenate %126, %230 in 0 : vector<8x32xf32>, vector<8x32xf32> -> vector<16x32xf32>
    %232 = arith.addf %1, %231 : vector<16x32xf32>
    %233 = vector.broadcast %13 : vector<1x32xf32> to vector<16x32xf32>
    %234 = arith.addf %232, %233 : vector<16x32xf32>
    %cst_102 = arith.constant dense<0.000000e+00> : vector<16xf32>
    %235 = vector.multi_reduction <add>, %234, %cst_102 [1] : vector<16x32xf32> to vector<16xf32>
    %236 = vector.shape_cast %235 : vector<16xf32> to vector<16x1xf32>
    %cst_103 = arith.constant 3.200000e+01 : f32
    %237 = vector.broadcast %cst_103 : f32 to vector<16x1xf32>
    %238 = arith.divf %236, %237 : vector<16x1xf32>
    %239 = vector.broadcast %238 : vector<16x1xf32> to vector<16x32xf32>
    %240 = arith.subf %234, %239 : vector<16x32xf32>
    %241 = arith.mulf %240, %240 : vector<16x32xf32>
    %cst_104 = arith.constant dense<0.000000e+00> : vector<16xf32>
    %242 = vector.multi_reduction <add>, %241, %cst_104 [1] : vector<16x32xf32> to vector<16xf32>
    %243 = vector.shape_cast %242 : vector<16xf32> to vector<16x1xf32>
    %cst_105 = arith.constant 3.200000e+01 : f32
    %244 = vector.broadcast %cst_105 : f32 to vector<16x1xf32>
    %245 = arith.divf %243, %244 : vector<16x1xf32>
    %246 = vector.broadcast %238 : vector<16x1xf32> to vector<16x32xf32>
    %247 = arith.subf %234, %246 : vector<16x32xf32>
    %cst_106 = arith.constant 9.99999997E-7 : f32
    %248 = vector.broadcast %cst_106 : f32 to vector<16x1xf32>
    %249 = arith.addf %245, %248 : vector<16x1xf32>
    %250 = math.rsqrt %249 : vector<16x1xf32>
    %251 = vector.broadcast %250 : vector<16x1xf32> to vector<16x32xf32>
    %252 = arith.mulf %247, %251 : vector<16x32xf32>
    %253 = vector.broadcast %16 : vector<1x32xf32> to vector<16x32xf32>
    %254 = arith.mulf %252, %253 : vector<16x32xf32>
    %255 = vector.broadcast %17 : vector<1x32xf32> to vector<16x32xf32>
    %256 = arith.addf %254, %255 : vector<16x32xf32>
    %cst_107 = arith.constant dense<0.000000e+00> : vector<16x64xf32>
    %257 = tpu.matmul %256, %7, %cst_107 {dimension_numbers = #tpu.dot_dimension_numbers<[1], [0], [0], [1], [0, 0, 1, 1], [], []>} : vector<16x32xf32>, vector<32x64xf32>, vector<16x64xf32> -> vector<16x64xf32>
    %258 = vector.broadcast %14 : vector<1x64xf32> to vector<16x64xf32>
    %259 = arith.addf %257, %258 : vector<16x64xf32>
    %cst_108 = arith.constant 5.000000e-01 : f32
    %260 = vector.broadcast %cst_108 : f32 to vector<16x64xf32>
    %261 = arith.mulf %260, %259 : vector<16x64xf32>
    %cst_109 = arith.constant 2.000000e+00 : f32
    %262 = math.sqrt %cst_109 : f32
    %263 = vector.broadcast %262 : f32 to vector<16x64xf32>
    %264 = arith.divf %259, %263 : vector<16x64xf32>
    %265 = math.erf %264 : vector<16x64xf32>
    %cst_110 = arith.constant 1.000000e+00 : f32
    %266 = vector.broadcast %cst_110 : f32 to vector<16x64xf32>
    %267 = arith.addf %266, %265 : vector<16x64xf32>
    %268 = arith.mulf %261, %267 : vector<16x64xf32>
    %cst_111 = arith.constant dense<0.000000e+00> : vector<16x32xf32>
    %269 = tpu.matmul %268, %9, %cst_111 {dimension_numbers = #tpu.dot_dimension_numbers<[1], [0], [0], [1], [0, 0, 1, 1], [], []>} : vector<16x64xf32>, vector<64x32xf32>, vector<16x32xf32> -> vector<16x32xf32>
    %270 = vector.broadcast %15 : vector<1x32xf32> to vector<16x32xf32>
    %271 = arith.addf %269, %270 : vector<16x32xf32>
    %272 = arith.addf %256, %271 : vector<16x32xf32>
    %cst_112 = arith.constant dense<0.000000e+00> : vector<16xf32>
    %273 = vector.multi_reduction <add>, %272, %cst_112 [1] : vector<16x32xf32> to vector<16xf32>
    %274 = vector.shape_cast %273 : vector<16xf32> to vector<16x1xf32>
    %cst_113 = arith.constant 3.200000e+01 : f32
    %275 = vector.broadcast %cst_113 : f32 to vector<16x1xf32>
    %276 = arith.divf %274, %275 : vector<16x1xf32>
    %277 = vector.broadcast %276 : vector<16x1xf32> to vector<16x32xf32>
    %278 = arith.subf %272, %277 : vector<16x32xf32>
    %279 = arith.mulf %278, %278 : vector<16x32xf32>
    %cst_114 = arith.constant dense<0.000000e+00> : vector<16xf32>
    %280 = vector.multi_reduction <add>, %279, %cst_114 [1] : vector<16x32xf32> to vector<16xf32>
    %281 = vector.shape_cast %280 : vector<16xf32> to vector<16x1xf32>
    %cst_115 = arith.constant 3.200000e+01 : f32
    %282 = vector.broadcast %cst_115 : f32 to vector<16x1xf32>
    %283 = arith.divf %281, %282 : vector<16x1xf32>
    %284 = vector.broadcast %276 : vector<16x1xf32> to vector<16x32xf32>
    %285 = arith.subf %272, %284 : vector<16x32xf32>
    %cst_116 = arith.constant 9.99999997E-7 : f32
    %286 = vector.broadcast %cst_116 : f32 to vector<16x1xf32>
    %287 = arith.addf %283, %286 : vector<16x1xf32>
    %288 = math.rsqrt %287 : vector<16x1xf32>
    %289 = vector.broadcast %288 : vector<16x1xf32> to vector<16x32xf32>
    %290 = arith.mulf %285, %289 : vector<16x32xf32>
    %291 = vector.broadcast %18 : vector<1x32xf32> to vector<16x32xf32>
    %292 = arith.mulf %290, %291 : vector<16x32xf32>
    %293 = vector.broadcast %19 : vector<1x32xf32> to vector<16x32xf32>
    %294 = arith.addf %292, %293 : vector<16x32xf32>
    %c1_117 = arith.constant 1 : index
    %c0_118 = arith.constant 0 : index
    %c0_119 = arith.constant 0 : index
    %295 = vector.load %arg3[%c1_117, %c0_118, %c0_119] : memref<2x32x96xf32, #tpu.memory_space<vmem>>, vector<1x32x96xf32>
    %296 = vector.shape_cast %295 : vector<1x32x96xf32> to vector<32x96xf32>
    %c1_120 = arith.constant 1 : index
    %c0_121 = arith.constant 0 : index
    %c0_122 = arith.constant 0 : index
    %297 = vector.load %arg4[%c1_120, %c0_121, %c0_122] : memref<2x32x32xf32, #tpu.memory_space<vmem>>, vector<1x32x32xf32>
    %298 = vector.shape_cast %297 : vector<1x32x32xf32> to vector<32x32xf32>
    %c1_123 = arith.constant 1 : index
    %c0_124 = arith.constant 0 : index
    %c0_125 = arith.constant 0 : index
    %299 = vector.load %arg5[%c1_123, %c0_124, %c0_125] : memref<2x32x64xf32, #tpu.memory_space<vmem>>, vector<1x32x64xf32>
    %300 = vector.shape_cast %299 : vector<1x32x64xf32> to vector<32x64xf32>
    %c1_126 = arith.constant 1 : index
    %c0_127 = arith.constant 0 : index
    %c0_128 = arith.constant 0 : index
    %301 = vector.load %arg6[%c1_126, %c0_127, %c0_128] : memref<2x64x32xf32, #tpu.memory_space<vmem>>, vector<1x64x32xf32>
    %302 = vector.shape_cast %301 : vector<1x64x32xf32> to vector<64x32xf32>
    %c1_129 = arith.constant 1 : index
    %c0_130 = arith.constant 0 : index
    %c0_131 = arith.constant 0 : index
    %303 = vector.load %arg7[%c1_129, %c0_130, %c0_131] : memref<2x8x128xf32, #tpu.memory_space<vmem>>, vector<1x8x128xf32>
    %304 = vector.shape_cast %303 : vector<1x8x128xf32> to vector<8x128xf32>
    %305 = vector.extract_strided_slice %304 {offsets = [0, 0], sizes = [1, 96], strides = [1, 1]} : vector<8x128xf32> to vector<1x96xf32>
    %306 = vector.extract_strided_slice %304 {offsets = [1, 0], sizes = [1, 32], strides = [1, 1]} : vector<8x128xf32> to vector<1x32xf32>
    %307 = vector.extract_strided_slice %304 {offsets = [2, 0], sizes = [1, 64], strides = [1, 1]} : vector<8x128xf32> to vector<1x64xf32>
    %308 = vector.extract_strided_slice %304 {offsets = [3, 0], sizes = [1, 32], strides = [1, 1]} : vector<8x128xf32> to vector<1x32xf32>
    %309 = vector.extract_strided_slice %304 {offsets = [4, 0], sizes = [1, 32], strides = [1, 1]} : vector<8x128xf32> to vector<1x32xf32>
    %310 = vector.extract_strided_slice %304 {offsets = [5, 0], sizes = [1, 32], strides = [1, 1]} : vector<8x128xf32> to vector<1x32xf32>
    %311 = vector.extract_strided_slice %304 {offsets = [6, 0], sizes = [1, 32], strides = [1, 1]} : vector<8x128xf32> to vector<1x32xf32>
    %312 = vector.extract_strided_slice %304 {offsets = [7, 0], sizes = [1, 32], strides = [1, 1]} : vector<8x128xf32> to vector<1x32xf32>
    %cst_132 = arith.constant dense<0.000000e+00> : vector<16x96xf32>
    %313 = tpu.matmul %294, %296, %cst_132 {dimension_numbers = #tpu.dot_dimension_numbers<[1], [0], [0], [1], [0, 0, 1, 1], [], []>} : vector<16x32xf32>, vector<32x96xf32>, vector<16x96xf32> -> vector<16x96xf32>
    %314 = vector.broadcast %305 : vector<1x96xf32> to vector<16x96xf32>
    %315 = arith.addf %313, %314 : vector<16x96xf32>
    %316 = vector.extract_strided_slice %315 {offsets = [0, 0], sizes = [8, 96], strides = [1, 1]} : vector<16x96xf32> to vector<8x96xf32>
    %c0_133 = arith.constant 0 : index
    %c0_134 = arith.constant 0 : index
    %c0_135 = arith.constant 0 : index
    %317 = vector.load %arg2[%c0_133, %c0_134, %c0_135] : memref<2x8x8xf32, #tpu.memory_space<vmem>>, vector<1x8x8xf32>
    %318 = vector.shape_cast %317 : vector<1x8x8xf32> to vector<8x8xf32>
    %cst_136 = arith.constant 0.000000e+00 : f32
    %319 = vector.broadcast %cst_136 : f32 to vector<8x32xf32>
    %320 = vector.extract_strided_slice %316 {offsets = [0, 0], sizes = [8, 8], strides = [1, 1]} : vector<8x96xf32> to vector<8x8xf32>
    %321 = vector.extract_strided_slice %316 {offsets = [0, 32], sizes = [8, 8], strides = [1, 1]} : vector<8x96xf32> to vector<8x8xf32>
    %322 = vector.extract_strided_slice %316 {offsets = [0, 64], sizes = [8, 8], strides = [1, 1]} : vector<8x96xf32> to vector<8x8xf32>
    %323 = tpu.transpose %321, [1, 0] : vector<8x8xf32> -> vector<8x8xf32>
    %cst_137 = arith.constant dense<0.000000e+00> : vector<8x8xf32>
    %324 = tpu.matmul %320, %323, %cst_137 {dimension_numbers = #tpu.dot_dimension_numbers<[1], [0], [0], [1], [0, 0, 1, 1], [], []>} : vector<8x8xf32>, vector<8x8xf32>, vector<8x8xf32> -> vector<8x8xf32>
    %cst_138 = arith.constant 0.353553385 : f32
    %325 = vector.broadcast %cst_138 : f32 to vector<8x8xf32>
    %326 = arith.mulf %324, %325 : vector<8x8xf32>
    %327 = arith.addf %326, %318 : vector<8x8xf32>
    %cst_139 = arith.constant dense<0xFF800000> : vector<8xf32>
    %328 = vector.multi_reduction <maximumf>, %327, %cst_139 [1] : vector<8x8xf32> to vector<8xf32>
    %329 = vector.shape_cast %328 : vector<8xf32> to vector<8x1xf32>
    %330 = vector.broadcast %329 : vector<8x1xf32> to vector<8x8xf32>
    %331 = arith.subf %327, %330 : vector<8x8xf32>
    %332 = math.exp %331 : vector<8x8xf32>
    %cst_140 = arith.constant dense<0.000000e+00> : vector<8xf32>
    %333 = vector.multi_reduction <add>, %332, %cst_140 [1] : vector<8x8xf32> to vector<8xf32>
    %334 = vector.shape_cast %333 : vector<8xf32> to vector<8x1xf32>
    %335 = tpu.reciprocal %334 {approx = true} : vector<8x1xf32> -> vector<8x1xf32>
    %336 = vector.broadcast %335 : vector<8x1xf32> to vector<8x8xf32>
    %337 = arith.mulf %332, %336 : vector<8x8xf32>
    %c0_141 = arith.constant 0 : index
    %c4 = arith.constant 4 : index
    %c0_142 = arith.constant 0 : index
    %c0_143 = arith.constant 0 : index
    %338 = vector.load %arg9[%c0_141, %c4, %c0_142, %c0_143] : memref<2x8x8x8xf32, #tpu.memory_space<vmem>>, vector<1x1x8x8xf32>
    %339 = vector.shape_cast %338 : vector<1x1x8x8xf32> to vector<8x8xf32>
    %340 = vector.shape_cast %337 : vector<8x8xf32> to vector<1x1x8x8xf32>
    tpu.vector_store %arg9[%c0_141, %c4, %c0_142, %c0_143], %340 {strides = array<i32>} : memref<2x8x8x8xf32, #tpu.memory_space<vmem>>, vector<1x1x8x8xf32>,
    %cst_144 = arith.constant dense<0.000000e+00> : vector<8x8xf32>
    %341 = tpu.matmul %337, %322, %cst_144 {dimension_numbers = #tpu.dot_dimension_numbers<[1], [0], [0], [1], [0, 0, 1, 1], [], []>} : vector<8x8xf32>, vector<8x8xf32>, vector<8x8xf32> -> vector<8x8xf32>
    %342 = vector.extract_strided_slice %298 {offsets = [0, 0], sizes = [8, 32], strides = [1, 1]} : vector<32x32xf32> to vector<8x32xf32>
    %cst_145 = arith.constant dense<0.000000e+00> : vector<8x32xf32>
    %343 = tpu.matmul %341, %342, %cst_145 {dimension_numbers = #tpu.dot_dimension_numbers<[1], [0], [0], [1], [0, 0, 1, 1], [], []>} : vector<8x8xf32>, vector<8x32xf32>, vector<8x32xf32> -> vector<8x32xf32>
    %344 = arith.addf %319, %343 : vector<8x32xf32>
    %345 = vector.extract_strided_slice %316 {offsets = [0, 8], sizes = [8, 8], strides = [1, 1]} : vector<8x96xf32> to vector<8x8xf32>
    %346 = vector.extract_strided_slice %316 {offsets = [0, 40], sizes = [8, 8], strides = [1, 1]} : vector<8x96xf32> to vector<8x8xf32>
    %347 = vector.extract_strided_slice %316 {offsets = [0, 72], sizes = [8, 8], strides = [1, 1]} : vector<8x96xf32> to vector<8x8xf32>
    %348 = tpu.transpose %346, [1, 0] : vector<8x8xf32> -> vector<8x8xf32>
    %cst_146 = arith.constant dense<0.000000e+00> : vector<8x8xf32>
    %349 = tpu.matmul %345, %348, %cst_146 {dimension_numbers = #tpu.dot_dimension_numbers<[1], [0], [0], [1], [0, 0, 1, 1], [], []>} : vector<8x8xf32>, vector<8x8xf32>, vector<8x8xf32> -> vector<8x8xf32>
    %cst_147 = arith.constant 0.353553385 : f32
    %350 = vector.broadcast %cst_147 : f32 to vector<8x8xf32>
    %351 = arith.mulf %349, %350 : vector<8x8xf32>
    %352 = arith.addf %351, %318 : vector<8x8xf32>
    %cst_148 = arith.constant dense<0xFF800000> : vector<8xf32>
    %353 = vector.multi_reduction <maximumf>, %352, %cst_148 [1] : vector<8x8xf32> to vector<8xf32>
    %354 = vector.shape_cast %353 : vector<8xf32> to vector<8x1xf32>
    %355 = vector.broadcast %354 : vector<8x1xf32> to vector<8x8xf32>
    %356 = arith.subf %352, %355 : vector<8x8xf32>
    %357 = math.exp %356 : vector<8x8xf32>
    %cst_149 = arith.constant dense<0.000000e+00> : vector<8xf32>
    %358 = vector.multi_reduction <add>, %357, %cst_149 [1] : vector<8x8xf32> to vector<8xf32>
    %359 = vector.shape_cast %358 : vector<8xf32> to vector<8x1xf32>
    %360 = tpu.reciprocal %359 {approx = true} : vector<8x1xf32> -> vector<8x1xf32>
    %361 = vector.broadcast %360 : vector<8x1xf32> to vector<8x8xf32>
    %362 = arith.mulf %357, %361 : vector<8x8xf32>
    %c0_150 = arith.constant 0 : index
    %c5 = arith.constant 5 : index
    %c0_151 = arith.constant 0 : index
    %c0_152 = arith.constant 0 : index
    %363 = vector.load %arg9[%c0_150, %c5, %c0_151, %c0_152] : memref<2x8x8x8xf32, #tpu.memory_space<vmem>>, vector<1x1x8x8xf32>
    %364 = vector.shape_cast %363 : vector<1x1x8x8xf32> to vector<8x8xf32>
    %365 = vector.shape_cast %362 : vector<8x8xf32> to vector<1x1x8x8xf32>
    tpu.vector_store %arg9[%c0_150, %c5, %c0_151, %c0_152], %365 {strides = array<i32>} : memref<2x8x8x8xf32, #tpu.memory_space<vmem>>, vector<1x1x8x8xf32>,
    %cst_153 = arith.constant dense<0.000000e+00> : vector<8x8xf32>
    %366 = tpu.matmul %362, %347, %cst_153 {dimension_numbers = #tpu.dot_dimension_numbers<[1], [0], [0], [1], [0, 0, 1, 1], [], []>} : vector<8x8xf32>, vector<8x8xf32>, vector<8x8xf32> -> vector<8x8xf32>
    %367 = vector.extract_strided_slice %298 {offsets = [8, 0], sizes = [8, 32], strides = [1, 1]} : vector<32x32xf32> to vector<8x32xf32>
    %cst_154 = arith.constant dense<0.000000e+00> : vector<8x32xf32>
    %368 = tpu.matmul %366, %367, %cst_154 {dimension_numbers = #tpu.dot_dimension_numbers<[1], [0], [0], [1], [0, 0, 1, 1], [], []>} : vector<8x8xf32>, vector<8x32xf32>, vector<8x32xf32> -> vector<8x32xf32>
    %369 = arith.addf %344, %368 : vector<8x32xf32>
    %370 = vector.extract_strided_slice %316 {offsets = [0, 16], sizes = [8, 8], strides = [1, 1]} : vector<8x96xf32> to vector<8x8xf32>
    %371 = vector.extract_strided_slice %316 {offsets = [0, 48], sizes = [8, 8], strides = [1, 1]} : vector<8x96xf32> to vector<8x8xf32>
    %372 = vector.extract_strided_slice %316 {offsets = [0, 80], sizes = [8, 8], strides = [1, 1]} : vector<8x96xf32> to vector<8x8xf32>
    %373 = tpu.transpose %371, [1, 0] : vector<8x8xf32> -> vector<8x8xf32>
    %cst_155 = arith.constant dense<0.000000e+00> : vector<8x8xf32>
    %374 = tpu.matmul %370, %373, %cst_155 {dimension_numbers = #tpu.dot_dimension_numbers<[1], [0], [0], [1], [0, 0, 1, 1], [], []>} : vector<8x8xf32>, vector<8x8xf32>, vector<8x8xf32> -> vector<8x8xf32>
    %cst_156 = arith.constant 0.353553385 : f32
    %375 = vector.broadcast %cst_156 : f32 to vector<8x8xf32>
    %376 = arith.mulf %374, %375 : vector<8x8xf32>
    %377 = arith.addf %376, %318 : vector<8x8xf32>
    %cst_157 = arith.constant dense<0xFF800000> : vector<8xf32>
    %378 = vector.multi_reduction <maximumf>, %377, %cst_157 [1] : vector<8x8xf32> to vector<8xf32>
    %379 = vector.shape_cast %378 : vector<8xf32> to vector<8x1xf32>
    %380 = vector.broadcast %379 : vector<8x1xf32> to vector<8x8xf32>
    %381 = arith.subf %377, %380 : vector<8x8xf32>
    %382 = math.exp %381 : vector<8x8xf32>
    %cst_158 = arith.constant dense<0.000000e+00> : vector<8xf32>
    %383 = vector.multi_reduction <add>, %382, %cst_158 [1] : vector<8x8xf32> to vector<8xf32>
    %384 = vector.shape_cast %383 : vector<8xf32> to vector<8x1xf32>
    %385 = tpu.reciprocal %384 {approx = true} : vector<8x1xf32> -> vector<8x1xf32>
    %386 = vector.broadcast %385 : vector<8x1xf32> to vector<8x8xf32>
    %387 = arith.mulf %382, %386 : vector<8x8xf32>
    %c0_159 = arith.constant 0 : index
    %c6 = arith.constant 6 : index
    %c0_160 = arith.constant 0 : index
    %c0_161 = arith.constant 0 : index
    %388 = vector.load %arg9[%c0_159, %c6, %c0_160, %c0_161] : memref<2x8x8x8xf32, #tpu.memory_space<vmem>>, vector<1x1x8x8xf32>
    %389 = vector.shape_cast %388 : vector<1x1x8x8xf32> to vector<8x8xf32>
    %390 = vector.shape_cast %387 : vector<8x8xf32> to vector<1x1x8x8xf32>
    tpu.vector_store %arg9[%c0_159, %c6, %c0_160, %c0_161], %390 {strides = array<i32>} : memref<2x8x8x8xf32, #tpu.memory_space<vmem>>, vector<1x1x8x8xf32>,
    %cst_162 = arith.constant dense<0.000000e+00> : vector<8x8xf32>
    %391 = tpu.matmul %387, %372, %cst_162 {dimension_numbers = #tpu.dot_dimension_numbers<[1], [0], [0], [1], [0, 0, 1, 1], [], []>} : vector<8x8xf32>, vector<8x8xf32>, vector<8x8xf32> -> vector<8x8xf32>
    %392 = vector.extract_strided_slice %298 {offsets = [16, 0], sizes = [8, 32], strides = [1, 1]} : vector<32x32xf32> to vector<8x32xf32>
    %cst_163 = arith.constant dense<0.000000e+00> : vector<8x32xf32>
    %393 = tpu.matmul %391, %392, %cst_163 {dimension_numbers = #tpu.dot_dimension_numbers<[1], [0], [0], [1], [0, 0, 1, 1], [], []>} : vector<8x8xf32>, vector<8x32xf32>, vector<8x32xf32> -> vector<8x32xf32>
    %394 = arith.addf %369, %393 : vector<8x32xf32>
    %395 = vector.extract_strided_slice %316 {offsets = [0, 24], sizes = [8, 8], strides = [1, 1]} : vector<8x96xf32> to vector<8x8xf32>
    %396 = vector.extract_strided_slice %316 {offsets = [0, 56], sizes = [8, 8], strides = [1, 1]} : vector<8x96xf32> to vector<8x8xf32>
    %397 = vector.extract_strided_slice %316 {offsets = [0, 88], sizes = [8, 8], strides = [1, 1]} : vector<8x96xf32> to vector<8x8xf32>
    %398 = tpu.transpose %396, [1, 0] : vector<8x8xf32> -> vector<8x8xf32>
    %cst_164 = arith.constant dense<0.000000e+00> : vector<8x8xf32>
    %399 = tpu.matmul %395, %398, %cst_164 {dimension_numbers = #tpu.dot_dimension_numbers<[1], [0], [0], [1], [0, 0, 1, 1], [], []>} : vector<8x8xf32>, vector<8x8xf32>, vector<8x8xf32> -> vector<8x8xf32>
    %cst_165 = arith.constant 0.353553385 : f32
    %400 = vector.broadcast %cst_165 : f32 to vector<8x8xf32>
    %401 = arith.mulf %399, %400 : vector<8x8xf32>
    %402 = arith.addf %401, %318 : vector<8x8xf32>
    %cst_166 = arith.constant dense<0xFF800000> : vector<8xf32>
    %403 = vector.multi_reduction <maximumf>, %402, %cst_166 [1] : vector<8x8xf32> to vector<8xf32>
    %404 = vector.shape_cast %403 : vector<8xf32> to vector<8x1xf32>
    %405 = vector.broadcast %404 : vector<8x1xf32> to vector<8x8xf32>
    %406 = arith.subf %402, %405 : vector<8x8xf32>
    %407 = math.exp %406 : vector<8x8xf32>
    %cst_167 = arith.constant dense<0.000000e+00> : vector<8xf32>
    %408 = vector.multi_reduction <add>, %407, %cst_167 [1] : vector<8x8xf32> to vector<8xf32>
    %409 = vector.shape_cast %408 : vector<8xf32> to vector<8x1xf32>
    %410 = tpu.reciprocal %409 {approx = true} : vector<8x1xf32> -> vector<8x1xf32>
    %411 = vector.broadcast %410 : vector<8x1xf32> to vector<8x8xf32>
    %412 = arith.mulf %407, %411 : vector<8x8xf32>
    %c0_168 = arith.constant 0 : index
    %c7 = arith.constant 7 : index
    %c0_169 = arith.constant 0 : index
    %c0_170 = arith.constant 0 : index
    %413 = vector.load %arg9[%c0_168, %c7, %c0_169, %c0_170] : memref<2x8x8x8xf32, #tpu.memory_space<vmem>>, vector<1x1x8x8xf32>
    %414 = vector.shape_cast %413 : vector<1x1x8x8xf32> to vector<8x8xf32>
    %415 = vector.shape_cast %412 : vector<8x8xf32> to vector<1x1x8x8xf32>
    tpu.vector_store %arg9[%c0_168, %c7, %c0_169, %c0_170], %415 {strides = array<i32>} : memref<2x8x8x8xf32, #tpu.memory_space<vmem>>, vector<1x1x8x8xf32>,
    %cst_171 = arith.constant dense<0.000000e+00> : vector<8x8xf32>
    %416 = tpu.matmul %412, %397, %cst_171 {dimension_numbers = #tpu.dot_dimension_numbers<[1], [0], [0], [1], [0, 0, 1, 1], [], []>} : vector<8x8xf32>, vector<8x8xf32>, vector<8x8xf32> -> vector<8x8xf32>
    %417 = vector.extract_strided_slice %298 {offsets = [24, 0], sizes = [8, 32], strides = [1, 1]} : vector<32x32xf32> to vector<8x32xf32>
    %cst_172 = arith.constant dense<0.000000e+00> : vector<8x32xf32>
    %418 = tpu.matmul %416, %417, %cst_172 {dimension_numbers = #tpu.dot_dimension_numbers<[1], [0], [0], [1], [0, 0, 1, 1], [], []>} : vector<8x8xf32>, vector<8x32xf32>, vector<8x32xf32> -> vector<8x32xf32>
    %419 = arith.addf %394, %418 : vector<8x32xf32>
    %420 = vector.extract_strided_slice %315 {offsets = [8, 0], sizes = [8, 96], strides = [1, 1]} : vector<16x96xf32> to vector<8x96xf32>
    %c1_173 = arith.constant 1 : index
    %c0_174 = arith.constant 0 : index
    %c0_175 = arith.constant 0 : index
    %421 = vector.load %arg2[%c1_173, %c0_174, %c0_175] : memref<2x8x8xf32, #tpu.memory_space<vmem>>, vector<1x8x8xf32>
    %422 = vector.shape_cast %421 : vector<1x8x8xf32> to vector<8x8xf32>
    %cst_176 = arith.constant 0.000000e+00 : f32
    %423 = vector.broadcast %cst_176 : f32 to vector<8x32xf32>
    %424 = vector.extract_strided_slice %420 {offsets = [0, 0], sizes = [8, 8], strides = [1, 1]} : vector<8x96xf32> to vector<8x8xf32>
    %425 = vector.extract_strided_slice %420 {offsets = [0, 32], sizes = [8, 8], strides = [1, 1]} : vector<8x96xf32> to vector<8x8xf32>
    %426 = vector.extract_strided_slice %420 {offsets = [0, 64], sizes = [8, 8], strides = [1, 1]} : vector<8x96xf32> to vector<8x8xf32>
    %427 = tpu.transpose %425, [1, 0] : vector<8x8xf32> -> vector<8x8xf32>
    %cst_177 = arith.constant dense<0.000000e+00> : vector<8x8xf32>
    %428 = tpu.matmul %424, %427, %cst_177 {dimension_numbers = #tpu.dot_dimension_numbers<[1], [0], [0], [1], [0, 0, 1, 1], [], []>} : vector<8x8xf32>, vector<8x8xf32>, vector<8x8xf32> -> vector<8x8xf32>
    %cst_178 = arith.constant 0.353553385 : f32
    %429 = vector.broadcast %cst_178 : f32 to vector<8x8xf32>
    %430 = arith.mulf %428, %429 : vector<8x8xf32>
    %431 = arith.addf %430, %422 : vector<8x8xf32>
    %cst_179 = arith.constant dense<0xFF800000> : vector<8xf32>
    %432 = vector.multi_reduction <maximumf>, %431, %cst_179 [1] : vector<8x8xf32> to vector<8xf32>
    %433 = vector.shape_cast %432 : vector<8xf32> to vector<8x1xf32>
    %434 = vector.broadcast %433 : vector<8x1xf32> to vector<8x8xf32>
    %435 = arith.subf %431, %434 : vector<8x8xf32>
    %436 = math.exp %435 : vector<8x8xf32>
    %cst_180 = arith.constant dense<0.000000e+00> : vector<8xf32>
    %437 = vector.multi_reduction <add>, %436, %cst_180 [1] : vector<8x8xf32> to vector<8xf32>
    %438 = vector.shape_cast %437 : vector<8xf32> to vector<8x1xf32>
    %439 = tpu.reciprocal %438 {approx = true} : vector<8x1xf32> -> vector<8x1xf32>
    %440 = vector.broadcast %439 : vector<8x1xf32> to vector<8x8xf32>
    %441 = arith.mulf %436, %440 : vector<8x8xf32>
    %c1_181 = arith.constant 1 : index
    %c4_182 = arith.constant 4 : index
    %c0_183 = arith.constant 0 : index
    %c0_184 = arith.constant 0 : index
    %442 = vector.load %arg9[%c1_181, %c4_182, %c0_183, %c0_184] : memref<2x8x8x8xf32, #tpu.memory_space<vmem>>, vector<1x1x8x8xf32>
    %443 = vector.shape_cast %442 : vector<1x1x8x8xf32> to vector<8x8xf32>
    %444 = vector.shape_cast %441 : vector<8x8xf32> to vector<1x1x8x8xf32>
    tpu.vector_store %arg9[%c1_181, %c4_182, %c0_183, %c0_184], %444 {strides = array<i32>} : memref<2x8x8x8xf32, #tpu.memory_space<vmem>>, vector<1x1x8x8xf32>,
    %cst_185 = arith.constant dense<0.000000e+00> : vector<8x8xf32>
    %445 = tpu.matmul %441, %426, %cst_185 {dimension_numbers = #tpu.dot_dimension_numbers<[1], [0], [0], [1], [0, 0, 1, 1], [], []>} : vector<8x8xf32>, vector<8x8xf32>, vector<8x8xf32> -> vector<8x8xf32>
    %446 = vector.extract_strided_slice %298 {offsets = [0, 0], sizes = [8, 32], strides = [1, 1]} : vector<32x32xf32> to vector<8x32xf32>
    %cst_186 = arith.constant dense<0.000000e+00> : vector<8x32xf32>
    %447 = tpu.matmul %445, %446, %cst_186 {dimension_numbers = #tpu.dot_dimension_numbers<[1], [0], [0], [1], [0, 0, 1, 1], [], []>} : vector<8x8xf32>, vector<8x32xf32>, vector<8x32xf32> -> vector<8x32xf32>
    %448 = arith.addf %423, %447 : vector<8x32xf32>
    %449 = vector.extract_strided_slice %420 {offsets = [0, 8], sizes = [8, 8], strides = [1, 1]} : vector<8x96xf32> to vector<8x8xf32>
    %450 = vector.extract_strided_slice %420 {offsets = [0, 40], sizes = [8, 8], strides = [1, 1]} : vector<8x96xf32> to vector<8x8xf32>
    %451 = vector.extract_strided_slice %420 {offsets = [0, 72], sizes = [8, 8], strides = [1, 1]} : vector<8x96xf32> to vector<8x8xf32>
    %452 = tpu.transpose %450, [1, 0] : vector<8x8xf32> -> vector<8x8xf32>
    %cst_187 = arith.constant dense<0.000000e+00> : vector<8x8xf32>
    %453 = tpu.matmul %449, %452, %cst_187 {dimension_numbers = #tpu.dot_dimension_numbers<[1], [0], [0], [1], [0, 0, 1, 1], [], []>} : vector<8x8xf32>, vector<8x8xf32>, vector<8x8xf32> -> vector<8x8xf32>
    %cst_188 = arith.constant 0.353553385 : f32
    %454 = vector.broadcast %cst_188 : f32 to vector<8x8xf32>
    %455 = arith.mulf %453, %454 : vector<8x8xf32>
    %456 = arith.addf %455, %422 : vector<8x8xf32>
    %cst_189 = arith.constant dense<0xFF800000> : vector<8xf32>
    %457 = vector.multi_reduction <maximumf>, %456, %cst_189 [1] : vector<8x8xf32> to vector<8xf32>
    %458 = vector.shape_cast %457 : vector<8xf32> to vector<8x1xf32>
    %459 = vector.broadcast %458 : vector<8x1xf32> to vector<8x8xf32>
    %460 = arith.subf %456, %459 : vector<8x8xf32>
    %461 = math.exp %460 : vector<8x8xf32>
    %cst_190 = arith.constant dense<0.000000e+00> : vector<8xf32>
    %462 = vector.multi_reduction <add>, %461, %cst_190 [1] : vector<8x8xf32> to vector<8xf32>
    %463 = vector.shape_cast %462 : vector<8xf32> to vector<8x1xf32>
    %464 = tpu.reciprocal %463 {approx = true} : vector<8x1xf32> -> vector<8x1xf32>
    %465 = vector.broadcast %464 : vector<8x1xf32> to vector<8x8xf32>
    %466 = arith.mulf %461, %465 : vector<8x8xf32>
    %c1_191 = arith.constant 1 : index
    %c5_192 = arith.constant 5 : index
    %c0_193 = arith.constant 0 : index
    %c0_194 = arith.constant 0 : index
    %467 = vector.load %arg9[%c1_191, %c5_192, %c0_193, %c0_194] : memref<2x8x8x8xf32, #tpu.memory_space<vmem>>, vector<1x1x8x8xf32>
    %468 = vector.shape_cast %467 : vector<1x1x8x8xf32> to vector<8x8xf32>
    %469 = vector.shape_cast %466 : vector<8x8xf32> to vector<1x1x8x8xf32>
    tpu.vector_store %arg9[%c1_191, %c5_192, %c0_193, %c0_194], %469 {strides = array<i32>} : memref<2x8x8x8xf32, #tpu.memory_space<vmem>>, vector<1x1x8x8xf32>,
    %cst_195 = arith.constant dense<0.000000e+00> : vector<8x8xf32>
    %470 = tpu.matmul %466, %451, %cst_195 {dimension_numbers = #tpu.dot_dimension_numbers<[1], [0], [0], [1], [0, 0, 1, 1], [], []>} : vector<8x8xf32>, vector<8x8xf32>, vector<8x8xf32> -> vector<8x8xf32>
    %471 = vector.extract_strided_slice %298 {offsets = [8, 0], sizes = [8, 32], strides = [1, 1]} : vector<32x32xf32> to vector<8x32xf32>
    %cst_196 = arith.constant dense<0.000000e+00> : vector<8x32xf32>
    %472 = tpu.matmul %470, %471, %cst_196 {dimension_numbers = #tpu.dot_dimension_numbers<[1], [0], [0], [1], [0, 0, 1, 1], [], []>} : vector<8x8xf32>, vector<8x32xf32>, vector<8x32xf32> -> vector<8x32xf32>
    %473 = arith.addf %448, %472 : vector<8x32xf32>
    %474 = vector.extract_strided_slice %420 {offsets = [0, 16], sizes = [8, 8], strides = [1, 1]} : vector<8x96xf32> to vector<8x8xf32>
    %475 = vector.extract_strided_slice %420 {offsets = [0, 48], sizes = [8, 8], strides = [1, 1]} : vector<8x96xf32> to vector<8x8xf32>
    %476 = vector.extract_strided_slice %420 {offsets = [0, 80], sizes = [8, 8], strides = [1, 1]} : vector<8x96xf32> to vector<8x8xf32>
    %477 = tpu.transpose %475, [1, 0] : vector<8x8xf32> -> vector<8x8xf32>
    %cst_197 = arith.constant dense<0.000000e+00> : vector<8x8xf32>
    %478 = tpu.matmul %474, %477, %cst_197 {dimension_numbers = #tpu.dot_dimension_numbers<[1], [0], [0], [1], [0, 0, 1, 1], [], []>} : vector<8x8xf32>, vector<8x8xf32>, vector<8x8xf32> -> vector<8x8xf32>
    %cst_198 = arith.constant 0.353553385 : f32
    %479 = vector.broadcast %cst_198 : f32 to vector<8x8xf32>
    %480 = arith.mulf %478, %479 : vector<8x8xf32>
    %481 = arith.addf %480, %422 : vector<8x8xf32>
    %cst_199 = arith.constant dense<0xFF800000> : vector<8xf32>
    %482 = vector.multi_reduction <maximumf>, %481, %cst_199 [1] : vector<8x8xf32> to vector<8xf32>
    %483 = vector.shape_cast %482 : vector<8xf32> to vector<8x1xf32>
    %484 = vector.broadcast %483 : vector<8x1xf32> to vector<8x8xf32>
    %485 = arith.subf %481, %484 : vector<8x8xf32>
    %486 = math.exp %485 : vector<8x8xf32>
    %cst_200 = arith.constant dense<0.000000e+00> : vector<8xf32>
    %487 = vector.multi_reduction <add>, %486, %cst_200 [1] : vector<8x8xf32> to vector<8xf32>
    %488 = vector.shape_cast %487 : vector<8xf32> to vector<8x1xf32>
    %489 = tpu.reciprocal %488 {approx = true} : vector<8x1xf32> -> vector<8x1xf32>
    %490 = vector.broadcast %489 : vector<8x1xf32> to vector<8x8xf32>
    %491 = arith.mulf %486, %490 : vector<8x8xf32>
    %c1_201 = arith.constant 1 : index
    %c6_202 = arith.constant 6 : index
    %c0_203 = arith.constant 0 : index
    %c0_204 = arith.constant 0 : index
    %492 = vector.load %arg9[%c1_201, %c6_202, %c0_203, %c0_204] : memref<2x8x8x8xf32, #tpu.memory_space<vmem>>, vector<1x1x8x8xf32>
    %493 = vector.shape_cast %492 : vector<1x1x8x8xf32> to vector<8x8xf32>
    %494 = vector.shape_cast %491 : vector<8x8xf32> to vector<1x1x8x8xf32>
    tpu.vector_store %arg9[%c1_201, %c6_202, %c0_203, %c0_204], %494 {strides = array<i32>} : memref<2x8x8x8xf32, #tpu.memory_space<vmem>>, vector<1x1x8x8xf32>,
    %cst_205 = arith.constant dense<0.000000e+00> : vector<8x8xf32>
    %495 = tpu.matmul %491, %476, %cst_205 {dimension_numbers = #tpu.dot_dimension_numbers<[1], [0], [0], [1], [0, 0, 1, 1], [], []>} : vector<8x8xf32>, vector<8x8xf32>, vector<8x8xf32> -> vector<8x8xf32>
    %496 = vector.extract_strided_slice %298 {offsets = [16, 0], sizes = [8, 32], strides = [1, 1]} : vector<32x32xf32> to vector<8x32xf32>
    %cst_206 = arith.constant dense<0.000000e+00> : vector<8x32xf32>
    %497 = tpu.matmul %495, %496, %cst_206 {dimension_numbers = #tpu.dot_dimension_numbers<[1], [0], [0], [1], [0, 0, 1, 1], [], []>} : vector<8x8xf32>, vector<8x32xf32>, vector<8x32xf32> -> vector<8x32xf32>
    %498 = arith.addf %473, %497 : vector<8x32xf32>
    %499 = vector.extract_strided_slice %420 {offsets = [0, 24], sizes = [8, 8], strides = [1, 1]} : vector<8x96xf32> to vector<8x8xf32>
    %500 = vector.extract_strided_slice %420 {offsets = [0, 56], sizes = [8, 8], strides = [1, 1]} : vector<8x96xf32> to vector<8x8xf32>
    %501 = vector.extract_strided_slice %420 {offsets = [0, 88], sizes = [8, 8], strides = [1, 1]} : vector<8x96xf32> to vector<8x8xf32>
    %502 = tpu.transpose %500, [1, 0] : vector<8x8xf32> -> vector<8x8xf32>
    %cst_207 = arith.constant dense<0.000000e+00> : vector<8x8xf32>
    %503 = tpu.matmul %499, %502, %cst_207 {dimension_numbers = #tpu.dot_dimension_numbers<[1], [0], [0], [1], [0, 0, 1, 1], [], []>} : vector<8x8xf32>, vector<8x8xf32>, vector<8x8xf32> -> vector<8x8xf32>
    %cst_208 = arith.constant 0.353553385 : f32
    %504 = vector.broadcast %cst_208 : f32 to vector<8x8xf32>
    %505 = arith.mulf %503, %504 : vector<8x8xf32>
    %506 = arith.addf %505, %422 : vector<8x8xf32>
    %cst_209 = arith.constant dense<0xFF800000> : vector<8xf32>
    %507 = vector.multi_reduction <maximumf>, %506, %cst_209 [1] : vector<8x8xf32> to vector<8xf32>
    %508 = vector.shape_cast %507 : vector<8xf32> to vector<8x1xf32>
    %509 = vector.broadcast %508 : vector<8x1xf32> to vector<8x8xf32>
    %510 = arith.subf %506, %509 : vector<8x8xf32>
    %511 = math.exp %510 : vector<8x8xf32>
    %cst_210 = arith.constant dense<0.000000e+00> : vector<8xf32>
    %512 = vector.multi_reduction <add>, %511, %cst_210 [1] : vector<8x8xf32> to vector<8xf32>
    %513 = vector.shape_cast %512 : vector<8xf32> to vector<8x1xf32>
    %514 = tpu.reciprocal %513 {approx = true} : vector<8x1xf32> -> vector<8x1xf32>
    %515 = vector.broadcast %514 : vector<8x1xf32> to vector<8x8xf32>
    %516 = arith.mulf %511, %515 : vector<8x8xf32>
    %c1_211 = arith.constant 1 : index
    %c7_212 = arith.constant 7 : index
    %c0_213 = arith.constant 0 : index
    %c0_214 = arith.constant 0 : index
    %517 = vector.load %arg9[%c1_211, %c7_212, %c0_213, %c0_214] : memref<2x8x8x8xf32, #tpu.memory_space<vmem>>, vector<1x1x8x8xf32>
    %518 = vector.shape_cast %517 : vector<1x1x8x8xf32> to vector<8x8xf32>
    %519 = vector.shape_cast %516 : vector<8x8xf32> to vector<1x1x8x8xf32>
    tpu.vector_store %arg9[%c1_211, %c7_212, %c0_213, %c0_214], %519 {strides = array<i32>} : memref<2x8x8x8xf32, #tpu.memory_space<vmem>>, vector<1x1x8x8xf32>,
    %cst_215 = arith.constant dense<0.000000e+00> : vector<8x8xf32>
    %520 = tpu.matmul %516, %501, %cst_215 {dimension_numbers = #tpu.dot_dimension_numbers<[1], [0], [0], [1], [0, 0, 1, 1], [], []>} : vector<8x8xf32>, vector<8x8xf32>, vector<8x8xf32> -> vector<8x8xf32>
    %521 = vector.extract_strided_slice %298 {offsets = [24, 0], sizes = [8, 32], strides = [1, 1]} : vector<32x32xf32> to vector<8x32xf32>
    %cst_216 = arith.constant dense<0.000000e+00> : vector<8x32xf32>
    %522 = tpu.matmul %520, %521, %cst_216 {dimension_numbers = #tpu.dot_dimension_numbers<[1], [0], [0], [1], [0, 0, 1, 1], [], []>} : vector<8x8xf32>, vector<8x32xf32>, vector<8x32xf32> -> vector<8x32xf32>
    %523 = arith.addf %498, %522 : vector<8x32xf32>
    %524 = tpu.concatenate %419, %523 in 0 : vector<8x32xf32>, vector<8x32xf32> -> vector<16x32xf32>
    %525 = arith.addf %294, %524 : vector<16x32xf32>
    %526 = vector.broadcast %306 : vector<1x32xf32> to vector<16x32xf32>
    %527 = arith.addf %525, %526 : vector<16x32xf32>
    %cst_217 = arith.constant dense<0.000000e+00> : vector<16xf32>
    %528 = vector.multi_reduction <add>, %527, %cst_217 [1] : vector<16x32xf32> to vector<16xf32>
    %529 = vector.shape_cast %528 : vector<16xf32> to vector<16x1xf32>
    %cst_218 = arith.constant 3.200000e+01 : f32
    %530 = vector.broadcast %cst_218 : f32 to vector<16x1xf32>
    %531 = arith.divf %529, %530 : vector<16x1xf32>
    %532 = vector.broadcast %531 : vector<16x1xf32> to vector<16x32xf32>
    %533 = arith.subf %527, %532 : vector<16x32xf32>
    %534 = arith.mulf %533, %533 : vector<16x32xf32>
    %cst_219 = arith.constant dense<0.000000e+00> : vector<16xf32>
    %535 = vector.multi_reduction <add>, %534, %cst_219 [1] : vector<16x32xf32> to vector<16xf32>
    %536 = vector.shape_cast %535 : vector<16xf32> to vector<16x1xf32>
    %cst_220 = arith.constant 3.200000e+01 : f32
    %537 = vector.broadcast %cst_220 : f32 to vector<16x1xf32>
    %538 = arith.divf %536, %537 : vector<16x1xf32>
    %539 = vector.broadcast %531 : vector<16x1xf32> to vector<16x32xf32>
    %540 = arith.subf %527, %539 : vector<16x32xf32>
    %cst_221 = arith.constant 9.99999997E-7 : f32
    %541 = vector.broadcast %cst_221 : f32 to vector<16x1xf32>
    %542 = arith.addf %538, %541 : vector<16x1xf32>
    %543 = math.rsqrt %542 : vector<16x1xf32>
    %544 = vector.broadcast %543 : vector<16x1xf32> to vector<16x32xf32>
    %545 = arith.mulf %540, %544 : vector<16x32xf32>
    %546 = vector.broadcast %309 : vector<1x32xf32> to vector<16x32xf32>
    %547 = arith.mulf %545, %546 : vector<16x32xf32>
    %548 = vector.broadcast %310 : vector<1x32xf32> to vector<16x32xf32>
    %549 = arith.addf %547, %548 : vector<16x32xf32>
    %cst_222 = arith.constant dense<0.000000e+00> : vector<16x64xf32>
    %550 = tpu.matmul %549, %300, %cst_222 {dimension_numbers = #tpu.dot_dimension_numbers<[1], [0], [0], [1], [0, 0, 1, 1], [], []>} : vector<16x32xf32>, vector<32x64xf32>, vector<16x64xf32> -> vector<16x64xf32>
    %551 = vector.broadcast %307 : vector<1x64xf32> to vector<16x64xf32>
    %552 = arith.addf %550, %551 : vector<16x64xf32>
    %cst_223 = arith.constant 5.000000e-01 : f32
    %553 = vector.broadcast %cst_223 : f32 to vector<16x64xf32>
    %554 = arith.mulf %553, %552 : vector<16x64xf32>
    %cst_224 = arith.constant 2.000000e+00 : f32
    %555 = math.sqrt %cst_224 : f32
    %556 = vector.broadcast %555 : f32 to vector<16x64xf32>
    %557 = arith.divf %552, %556 : vector<16x64xf32>
    %558 = math.erf %557 : vector<16x64xf32>
    %cst_225 = arith.constant 1.000000e+00 : f32
    %559 = vector.broadcast %cst_225 : f32 to vector<16x64xf32>
    %560 = arith.addf %559, %558 : vector<16x64xf32>
    %561 = arith.mulf %554, %560 : vector<16x64xf32>
    %cst_226 = arith.constant dense<0.000000e+00> : vector<16x32xf32>
    %562 = tpu.matmul %561, %302, %cst_226 {dimension_numbers = #tpu.dot_dimension_numbers<[1], [0], [0], [1], [0, 0, 1, 1], [], []>} : vector<16x64xf32>, vector<64x32xf32>, vector<16x32xf32> -> vector<16x32xf32>
    %563 = vector.broadcast %308 : vector<1x32xf32> to vector<16x32xf32>
    %564 = arith.addf %562, %563 : vector<16x32xf32>
    %565 = arith.addf %549, %564 : vector<16x32xf32>
    %cst_227 = arith.constant dense<0.000000e+00> : vector<16xf32>
    %566 = vector.multi_reduction <add>, %565, %cst_227 [1] : vector<16x32xf32> to vector<16xf32>
    %567 = vector.shape_cast %566 : vector<16xf32> to vector<16x1xf32>
    %cst_228 = arith.constant 3.200000e+01 : f32
    %568 = vector.broadcast %cst_228 : f32 to vector<16x1xf32>
    %569 = arith.divf %567, %568 : vector<16x1xf32>
    %570 = vector.broadcast %569 : vector<16x1xf32> to vector<16x32xf32>
    %571 = arith.subf %565, %570 : vector<16x32xf32>
    %572 = arith.mulf %571, %571 : vector<16x32xf32>
    %cst_229 = arith.constant dense<0.000000e+00> : vector<16xf32>
    %573 = vector.multi_reduction <add>, %572, %cst_229 [1] : vector<16x32xf32> to vector<16xf32>
    %574 = vector.shape_cast %573 : vector<16xf32> to vector<16x1xf32>
    %cst_230 = arith.constant 3.200000e+01 : f32
    %575 = vector.broadcast %cst_230 : f32 to vector<16x1xf32>
    %576 = arith.divf %574, %575 : vector<16x1xf32>
    %577 = vector.broadcast %569 : vector<16x1xf32> to vector<16x32xf32>
    %578 = arith.subf %565, %577 : vector<16x32xf32>
    %cst_231 = arith.constant 9.99999997E-7 : f32
    %579 = vector.broadcast %cst_231 : f32 to vector<16x1xf32>
    %580 = arith.addf %576, %579 : vector<16x1xf32>
    %581 = math.rsqrt %580 : vector<16x1xf32>
    %582 = vector.broadcast %581 : vector<16x1xf32> to vector<16x32xf32>
    %583 = arith.mulf %578, %582 : vector<16x32xf32>
    %584 = vector.broadcast %311 : vector<1x32xf32> to vector<16x32xf32>
    %585 = arith.mulf %583, %584 : vector<16x32xf32>
    %586 = vector.broadcast %312 : vector<1x32xf32> to vector<16x32xf32>
    %587 = arith.addf %585, %586 : vector<16x32xf32>
    %588 = vector.shape_cast %587 : vector<16x32xf32> to vector<2x8x32xf32>
    %c0_232 = arith.constant 0 : index
    %c0_233 = arith.constant 0 : index
    %c0_234 = arith.constant 0 : index
    %589 = vector.load %arg8[%c0_232, %c0_233, %c0_234] : memref<2x8x32xf32, #tpu.memory_space<vmem>>, vector<2x8x32xf32>
    tpu.vector_store %arg8[%c0_232, %c0_233, %c0_234], %588 {strides = array<i32>} : memref<2x8x32xf32, #tpu.memory_space<vmem>>, vector<2x8x32xf32>,
    return
  }
  func.func @transform_0(%arg0: i32) -> (i32, i32, i32) {
    %c0_i32 = arith.constant 0 : i32
    %c0_i32_0 = arith.constant 0 : i32
    %c0_i32_1 = arith.constant 0 : i32
    %c0_i32_2 = arith.constant 0 : i32
    return %c0_i32, %c0_i32_0, %c0_i32_1 : i32, i32, i32
  }
  func.func @transform_1(%arg0: i32) -> (i32, i32, i32) {
    %c0_i32 = arith.constant 0 : i32
    %c0_i32_0 = arith.constant 0 : i32
    %c0_i32_1 = arith.constant 0 : i32
    %c0_i32_2 = arith.constant 0 : i32
    return %c0_i32, %c0_i32_0, %c0_i32_1 : i32, i32, i32
  }
  func.func @transform_2(%arg0: i32) -> (i32, i32, i32) {
    %c0_i32 = arith.constant 0 : i32
    %c0_i32_0 = arith.constant 0 : i32
    %c0_i32_1 = arith.constant 0 : i32
    %c0_i32_2 = arith.constant 0 : i32
    return %c0_i32, %c0_i32_0, %c0_i32_1 : i32, i32, i32
  }
  func.func @transform_3(%arg0: i32) -> (i32, i32, i32) {
    %c0_i32 = arith.constant 0 : i32
    %c0_i32_0 = arith.constant 0 : i32
    %c0_i32_1 = arith.constant 0 : i32
    %c0_i32_2 = arith.constant 0 : i32
    return %c0_i32, %c0_i32_0, %c0_i32_1 : i32, i32, i32
  }
  func.func @transform_4(%arg0: i32) -> (i32, i32, i32) {
    %c0_i32 = arith.constant 0 : i32
    %c0_i32_0 = arith.constant 0 : i32
    %c0_i32_1 = arith.constant 0 : i32
    %c0_i32_2 = arith.constant 0 : i32
    return %c0_i32, %c0_i32_0, %c0_i32_1 : i32, i32, i32
  }
  func.func @transform_5(%arg0: i32) -> (i32, i32, i32) {
    %c0_i32 = arith.constant 0 : i32
    %c0_i32_0 = arith.constant 0 : i32
    %c0_i32_1 = arith.constant 0 : i32
    %c0_i32_2 = arith.constant 0 : i32
    return %c0_i32, %c0_i32_0, %c0_i32_1 : i32, i32, i32
  }
  func.func @transform_6(%arg0: i32) -> (i32, i32, i32) {
    %c0_i32 = arith.constant 0 : i32
    %c0_i32_0 = arith.constant 0 : i32
    %c0_i32_1 = arith.constant 0 : i32
    %c0_i32_2 = arith.constant 0 : i32
    return %c0_i32, %c0_i32_0, %c0_i32_1 : i32, i32, i32
  }
  func.func @transform_7(%arg0: i32) -> (i32, i32, i32) {
    %c0_i32 = arith.constant 0 : i32
    %c0_i32_0 = arith.constant 0 : i32
    %c0_i32_1 = arith.constant 0 : i32
    %c0_i32_2 = arith.constant 0 : i32
    return %c0_i32, %c0_i32_0, %c0_i32_1 : i32, i32, i32
  }
  func.func @transform_8(%arg0: i32) -> (i32, i32, i32, i32) {
    %c0_i32 = arith.constant 0 : i32
    %c0_i32_0 = arith.constant 0 : i32
    %c0_i32_1 = arith.constant 0 : i32
    %c0_i32_2 = arith.constant 0 : i32
    %c0_i32_3 = arith.constant 0 : i32
    return %c0_i32, %c0_i32_0, %c0_i32_1, %c0_i32_2 : i32, i32, i32, i32
  }
}

</mosaic_0001>

<bundles_post_ra>
// kernel: gpt_forward.1
= control target key start
LH: loop header
LB: loop body
LE: loop exit
PB: predicated region body
PF: predicated region fallthrough
CT: control target
= control target key end

     0   :  { %s3125_s0 = inlined_call_operand.vmem [shape: f32[2,8,32], index: 0, kind: input, shape index: {}]   ;;  %s3126_s1 = inlined_call_operand.vmem [shape: f32[2,8,8], index: 1, kind: input, shape index: {}]   ;;  %s3127_s2 = inlined_call_operand.vmem [shape: f32[2,32,96], index: 2, kind: input, shape index: {}]   ;;  %s3128_s3 = inlined_call_operand.vmem [shape: f32[2,32,32], index: 3, kind: input, shape index: {}]   ;;  %s3129_s4 = inlined_call_operand.vmem [shape: f32[2,32,64], index: 4, kind: input, shape index: {}]   ;;  %s3130_s5 = inlined_call_operand.vmem [shape: f32[2,64,32], index: 5, kind: input, shape index: {}]   ;;  %s3131_s6 = inlined_call_operand.vmem [shape: f32[2,8,128], index: 6, kind: input, shape index: {}]   ;;  %s3132_s7 = inlined_call_operand.hbm [shape: f32[2,8,32], index: 7, kind: output, shape index: {0}]   ;;  %s3133_s8 = inlined_call_operand.vmem [shape: f32[2,8,8,8], index: 8, kind: output, shape index: {1}]  }
   0x1   :  { %v34_v0 = vld [vmem:[%s3127_s2 + $0x18] sm:$0xff]  ;;  %v33_v1 = vld [vmem:[%s3127_s2 + $0x10] sm:$0xff]  ;;  %v32_v2 = vld [vmem:[%s3127_s2 + $0x8] sm:$0xff] }
   0x2   :  { %72 = vmatpush.msra.mxu0 %v34_v0 }
   0x3   :  { %14 = vsyncpa [#allocation3], 0  ;;  %v31_v3 = vld [vmem:[%s3127_s2] sm:$0xff]  ;;  %vm53_vm0 = vcmask 261120   ;;  %s2423_s17 = smov 120   ;;  %s2424_s18 = smov 96  }
   0x4   :  { %73 = vmatpush.msra.mxu0 %v33_v1  ;;  %v2499_v4 = vld [vmem:[%s3125_s0] sm:$0xff]  ;;  %s2425_s19 = smov 88   ;;  %v2520_v9 = vld [vmem:[%s3125_s0 + $0x8] sm:$0xff]  ;;  %vm87_vm1 = vcmask 64512   ;;  %s2426_s23 = smov 112   ;;  %vm1012_vm14 = vcmask 523264  }
   0x5   :  { %v2506_v5 = vld [vmem:[%s3131_s6] sm:$0xff]  ;;  %s2427_s24 = smov 72   ;;  %s2428_s25 = smov 64   ;;  %v36_v42 = vld [vmem:[%s3128_s3 + $0x8] sm:$0xff] }
   0x6   :  { %74 = vmatpush.msra.mxu0 %v32_v2  ;;  %v52_v6 = vperm.slane %v2506_v5, 0  ;;  %v2532_v14 = vld [vmem:[%s3126_s1] sm:$0xff]  ;;  %s2429_s26 = smov 56   ;;  %s2430_s27 = smov 80   ;;  %v37_v2 = vld [vmem:[%s3128_s3 + $0x10] sm:$0xff] }
   0x7   :  { %v35_v47 = vld [vmem:[%s3128_s3] sm:$0xff]  ;;  %s2431_s14 = smov 48   ;;  %s2432_s15 = smov 104  }
   0x8   :  { %75 = vmatpush.msra.mxu0 %v31_v3  ;;  %s2433_s9 = smov 40   ;;  %s2438_s22 = smov 8  }
   0x9   :  { %2169 = vmatmul.msk.f32.vlgmr.msra.gmra.mxu0 %vm53_vm0, %v2499_v4 }
  0x11   :  { %2170 = vmatmul.msk.f32.gmra.mxu0 %vm53_vm0, %v2520_v9 }
  0x86   :  { %v77_v7 = vpop.f32.mrf.mxu0 }
  0x87   :  { %v2509_v8 = vadd.f32 %v77_v7, %v52_v6 }
  0x89   :  { %152 = vrot.lane.b32.xlu1 %v2509_v8, %s2423_s17  ;;  %85 = vrot.lane.b32.xlu0 %v2509_v8, %s2424_s18 }
  0x8e   :  { %v80_v22 = vpop.f32.mrf.mxu0 }
  0x8f   :  { %v2540_v23 = vadd.f32 %v80_v22, %v52_v6 }
  0x91   :  { %154 = vrot.lane.b32.xlu0 %v2509_v8, %s2425_s19 }
  0xfb   :  { %v86_v10 = vpop.permute.xlu0 %85  ;;  %v153_v12 = vpop.permute.xlu1 %152 }
  0xfc   :  { %2171 = vmatpush.xpose.msk.msra.mxu1 %vm87_vm1, %v86_v10 }
  0xff   :  { %2172 = vmatmul.msk.f32.vlgmr.msra.gmra.mxu1 %vm87_vm1, %v2509_v8 }
 0x103   :  { %v155_v11 = vpop.permute.xlu0 %154 }
 0x104   :  { %2174 = vmatpush.xpose.msk.msra.mxu3 %vm87_vm1, %v155_v11 }
 0x107   :  { %2175 = vmatmul.msk.f32.vlgmr.msra.gmra.mxu3 %vm87_vm1, %v153_v12 }
 0x108   :  { %262 = vmatpush.msrb.mxu3 %v35_v47 }
 0x10a   :  { %354 = vmatpush.msra.mxu3 %v37_v2 }
 0x17c   :  { %v109_v13 = vpop.f32.mrf.mxu1 }
 0x17d   :  { %v112_v15 = vmul.f32 0.35355338, %v109_v13 }
 0x17f   :  { %v113_v16 = vadd.f32 %v112_v15, %v2532_v14 }
 0x181   :  { %v114_v17 = vsel %vm87_vm1, %v113_v16, -inf }
 0x182   :  { %115 = vmax.xlane.f32.xlu1 %v114_v17 }
 0x18a   :  { %v177_v18 = vpop.f32.mrf.mxu3 }
 0x18b   :  { %v180_v19 = vmul.f32 0.35355338, %v177_v18 }
 0x18d   :  { %v181_v20 = vadd.f32 %v180_v19, %v2532_v14 }
 0x18f   :  { %v182_v21 = vsel %vm87_vm1, %v181_v20, -inf }
 0x190   :  { %183 = vmax.xlane.f32.xlu2 %v182_v21 }
 0x19b   :  { %267 = vrot.lane.b32.xlu1 %v2509_v8, %s2426_s23 }
 0x1a3   :  { %456 = vrot.lane.b32.xlu1 %v2540_v23, %s2424_s18 }
 0x1ab   :  { %362 = vrot.lane.b32.xlu1 %v2509_v8, %s2427_s24 }
 0x1f5   :  { %v116_v24 = vpop.xlane.xlu1 %115 }
 0x1f6   :  { %v117_v25 = vsub.f32 %v113_v16, %v116_v24 }
 0x1f8   :  { %v118_v26 = vmul.f32 1.442695, %v117_v25 }
 0x1fa   :  { %2303 = vpow2.f32 %v118_v26 }
 0x200   :  { %v2304_v27 = vpop.eup %2303 }
 0x201   :  { %v120_v28 = vsel %vm87_vm1, %v2304_v27, 0.0 }
 0x202   :  { %121 = vadd.xlane.f32.xlu2 %v120_v28 }
 0x203   :  { %v184_v29 = vpop.xlane.xlu2 %183 }
 0x204   :  { %v185_v30 = vsub.f32 %v181_v20, %v184_v29 }
 0x206   :  { %v186_v31 = vmul.f32 1.442695, %v185_v30 }
 0x208   :  { %2305 = vpow2.f32 %v186_v31 }
 0x20d   :  { %v268_v32 = vpop.permute.xlu1 %267 }
 0x20e   :  { %v2306_v33 = vpop.eup %2305 }
 0x20f   :  { %v188_v34 = vsel %vm87_vm1, %v2306_v33, 0.0 }
 0x210   :  { %189 = vadd.xlane.f32.xlu0 %v188_v34 }
 0x215   :  { %v2548_v35 = vpop.permute.xlu1 %456 }
 0x21a   :  { %126 = vrot.lane.b32.xlu2 %v2509_v8, %s2428_s25 }
 0x21d   :  { %v363_v36 = vpop.permute.xlu1 %362 }
 0x21e   :  { %2185 = vmatpush.xpose.msk.msrb.mxu0 %vm87_vm1, %v363_v36 }
 0x222   :  { %195 = vrot.lane.b32.xlu2 %v2509_v8, %s2429_s26 }
 0x22a   :  { %269 = vrot.lane.b32.xlu2 %v2509_v8, %s2430_s27 }
 0x275   :  { %v122_v37 = vpop.xlane.xlu2 %121 }
 0x276   :  { %2307 = vrcp.f32 %v122_v37 }
 0x27c   :  { %v2308_v38 = vpop.eup %2307 }
 0x27d   :  { %v127_v39 = vpop.permute.xlu2 %126  ;;  %v124_v40 = vmul.f32 %v2308_v38, %v2304_v27 }
 0x27e   :  { %147 = vmatpush.msra.mxu2 %v127_v39 }
 0x27f   :  { %125 = vst.msk [vmem:[%s3133_s8] sm:$0xff] %vm87_vm1, %v124_v40  ;;  %2173 = vmatmul.msk.f32.vlgmr.msra.gmra.mxu2 %vm87_vm1, %v124_v40 }
 0x283   :  { %v190_v41 = vpop.xlane.xlu0 %189 }
 0x284   :  { %2309 = vrcp.f32 %v190_v41 }
 0x285   :  { %v196_v43 = vpop.permute.xlu2 %195 }
 0x286   :  { %216 = vmatpush.msrb.mxu2 %v196_v43  ;;  %v2645_v43 = vld [vmem:[%s3128_s3 + $0x18] sm:$0xff] }
 0x288   :  { %239 = vmatpush.msra.mxu2 %v36_v42 }
 0x28a   :  { %v2310_v44 = vpop.eup %2309 }
 0x28b   :  { %v192_v45 = vmul.f32 %v2310_v44, %v2306_v33 }
 0x28d   :  { %2176 = vst.msk [vmem:[%s3133_s8 + $0x8] sm:$0xff] %vm87_vm1, %v192_v45  ;;  %2177 = vmatmul.msk.f32.vlgmr.msrb.gmra.mxu2 %vm87_vm1, %v192_v45  ;;  %v270_v46 = vpop.permute.xlu2 %269 }
 0x28e   :  { %2180 = vmatpush.xpose.msk.msrb.mxu2 %vm87_vm1, %v270_v46 }
 0x302   :  { %v149_v48 = vpop.f32.mrf.mxu2 }
 0x303   :  { %2179 = vmatmul.msk.f32.vlgmr.msrb.gmra.mxu3 %vm87_vm1, %v149_v48 }
 0x304   :  { %2191 = vmatpush.xpose.msk.msrb.mxu3 %vm87_vm1, %v2548_v35 }
 0x310   :  { %v218_v49 = vpop.f32.mrf.mxu2 }
 0x311   :  { %2178 = vmatmul.msk.f32.vlgmr.msra.gmra.mxu2 %vm87_vm1, %v218_v49 }
 0x319   :  { %2181 = vmatmul.msk.f32.vlgmr.msrb.gmra.mxu2 %vm87_vm1, %v268_v32 }
 0x386   :  { %v264_v12 = vpop.f32.mrf.mxu3 }
 0x394   :  { %v241_v50 = vpop.f32.mrf.mxu2 }
 0x395   :  { %v265_v13 = vadd.f32 %v264_v12, %v241_v50 }
 0x39c   :  { %v292_v51 = vpop.f32.mrf.mxu2 }
 0x39d   :  { %v295_v52 = vmul.f32 0.35355338, %v292_v51 }
 0x39f   :  { %v296_v53 = vadd.f32 %v295_v52, %v2532_v14 }
 0x3a1   :  { %v297_v54 = vsel %vm87_vm1, %v296_v53, -inf }
 0x3a2   :  { %298 = vmax.xlane.f32.xlu2 %v297_v54 }
 0x3ba   :  { %497 = vrot.lane.b32.xlu2 %v2540_v23, %s2428_s25 }
 0x415   :  { %v299_v55 = vpop.xlane.xlu2 %298 }
 0x416   :  { %v300_v56 = vsub.f32 %v296_v53, %v299_v55 }
 0x418   :  { %v301_v57 = vmul.f32 1.442695, %v300_v56 }
 0x41a   :  { %2311 = vpow2.f32 %v301_v57 }
 0x41d   :  { %v498_v60 = vpop.permute.xlu2 %497 }
 0x41e   :  { %518 = vmatpush.msra.mxu0 %v498_v60 }
 0x420   :  { %v2312_v58 = vpop.eup %2311 }
 0x421   :  { %v303_v59 = vsel %vm87_vm1, %v2312_v58, 0.0 }
 0x422   :  { %304 = vadd.xlane.f32.xlu0 %v303_v59 }
 0x436   :  { %310 = vrot.lane.b32.xlu0 %v2509_v8, %s2431_s14 }
 0x43e   :  { %360 = vrot.lane.b32.xlu0 %v2509_v8, %s2432_s15 }
 0x495   :  { %v305_v61 = vpop.xlane.xlu0 %304 }
 0x496   :  { %2313 = vrcp.f32 %v305_v61 }
 0x49c   :  { %v2314_v62 = vpop.eup %2313 }
 0x49d   :  { %v307_v63 = vmul.f32 %v2314_v62, %v2312_v58 }
 0x49f   :  { %2182 = vst.msk [vmem:[%s3133_s8 + $0x10] sm:$0xff] %vm87_vm1, %v307_v63 }
 0x4a8   :  { %v311_v0 = vpop.permute.xlu0 %310 }
 0x4a9   :  { %331 = vmatpush.msrb.mxu1 %v311_v0 }
 0x4aa   :  { %2183 = vmatmul.msk.f32.vlgmr.msrb.gmra.mxu1 %vm87_vm1, %v307_v63 }
 0x4ab   :  { %447 = vmatpush.msra.mxu1 %v2645_v43 }
 0x4b0   :  { %v361_v1 = vpop.permute.xlu0 %360 }
 0x4b1   :  { %2186 = vmatmul.msk.f32.vlgmr.msrb.gmra.mxu0 %vm87_vm1, %v361_v1 }
 0x4b2   :  { %633 = vmatpush.msrb.mxu0 %v35_v47 }
 0x527   :  { %v333_v3 = vpop.f32.mrf.mxu1 }
 0x528   :  { %2184 = vmatmul.msk.f32.vlgmr.msra.gmra.mxu3 %vm87_vm1, %v333_v3 }
 0x529   :  { %610 = vmatpush.msra.mxu3 %v36_v42 }
 0x52e   :  { %v385_v6 = vpop.f32.mrf.mxu0 }
 0x52f   :  { %v388_v7 = vmul.f32 0.35355338, %v385_v6 }
 0x530   :  { %2192 = vmatmul.msk.f32.vlgmr.msrb.gmra.mxu3 %vm87_vm1, %v2540_v23 }
 0x531   :  { %v389_v10 = vadd.f32 %v388_v7, %v2532_v14  ;;  %725 = vmatpush.msrb.mxu3 %v37_v2  ;;  %v2609_v14 = vld [vmem:[%s3126_s1 + $0x8] sm:$0xff] }
 0x533   :  { %v390_v11 = vsel %vm87_vm1, %v389_v10, -inf }
 0x534   :  { %391 = vmax.xlane.f32.xlu2 %v390_v11 }
 0x54c   :  { %640 = vrot.lane.b32.xlu2 %v2540_v23, %s2430_s27 }
 0x5a7   :  { %v392_v16 = vpop.xlane.xlu2 %391 }
 0x5a8   :  { %v393_v18 = vsub.f32 %v389_v10, %v392_v16 }
 0x5aa   :  { %v394_v19 = vmul.f32 1.442695, %v393_v18 }
 0x5ab   :  { %v356_v15 = vpop.f32.mrf.mxu3 }
 0x5ac   :  { %v2604_v17 = vadd.f32 %v356_v15, %v265_v13  ;;  %2315 = vpow2.f32 %v394_v19  ;;  %v826_v13 = vperm.slane %v2506_v5, 1 }
 0x5af   :  { %v641_v40 = vpop.permute.xlu2 %640 }
 0x5b2   :  { %v2316_v25 = vpop.eup %2315 }
 0x5b3   :  { %v479_v20 = vpop.f32.mrf.mxu3  ;;  %v396_v26 = vsel %vm87_vm1, %v2316_v25, 0.0 }
 0x5b4   :  { %v482_v21 = vmul.f32 0.35355338, %v479_v20 }
 0x5b6   :  { %v483_v22 = vadd.f32 %v2609_v14, %v482_v21 }
 0x5b8   :  { %v484_v24 = vsel %vm87_vm1, %v483_v22, -inf }
 0x5b9   :  { %485 = vmax.xlane.f32.xlu1 %v484_v24 }
 0x5c1   :  { %397 = vadd.xlane.f32.xlu1 %v396_v26 }
 0x5da   :  { %525 = vrot.lane.b32.xlu1 %v2540_v23, %s2425_s19 }
 0x5e2   :  { %733 = vrot.lane.b32.xlu1 %v2540_v23, %s2427_s24 }
 0x62c   :  { %v486_v27 = vpop.xlane.xlu1 %485 }
 0x62d   :  { %v487_v28 = vsub.f32 %v483_v22, %v486_v27 }
 0x62f   :  { %v488_v29 = vmul.f32 1.442695, %v487_v28 }
 0x631   :  { %2317 = vpow2.f32 %v488_v29  ;;  %v2434_v29 = vmov 32.0  }
 0x634   :  { %v398_v30 = vpop.xlane.xlu1 %397 }
 0x635   :  { %2319 = vrcp.f32 %v398_v30 }
 0x637   :  { %v2318_v31 = vpop.eup %2317 }
 0x638   :  { %v490_v32 = vsel %vm87_vm1, %v2318_v31, 0.0 }
 0x639   :  { %491 = vadd.xlane.f32.xlu0 %v490_v32 }
 0x63b   :  { %v2320_v33 = vpop.eup %2319 }
 0x63c   :  { %v400_v34 = vmul.f32 %v2320_v33, %v2316_v25 }
 0x63e   :  { %2187 = vst.msk [vmem:[%s3133_s8 + $0x18] sm:$0xff] %vm87_vm1, %v400_v34 }
 0x64c   :  { %v526_v35 = vpop.permute.xlu1 %525 }
 0x64d   :  { %403 = vrot.lane.b32.xlu0 %v2509_v8, %s2433_s9 }
 0x654   :  { %v734_v39 = vpop.permute.xlu1 %733 }
 0x655   :  { %523 = vrot.lane.b32.xlu0 %v2540_v23, %s2423_s17 }
 0x65d   :  { %638 = vrot.lane.b32.xlu0 %v2540_v23, %s2426_s23 }
 0x665   :  { %731 = vrot.lane.b32.xlu0 %v2540_v23, %s2432_s15 }
 0x6ac   :  { %v492_v36 = vpop.xlane.xlu0 %491 }
 0x6ad   :  { %2321 = vrcp.f32 %v492_v36 }
 0x6b3   :  { %v2322_v37 = vpop.eup %2321 }
 0x6b4   :  { %v494_v38 = vmul.f32 %v2322_v37, %v2318_v31 }
 0x6b6   :  { %2193 = vst.msk [vmem:[%s3133_s8 + $0x40] sm:$0xff] %vm87_vm1, %v494_v38  ;;  %2194 = vmatmul.msk.f32.vlgmr.msra.gmra.mxu0 %vm87_vm1, %v494_v38 }
 0x6b7   :  { %2206 = vmatpush.xpose.msk.msra.mxu0 %vm87_vm1, %v734_v39 }
 0x6bf   :  { %v404_v8 = vpop.permute.xlu0 %403 }
 0x6c0   :  { %424 = vmatpush.msra.mxu2 %v404_v8 }
 0x6c1   :  { %2188 = vmatmul.msk.f32.vlgmr.msra.gmra.mxu2 %vm87_vm1, %v400_v34 }
 0x6c2   :  { %2195 = vmatpush.xpose.msk.msrb.mxu2 %vm87_vm1, %v526_v35 }
 0x6c6   :  { %2201 = vmatpush.xpose.msk.msra.mxu2 %vm87_vm1, %v641_v40 }
 0x6c7   :  { %v524_v41 = vpop.permute.xlu0 %523 }
 0x6c9   :  { %2196 = vmatmul.msk.f32.vlgmr.msrb.gmra.mxu2 %vm87_vm1, %v524_v41 }
 0x6cf   :  { %v639_v42 = vpop.permute.xlu0 %638 }
 0x6d1   :  { %2202 = vmatmul.msk.f32.vlgmr.msra.gmra.mxu2 %vm87_vm1, %v639_v42 }
 0x6d7   :  { %v732_v45 = vpop.permute.xlu0 %731 }
 0x733   :  { %v520_v44 = vpop.f32.mrf.mxu0 }
 0x734   :  { %2200 = vmatmul.msk.f32.vlgmr.msrb.gmra.mxu0 %vm87_vm1, %v520_v44 }
 0x73c   :  { %2207 = vmatmul.msk.f32.vlgmr.msra.gmra.mxu0 %vm87_vm1, %v732_v45  ;;  %v42_v45 = vld [vmem:[%s3129_s4 + $0x18] sm:$0xff] }
 0x73d   :  { %905 = vmatpush.msrb.mxu0 %v42_v45  ;;  %v48_v45 = vld [vmem:[%s3130_s5 + $0x28] sm:$0xff] }
 0x744   :  { %v426_v46 = vpop.f32.mrf.mxu2 }
 0x745   :  { %2189 = vmatmul.msk.f32.vlgmr.msra.gmra.mxu1 %vm87_vm1, %v426_v46  ;;  %v41_v46 = vld [vmem:[%s3129_s4 + $0x10] sm:$0xff] }
 0x746   :  { %906 = vmatpush.msrb.mxu0 %v41_v46 }
 0x74c   :  { %v548_v47 = vpop.f32.mrf.mxu2 }
 0x74d   :  { %v551_v48 = vmul.f32 0.35355338, %v548_v47  ;;  %v40_v47 = vld [vmem:[%s3129_s4 + $0x8] sm:$0xff] }
 0x74e   :  { %907 = vmatpush.msrb.mxu0 %v40_v47  ;;  %v47_v47 = vld [vmem:[%s3130_s5 + $0x20] sm:$0xff] }
 0x74f   :  { %v552_v49 = vadd.f32 %v2609_v14, %v551_v48  ;;  %v39_v48 = vld [vmem:[%s3129_s4] sm:$0xff] }
 0x750   :  { %908 = vmatpush.msrb.mxu0 %v39_v48 }
 0x751   :  { %v553_v50 = vsel %vm87_vm1, %v552_v49, -inf }
 0x752   :  { %554 = vmax.xlane.f32.xlu1 %v553_v50 }
 0x754   :  { %v663_v51 = vpop.f32.mrf.mxu2 }
 0x755   :  { %v666_v52 = vmul.f32 0.35355338, %v663_v51 }
 0x757   :  { %v667_v53 = vadd.f32 %v2609_v14, %v666_v52 }
 0x759   :  { %v668_v54 = vsel %vm87_vm1, %v667_v53, -inf }
 0x75a   :  { %669 = vmax.xlane.f32.xlu0 %v668_v54 }
 0x7b1   :  { %v2655_v55 = vpop.f32.mrf.mxu0 }
 0x7b9   :  { %v756_v56 = vpop.f32.mrf.mxu0 }
 0x7ba   :  { %v759_v57 = vmul.f32 0.35355338, %v756_v56 }
 0x7bc   :  { %v760_v58 = vadd.f32 %v2609_v14, %v759_v57 }
 0x7be   :  { %v761_v59 = vsel %vm87_vm1, %v760_v58, -inf }
 0x7bf   :  { %762 = vmax.xlane.f32.xlu2 %v761_v59  ;;  %v880_v59 = vperm.slane %v2506_v5, 4 }
 0x7c2   :  { %v449_v10 = vpop.f32.mrf.mxu1 }
 0x7c3   :  { %v452_v11 = vadd.f32 %v449_v10, %v2604_v17 }
 0x7c5   :  { %v555_v60 = vpop.xlane.xlu1 %554  ;;  %v824_v12 = vadd.f32 %v452_v11, %v2499_v4 }
 0x7c6   :  { %v556_v61 = vsub.f32 %v552_v49, %v555_v60 }
 0x7c7   :  { %v827_v15 = vadd.f32 %v826_v13, %v824_v12 }
 0x7c8   :  { %v557_v62 = vmul.f32 1.442695, %v556_v61 }
 0x7c9   :  { %v829_v16 = vsel %vm53_vm0, %v827_v15, 0.0 }
 0x7ca   :  { %2323 = vpow2.f32 %v557_v62  ;;  %v883_v62 = vperm.slane %v2506_v5, 5 }
 0x7cd   :  { %v670_v63 = vpop.xlane.xlu0 %669 }
 0x7ce   :  { %v671_v0 = vsub.f32 %v667_v53, %v670_v63 }
 0x7d0   :  { %v2324_v1 = vpop.eup %2323  ;;  %v672_v2 = vmul.f32 1.442695, %v671_v0 }
 0x7d1   :  { %v559_v3 = vsel %vm87_vm1, %v2324_v1, 0.0 }
 0x7d2   :  { %2325 = vpow2.f32 %v672_v2  ;;  %560 = vadd.xlane.f32.xlu1 %v559_v3 }
 0x7d8   :  { %v2326_v6 = vpop.eup %2325 }
 0x7d9   :  { %v674_v7 = vsel %vm87_vm1, %v2326_v6, 0.0 }
 0x7da   :  { %675 = vadd.xlane.f32.xlu0 %v674_v7 }
 0x7eb   :  { %566 = vrot.lane.b32.xlu1 %v2540_v23, %s2429_s26 }
 0x7ee   :  { %681 = vrot.lane.b32.xlu0 %v2540_v23, %s2431_s14 }
 0x815   :  { %830 = vadd.xlane.f32.xlu1 %v829_v16 }
 0x832   :  { %v763_v18 = vpop.xlane.xlu2 %762 }
 0x833   :  { %v764_v19 = vsub.f32 %v760_v58, %v763_v18 }
 0x835   :  { %v765_v20 = vmul.f32 1.442695, %v764_v19 }
 0x837   :  { %2327 = vpow2.f32 %v765_v20 }
 0x83d   :  { %v2328_v14 = vpop.eup %2327 }
 0x83e   :  { %v767_v21 = vsel %vm87_vm1, %v2328_v14, 0.0 }
 0x83f   :  { %768 = vadd.xlane.f32.xlu2 %v767_v21  ;;  %v2435_v21 = vmov 1.4142135  }
 0x845   :  { %v561_v22 = vpop.xlane.xlu1 %560 }
 0x846   :  { %2329 = vrcp.f32 %v561_v22 }
 0x84c   :  { %v2330_v17 = vpop.eup %2329 }
 0x84d   :  { %v563_v4 = vmul.f32 %v2330_v17, %v2324_v1  ;;  %v676_v24 = vpop.xlane.xlu0 %675 }
 0x84e   :  { %2331 = vrcp.f32 %v676_v24 }
 0x84f   :  { %2197 = vst.msk [vmem:[%s3133_s8 + $0x48] sm:$0xff] %vm87_vm1, %v563_v4  ;;  %2333 = vrcp.f32 %v2434_v29 }
 0x854   :  { %v2332_v25 = vpop.eup %2331 }
 0x855   :  { %v678_v26 = vmul.f32 %v2332_v25, %v2326_v6  ;;  %v2334_v30 = vpop.eup %2333 }
 0x856   :  { %v836_v31 = vmul.f32 32.0, %v2334_v30  ;;  %vm840_vm2 = vweird.f32 %v2334_v30 }
 0x857   :  { %2203 = vst.msk [vmem:[%s3133_s8 + $0x50] sm:$0xff] %vm87_vm1, %v678_v26  ;;  %774 = vrot.lane.b32.xlu2 %v2540_v23, %s2433_s9 }
 0x858   :  { %v837_v32 = vsub.f32 1.0, %v836_v31 }
 0x85a   :  { %v838_v33 = vmul.f32 %v2334_v30, %v837_v32 }
 0x85c   :  { %v839_v34 = vadd.f32 %v2334_v30, %v838_v33 }
 0x85d   :  { %v567_v27 = vpop.permute.xlu1 %566 }
 0x85e   :  { %587 = vmatpush.msrb.mxu1 %v567_v27  ;;  %v2685_v35 = vsel %vm840_vm2, %v2334_v30, %v839_v34 }
 0x85f   :  { %2198 = vmatmul.msk.f32.vlgmr.msrb.gmra.mxu1 %vm87_vm1, %v563_v4  ;;  %v886_v4 = vperm.slane %v2506_v5, 2 }
 0x860   :  { %v682_v28 = vpop.permute.xlu0 %681 }
 0x861   :  { %702 = vmatpush.msra.mxu1 %v682_v28 }
 0x863   :  { %818 = vmatpush.msrb.mxu1 %v2645_v43 }
 0x867   :  { %2204 = vmatmul.msk.f32.vlgmr.msra.gmra.mxu1 %vm87_vm1, %v678_v26 }
 0x888   :  { %v831_v23 = vpop.xlane.xlu1 %830 }
 0x889   :  { %v842_v36 = vmul.f32 %v2685_v35, %v831_v23 }
 0x88b   :  { %v844_v37 = vsub.f32 %v827_v15, %v842_v36 }
 0x88d   :  { %v846_v38 = vmul.f32 %v844_v37, %v844_v37 }
 0x88f   :  { %v848_v39 = vsel %vm53_vm0, %v846_v38, 0.0 }
 0x890   :  { %849 = vadd.xlane.f32.xlu0 %v848_v39 }
 0x8b2   :  { %v769_v8 = vpop.xlane.xlu2 %768 }
 0x8b3   :  { %2335 = vrcp.f32 %v769_v8 }
 0x8b9   :  { %v2336_v40 = vpop.eup %2335 }
 0x8ba   :  { %v771_v41 = vmul.f32 %v2336_v40, %v2328_v14  ;;  %v775_v42 = vpop.permute.xlu2 %774 }
 0x8bb   :  { %795 = vmatpush.msrb.mxu2 %v775_v42 }
 0x8bc   :  { %2208 = vst.msk [vmem:[%s3133_s8 + $0x58] sm:$0xff] %vm87_vm1, %v771_v41  ;;  %2209 = vmatmul.msk.f32.vlgmr.msrb.gmra.mxu2 %vm87_vm1, %v771_v41 }
 0x8dc   :  { %v589_v43 = vpop.f32.mrf.mxu1 }
 0x8dd   :  { %2199 = vmatmul.msk.f32.vlgmr.msra.gmra.mxu3 %vm87_vm1, %v589_v43  ;;  %v50_v43 = vld [vmem:[%s3130_s5 + $0x38] sm:$0xff] }
 0x8de   :  { %1027 = vmatpush.msra.mxu0 %v50_v43 }
 0x8e4   :  { %v704_v44 = vpop.f32.mrf.mxu1 }
 0x8e5   :  { %2205 = vmatmul.msk.f32.vlgmr.msrb.gmra.mxu3 %vm87_vm1, %v704_v44  ;;  %v49_v44 = vld [vmem:[%s3130_s5 + $0x30] sm:$0xff] }
 0x8e6   :  { %1028 = vmatpush.msra.mxu0 %v49_v44 }
 0x8e8   :  { %1029 = vmatpush.msra.mxu0 %v48_v45 }
 0x8ea   :  { %1030 = vmatpush.msra.mxu0 %v47_v47 }
 0x903   :  { %v850_v49 = vpop.xlane.xlu0 %849 }
 0x904   :  { %v854_v50 = vmul.f32 %v850_v49, %v2685_v35  ;;  %v46_v49 = vld [vmem:[%s3130_s5 + $0x18] sm:$0xff] }
 0x905   :  { %1031 = vmatpush.msra.mxu0 %v46_v49 }
 0x906   :  { %v856_v51 = vadd.f32 1e-06, %v854_v50 }
 0x908   :  { %2337 = vrsqrt.f32 %v856_v51  ;;  %vm864_vm4 = vweird.f32 %v856_v51 }
 0x909   :  { %2339 = vrcp.f32 %v2435_v21 }
 0x90e   :  { %v2338_v52 = vpop.eup %2337 }
 0x90f   :  { %v859_v53 = vmul.f32 %v2338_v52, %v856_v51  ;;  %vm865_vm3 = vweird.f32 %v2338_v52  ;;  %v45_v51 = vld [vmem:[%s3130_s5 + $0x10] sm:$0xff] }
 0x910   :  { %vm866_vm5 = vmor %vm864_vm4, %vm865_vm3  ;;  %1032 = vmatpush.msra.mxu0 %v45_v51 }
 0x911   :  { %v860_v54 = vmul.f32 %v2338_v52, %v859_v53  ;;  %v44_v53 = vld [vmem:[%s3130_s5 + $0x8] sm:$0xff] }
 0x912   :  { %1033 = vmatpush.msra.mxu0 %v44_v53 }
 0x913   :  { %v861_v56 = vmul.f32 0.5, %v860_v54 }
 0x915   :  { %v862_v57 = vsub.f32 1.5, %v861_v56 }
 0x917   :  { %v863_v58 = vmul.f32 %v2338_v52, %v862_v57 }
 0x919   :  { %v867_v60 = vsel %vm866_vm5, %v2338_v52, %v863_v58  ;;  %v43_v58 = vld [vmem:[%s3130_s5] sm:$0xff] }
 0x91a   :  { %v878_v61 = vmul.f32 %v867_v60, %v844_v37  ;;  %1034 = vmatpush.msra.mxu0 %v43_v58 }
 0x91c   :  { %v881_v63 = vmul.f32 %v880_v59, %v878_v61 }
 0x91e   :  { %v2715_v0 = vadd.f32 %v883_v62, %v881_v63 }
 0x920   :  { %2211 = vmatmul.msk.f32.vlgmr.msrb.gmra.mxu0 %vm53_vm0, %v2715_v0 }
 0x93f   :  { %v797_v1 = vpop.f32.mrf.mxu2 }
 0x940   :  { %2210 = vmatmul.msk.f32.vlgmr.msrb.gmra.mxu1 %vm87_vm1, %v797_v1 }
 0x960   :  { %v612_v2 = vpop.f32.mrf.mxu3 }
 0x961   :  { %v636_v6 = vadd.f32 %v2655_v55, %v612_v2 }
 0x968   :  { %v727_v3 = vpop.f32.mrf.mxu3 }
 0x969   :  { %v730_v7 = vadd.f32 %v727_v3, %v636_v6 }
 0x99d   :  { %v910_v24 = vpop.f32.mrf.mxu0 }
 0x99e   :  { %v2734_v26 = vadd.f32 %v910_v24, %v886_v4 }
 0x9bd   :  { %v820_v10 = vpop.f32.mrf.mxu1 }
 0x9be   :  { %v823_v11 = vadd.f32 %v820_v10, %v730_v7 }
 0x9c0   :  { %v825_v12 = vadd.f32 %v823_v11, %v2520_v9  ;;  %v2340_v9 = vpop.eup %2339 }
 0x9c1   :  { %v919_v22 = vmul.f32 1.4142135, %v2340_v9  ;;  %vm923_vm6 = vweird.f32 %v2340_v9 }
 0x9c2   :  { %v828_v15 = vadd.f32 %v826_v13, %v825_v12 }
 0x9c3   :  { %v920_v17 = vsub.f32 1.0, %v919_v22 }
 0x9c4   :  { %v832_v16 = vsel %vm53_vm0, %v828_v15, 0.0 }
 0x9c5   :  { %833 = vadd.xlane.f32.xlu2 %v832_v16  ;;  %v921_v13 = vmul.f32 %v2340_v9, %v920_v17 }
 0x9c7   :  { %v922_v25 = vadd.f32 %v2340_v9, %v921_v13 }
 0x9c9   :  { %v2736_v27 = vsel %vm923_vm6, %v2340_v9, %v922_v25 }
 0x9ca   :  { %v2740_v28 = vmul.f32 %v2736_v27, %v2734_v26 }
 0x9cc   :  { %v927_v29 = vmul.f32 %v2740_v28, %v2740_v28 }
 0x9ce   :  { %v928_v30 = vmin.f32 %v927_v29, 16.0 }
 0x9d0   :  { %v940_v31 = vmul.f32 3.8918573e-05, %v928_v30  ;;  %v929_v39 = vmul.f32 2.1237322e-06, %v928_v30 }
 0x9d2   :  { %v941_v32 = vadd.f32 0.001143296, %v940_v31  ;;  %v930_v40 = vadd.f32 0.00028619796, %v929_v39 }
 0x9d4   :  { %v942_v33 = vmul.f32 %v941_v32, %v928_v30  ;;  %v931_v42 = vmul.f32 %v930_v40, %v928_v30  ;;  %v916_v32 = vmul.f32 0.5, %v2734_v26 }
 0x9d6   :  { %v943_v34 = vadd.f32 0.014752088, %v942_v33  ;;  %v932_v46 = vadd.f32 0.0036580483, %v931_v42 }
 0x9d8   :  { %v944_v23 = vmul.f32 %v943_v34, %v928_v30  ;;  %v933_v48 = vmul.f32 %v932_v46, %v928_v30 }
 0x9da   :  { %v945_v36 = vadd.f32 0.112945676, %v944_v23  ;;  %v934_v54 = vadd.f32 0.05243302, %v933_v48 }
 0x9dc   :  { %v946_v37 = vmul.f32 %v945_v36, %v928_v30  ;;  %v935_v61 = vmul.f32 %v934_v54, %v928_v30 }
 0x9de   :  { %v947_v38 = vadd.f32 0.4994258, %v946_v37  ;;  %v936_v1 = vadd.f32 0.18741608, %v935_v61 }
 0x9e0   :  { %v948_v8 = vmul.f32 %v947_v38, %v928_v30  ;;  %v937_v7 = vmul.f32 %v936_v1, %v928_v30 }
 0x9e2   :  { %v949_v41 = vadd.f32 1.0, %v948_v8 }
 0x9e4   :  { %2341 = vrcp.f32 %v949_v41  ;;  %v961_v11 = vand.u32 2147483648, %v949_v41  ;;  %vm955_vm8 = vweird.f32 %v949_v41 }
 0x9ea   :  { %v2342_v50 = vpop.eup %2341 }
 0x9eb   :  { %v951_v56 = vmul.f32 %v2342_v50, %v949_v41  ;;  %vm956_vm7 = vweird.f32 %v2342_v50 }
 0x9ec   :  { %vm957_vm9 = vmor %vm955_vm8, %vm956_vm7 }
 0x9ed   :  { %v952_v63 = vsub.f32 1.0, %v951_v56 }
 0x9ef   :  { %v953_v2 = vmul.f32 %v2342_v50, %v952_v63 }
 0x9f1   :  { %v954_v10 = vadd.f32 %v2342_v50, %v953_v2 }
 0xa38   :  { %v834_v18 = vpop.xlane.xlu2 %833 }
 0xa39   :  { %v843_v19 = vmul.f32 %v2685_v35, %v834_v18  ;;  %v938_v18 = vadd.f32 1.1283791, %v937_v7 }
 0xa3b   :  { %v2726_v20 = vsub.f32 %v828_v15, %v843_v19  ;;  %v959_v15 = vand.u32 2147483647, %v949_v41  ;;  %v958_v19 = vsel %vm957_vm9, %v2342_v50, %v954_v10  ;;  %v939_v22 = vmul.f32 %v938_v18, %v2740_v28 }
 0xa3d   :  { %v847_v14 = vmul.f32 %v2726_v20, %v2726_v20  ;;  %vm960_vm11 = vcmp.eq.f32.partialorder %v959_v15, 8.507059e+37 }
 0xa3f   :  { %v851_v55 = vsel %vm53_vm0, %v847_v14, 0.0  ;;  %v962_v14 = vor.u32 1.1754944e-38, %v961_v11 }
 0xa40   :  { %852 = vadd.xlane.f32.xlu1 %v851_v55 }
 0xa41   :  { %v963_v21 = vsel %vm960_vm11, %v962_v14, %v958_v19 }
 0xa42   :  { %v964_v13 = vmul.f32 %v963_v21, %v939_v22  ;;  %v2220_v22 = vld [vmem:[%s3127_s2 + $0x38] sm:$0xff] }
 0xa43   :  { %1139 = vmatpush.msra.mxu2 %v2220_v22 }
 0xa44   :  { %v2213_v29 = vclamps-f32 %v964_v13, 1.0  ;;  %v2218_v13 = vld [vmem:[%s3127_s2 + $0x28] sm:$0xff] }
 0xa46   :  { %v1007_v31 = vadd.f32 1.0, %v2213_v29 }
 0xa48   :  { %v1009_v28 = vmul.f32 %v1007_v31, %v916_v32 }
 0xab3   :  { %v853_v52 = vpop.xlane.xlu1 %852 }
 0xab4   :  { %v855_v57 = vmul.f32 %v853_v52, %v2685_v35 }
 0xab6   :  { %v857_v60 = vadd.f32 1e-06, %v855_v57 }
 0xab8   :  { %2343 = vrsqrt.f32 %v857_v60  ;;  %vm874_vm12 = vweird.f32 %v857_v60 }
 0xabe   :  { %v2344_v3 = vpop.eup %2343 }
 0xabf   :  { %v869_v6 = vmul.f32 %v2344_v3, %v857_v60  ;;  %vm875_vm10 = vweird.f32 %v2344_v3 }
 0xac0   :  { %vm876_vm13 = vmor %vm874_vm12, %vm875_vm10 }
 0xac1   :  { %v870_v12 = vmul.f32 %v2344_v3, %v869_v6 }
 0xac3   :  { %v871_v16 = vmul.f32 0.5, %v870_v12 }
 0xac5   :  { %v872_v55 = vsub.f32 1.5, %v871_v16 }
 0xac7   :  { %v873_v9 = vmul.f32 %v2344_v3, %v872_v55 }
 0xac9   :  { %v877_v17 = vsel %vm876_vm13, %v2344_v3, %v873_v9 }
 0xaca   :  { %v879_v24 = vmul.f32 %v877_v17, %v2726_v20  ;;  %v2219_v17 = vld [vmem:[%s3127_s2 + $0x30] sm:$0xff] }
 0xacb   :  { %1140 = vmatpush.msra.mxu2 %v2219_v17 }
 0xacc   :  { %v882_v25 = vmul.f32 %v880_v59, %v879_v24  ;;  %v2217_v24 = vld [vmem:[%s3127_s2 + $0x20] sm:$0xff] }
 0xacd   :  { %1141 = vmatpush.msra.mxu2 %v2218_v13 }
 0xace   :  { %v2775_v30 = vadd.f32 %v883_v62, %v882_v25  ;;  %v1011_v62 = vperm.slane %v2506_v5, 3 }
 0xacf   :  { %1142 = vmatpush.msra.mxu2 %v2217_v24 }
 0xad0   :  { %2212 = vmatmul.msk.f32.gmra.mxu0 %vm53_vm0, %v2775_v30 }
 0xad8   :  { %2215 = vmatmul.msk.f32.vlgmr.msra.gmra.mxu0 %vm1012_vm14, %v1009_v28 }
 0xb4d   :  { %v913_v33 = vpop.f32.mrf.mxu0 }
 0xb4e   :  { %v914_v20 = vadd.f32 %v913_v33, %v886_v4 }
 0xb50   :  { %v926_v59 = vmul.f32 %v2736_v27, %v914_v20  ;;  %v917_v15 = vmul.f32 0.5, %v914_v20 }
 0xb52   :  { %v967_v34 = vmul.f32 %v926_v59, %v926_v59 }
 0xb54   :  { %v968_v23 = vmin.f32 %v967_v34, 16.0 }
 0xb55   :  { %v1036_v36 = vpop.f32.mrf.mxu0 }
 0xb56   :  { %v969_v37 = vmul.f32 2.1237322e-06, %v968_v23  ;;  %v980_v38 = vmul.f32 3.8918573e-05, %v968_v23  ;;  %v1037_v26 = vadd.f32 %v1036_v36, %v1011_v62 }
 0xb58   :  { %v970_v39 = vadd.f32 0.00028619796, %v969_v37  ;;  %v981_v8 = vadd.f32 0.001143296, %v980_v38  ;;  %v1042_v40 = vadd.f32 %v1037_v26, %v2715_v0  ;;  %v1091_v38 = vperm.slane %v2506_v5, 7 }
 0xb5a   :  { %v971_v41 = vmul.f32 %v970_v39, %v968_v23  ;;  %v982_v42 = vmul.f32 %v981_v8, %v968_v23  ;;  %v1044_v4 = vsel %vm53_vm0, %v1042_v40, 0.0  ;;  %v2818_v8 = vld [vmem:[%s3131_s6 + $0x8] sm:$0xff]  ;;  %s2437_s6 = smov 128  }
 0xb5b   :  { %1045 = vadd.xlane.f32.xlu0 %v1044_v4 }
 0xb5c   :  { %v983_v43 = vadd.f32 0.014752088, %v982_v42  ;;  %v972_v44 = vadd.f32 0.0036580483, %v971_v41 }
 0xb5e   :  { %v984_v45 = vmul.f32 %v983_v43, %v968_v23  ;;  %v973_v47 = vmul.f32 %v972_v44, %v968_v23 }
 0xb60   :  { %v985_v46 = vadd.f32 0.112945676, %v984_v45  ;;  %v974_v50 = vadd.f32 0.05243302, %v973_v47 }
 0xb62   :  { %v986_v48 = vmul.f32 %v985_v46, %v968_v23  ;;  %v975_v53 = vmul.f32 %v974_v50, %v968_v23 }
 0xb64   :  { %v987_v49 = vadd.f32 0.4994258, %v986_v48  ;;  %v976_v54 = vadd.f32 0.18741608, %v975_v53 }
 0xb66   :  { %v988_v51 = vmul.f32 %v987_v49, %v968_v23  ;;  %v977_v0 = vmul.f32 %v976_v54, %v968_v23  ;;  %v1088_v23 = vperm.slane %v2506_v5, 6 }
 0xb68   :  { %v989_v52 = vadd.f32 1.0, %v988_v51  ;;  %v978_v61 = vadd.f32 1.1283791, %v977_v0 }
 0xb6a   :  { %2345 = vrcp.f32 %v989_v52  ;;  %v1001_v60 = vand.u32 2147483648, %v989_v52  ;;  %v999_v1 = vand.u32 2147483647, %v989_v52  ;;  %vm995_vm2 = vweird.f32 %v989_v52 }
 0xb6b   :  { %v979_v6 = vmul.f32 %v978_v61, %v926_v59 }
 0xb6c   :  { %v1002_v3 = vor.u32 1.1754944e-38, %v1001_v60  ;;  %vm1000_vm4 = vcmp.eq.f32.partialorder %v999_v1, 8.507059e+37 }
 0xb70   :  { %v2346_v56 = vpop.eup %2345 }
 0xb71   :  { %v991_v57 = vmul.f32 %v2346_v56, %v989_v52  ;;  %vm996_vm15 = vweird.f32 %v2346_v56 }
 0xb72   :  { %vm997_vm3 = vmor %vm995_vm2, %vm996_vm15 }
 0xb73   :  { %v992_v58 = vsub.f32 1.0, %v991_v57 }
 0xb75   :  { %v993_v63 = vmul.f32 %v2346_v56, %v992_v58  ;;  %v2851_v58 = vld [vmem:[%s3126_s1] sm:$0xff] }
 0xb77   :  { %v994_v2 = vadd.f32 %v2346_v56, %v993_v63 }
 0xb79   :  { %v998_v7 = vsel %vm997_vm3, %v2346_v56, %v994_v2 }
 0xb7a   :  { %v1003_v10 = vsel %vm1000_vm4, %v1002_v3, %v998_v7 }
 0xb7b   :  { %v1004_v11 = vmul.f32 %v1003_v10, %v979_v6 }
 0xb7d   :  { %v2214_v12 = vclamps-f32 %v1004_v11, 1.0 }
 0xb7f   :  { %v1008_v16 = vadd.f32 1.0, %v2214_v12 }
 0xb81   :  { %v1010_v18 = vmul.f32 %v1008_v16, %v917_v15 }
 0xb83   :  { %2216 = vmatmul.msk.f32.gmra.mxu0 %vm1012_vm14, %v1010_v18 }
 0xbce   :  { %v1046_v19 = vpop.xlane.xlu0 %1045 }
 0xbcf   :  { %v1050_v14 = vmul.f32 %v1046_v19, %v2685_v35 }
 0xbd1   :  { %v1052_v55 = vsub.f32 %v1042_v40, %v1050_v14  ;;  %v1120_v40 = vperm.slane %v2818_v8, 0 }
 0xbd3   :  { %v1054_v21 = vmul.f32 %v1052_v55, %v1052_v55 }
 0xbd5   :  { %v1056_v9 = vsel %vm53_vm0, %v1054_v21, 0.0 }
 0xbd6   :  { %1057 = vadd.xlane.f32.xlu1 %v1056_v9 }
 0xc00   :  { %v1039_v4 = vpop.f32.mrf.mxu0 }
 0xc01   :  { %v1040_v43 = vadd.f32 %v1039_v4, %v1011_v62 }
 0xc03   :  { %v1043_v44 = vadd.f32 %v1040_v43, %v2775_v30 }
 0xc05   :  { %v1047_v45 = vsel %vm53_vm0, %v1043_v44, 0.0 }
 0xc49   :  { %v1058_v25 = vpop.xlane.xlu1 %1057 }
 0xc4a   :  { %v1062_v29 = vmul.f32 %v1058_v25, %v2685_v35 }
 0xc4c   :  { %v1064_v31 = vadd.f32 1e-06, %v1062_v29 }
 0xc4e   :  { %2347 = vrsqrt.f32 %v1064_v31  ;;  %vm1072_vm6 = vweird.f32 %v1064_v31 }
 0xc54   :  { %v2348_v32 = vpop.eup %2347 }
 0xc55   :  { %v1067_v28 = vmul.f32 %v2348_v32, %v1064_v31  ;;  %vm1073_vm5 = vweird.f32 %v2348_v32 }
 0xc56   :  { %vm1074_vm7 = vmor %vm1072_vm6, %vm1073_vm5 }
 0xc57   :  { %v1068_v33 = vmul.f32 %v2348_v32, %v1067_v28 }
 0xc59   :  { %v1069_v20 = vmul.f32 0.5, %v1068_v33 }
 0xc5b   :  { %v1070_v59 = vsub.f32 1.5, %v1069_v20 }
 0xc5d   :  { %v1071_v34 = vmul.f32 %v2348_v32, %v1070_v59 }
 0xc5f   :  { %v1075_v36 = vsel %vm1074_vm7, %v2348_v32, %v1071_v34 }
 0xc60   :  { %v1086_v37 = vmul.f32 %v1075_v36, %v1052_v55 }
 0xc62   :  { %v1089_v26 = vmul.f32 %v1088_v23, %v1086_v37 }
 0xc64   :  { %v2811_v39 = vadd.f32 %v1091_v38, %v1089_v26 }
 0xc66   :  { %2238 = vmatmul.msk.f32.vlgmr.msra.gmra.mxu2 %vm53_vm0, %v2811_v39 }
 0xce9   :  { %v1144_v41 = vpop.f32.mrf.mxu2 }
 0xcea   :  { %v2823_v42 = vadd.f32 %v1144_v41, %v1120_v40 }
 0xcec   :  { %1336 = vrot.lane.b32.xlu1 %v2823_v42, %s2430_s27  ;;  %1219 = vrot.lane.b32.xlu2 %v2823_v42, %s2423_s17 }
 0xced   :  { %1221 = vrot.lane.b32.xlu0 %v2823_v42, %s2425_s19 }
 0xcf4   :  { %1152 = vrot.lane.b32.xlu2 %v2823_v42, %s2424_s18 }
 0xcf5   :  { %1334 = vrot.lane.b32.xlu0 %v2823_v42, %s2426_s23 }
 0xd1f   :  { %1048 = vadd.xlane.f32.xlu0 %v1047_v45 }
 0xd46   :  { %v1220_v46 = vpop.permute.xlu2 %1219 }
 0xd4e   :  { %v1153_v47 = vpop.permute.xlu2 %1152 }
 0xd4f   :  { %2240 = vmatpush.xpose.msk.msra.mxu1 %vm87_vm1, %v1153_v47 }
 0xd52   :  { %2241 = vmatmul.msk.f32.vlgmr.msra.gmra.mxu1 %vm87_vm1, %v2823_v42 }
 0xd5e   :  { %v1337_v48 = vpop.permute.xlu1 %1336 }
 0xd5f   :  { %v1222_v49 = vpop.permute.xlu0 %1221  ;;  %2250 = vmatpush.xpose.msk.msrb.mxu0 %vm87_vm1, %v1337_v48 }
 0xd60   :  { %2244 = vmatpush.xpose.msk.msra.mxu3 %vm87_vm1, %v1222_v49 }
 0xd63   :  { %2245 = vmatmul.msk.f32.vlgmr.msra.gmra.mxu3 %vm87_vm1, %v1220_v46 }
 0xd67   :  { %v1335_v62 = vpop.permute.xlu0 %1334 }
 0xd68   :  { %2251 = vmatmul.msk.f32.vlgmr.msrb.gmra.mxu0 %vm87_vm1, %v1335_v62 }
 0xd92   :  { %v1049_v30 = vpop.xlane.xlu0 %1048 }
 0xd93   :  { %v1051_v50 = vmul.f32 %v1049_v30, %v2685_v35 }
 0xd95   :  { %v1053_v51 = vsub.f32 %v1043_v44, %v1051_v50  ;;  %v2222_v50 = vld [vmem:[%s3128_s3 + $0x28] sm:$0xff] }
 0xd97   :  { %v1055_v52 = vmul.f32 %v1053_v51, %v1053_v51 }
 0xd99   :  { %v1059_v53 = vsel %vm53_vm0, %v1055_v52, 0.0 }
 0xd9a   :  { %1060 = vadd.xlane.f32.xlu2 %v1059_v53 }
 0xdcf   :  { %v1175_v25 = vpop.f32.mrf.mxu1 }
 0xdd0   :  { %v1178_v32 = vmul.f32 0.35355338, %v1175_v25 }
 0xdd2   :  { %v1179_v33 = vadd.f32 %v2851_v58, %v1178_v32 }
 0xdd4   :  { %v1180_v59 = vsel %vm87_vm1, %v1179_v33, -inf }
 0xde5   :  { %v1359_v54 = vpop.f32.mrf.mxu0 }
 0xde6   :  { %v1362_v56 = vmul.f32 0.35355338, %v1359_v54  ;;  %v1244_v0 = vpop.f32.mrf.mxu3 }
 0xde7   :  { %v1247_v57 = vmul.f32 0.35355338, %v1244_v0 }
 0xde8   :  { %v1363_v60 = vadd.f32 %v2851_v58, %v1362_v56 }
 0xde9   :  { %v1248_v61 = vadd.f32 %v2851_v58, %v1247_v57 }
 0xdea   :  { %v1364_v63 = vsel %vm87_vm1, %v1363_v60, -inf }
 0xdeb   :  { %1365 = vmax.xlane.f32.xlu0 %v1364_v63  ;;  %v1249_v1 = vsel %vm87_vm1, %v1248_v61, -inf }
 0xdec   :  { %1250 = vmax.xlane.f32.xlu1 %v1249_v1 }
 0xdff   :  { %1262 = vrot.lane.b32.xlu0 %v2823_v42, %s2429_s26 }
 0xe07   :  { %1193 = vrot.lane.b32.xlu0 %v2823_v42, %s2428_s25 }
 0xe0d   :  { %v1061_v2 = vpop.xlane.xlu2 %1060 }
 0xe0e   :  { %v1063_v3 = vmul.f32 %v1061_v2, %v2685_v35 }
 0xe0f   :  { %1427 = vrot.lane.b32.xlu0 %v2823_v42, %s2432_s15 }
 0xe10   :  { %v1065_v6 = vadd.f32 1e-06, %v1063_v3 }
 0xe12   :  { %2349 = vrsqrt.f32 %v1065_v6  ;;  %vm1082_vm9 = vweird.f32 %v1065_v6 }
 0xe18   :  { %v2350_v7 = vpop.eup %2349 }
 0xe19   :  { %v1077_v10 = vmul.f32 %v2350_v7, %v1065_v6  ;;  %vm1083_vm8 = vweird.f32 %v2350_v7  ;;  %v2928_v6 = vld [vmem:[%s3126_s1 + $0x8] sm:$0xff] }
 0xe1a   :  { %vm1084_vm10 = vmor %vm1082_vm9, %vm1083_vm8 }
 0xe1b   :  { %v1078_v11 = vmul.f32 %v2350_v7, %v1077_v10 }
 0xe1d   :  { %v1079_v12 = vmul.f32 0.5, %v1078_v11 }
 0xe1f   :  { %v1080_v15 = vsub.f32 1.5, %v1079_v12 }
 0xe21   :  { %v1081_v16 = vmul.f32 %v2350_v7, %v1080_v15 }
 0xe23   :  { %v1085_v18 = vsel %vm1084_vm10, %v2350_v7, %v1081_v16 }
 0xe24   :  { %v1087_v19 = vmul.f32 %v1085_v18, %v1053_v51 }
 0xe26   :  { %v1090_v14 = vmul.f32 %v1088_v23, %v1087_v19  ;;  %v2221_v23 = vld [vmem:[%s3128_s3 + $0x20] sm:$0xff] }
 0xe27   :  { %1329 = vmatpush.msrb.mxu3 %v2221_v23 }
 0xe28   :  { %v2868_v55 = vadd.f32 %v1091_v38, %v1090_v14 }
 0xe2a   :  { %2239 = vmatmul.msk.f32.gmra.mxu2 %vm53_vm0, %v2868_v55 }
 0xe5e   :  { %v1366_v21 = vpop.xlane.xlu0 %1365 }
 0xe5f   :  { %v1367_v9 = vsub.f32 %v1363_v60, %v1366_v21  ;;  %v1251_v22 = vpop.xlane.xlu1 %1250 }
 0xe60   :  { %v1252_v17 = vsub.f32 %v1248_v61, %v1251_v22 }
 0xe61   :  { %v1368_v13 = vmul.f32 1.442695, %v1367_v9 }
 0xe62   :  { %v1253_v24 = vmul.f32 1.442695, %v1252_v17 }
 0xe63   :  { %2351 = vpow2.f32 %v1368_v13 }
 0xe64   :  { %2353 = vpow2.f32 %v1253_v24 }
 0xe69   :  { %v2352_v29 = vpop.eup %2351 }
 0xe6a   :  { %v2354_v31 = vpop.eup %2353  ;;  %v1370_v28 = vsel %vm87_vm1, %v2352_v29, 0.0 }
 0xe6b   :  { %1371 = vadd.xlane.f32.xlu1 %v1370_v28  ;;  %v1255_v5 = vsel %vm87_vm1, %v2354_v31, 0.0 }
 0xe6c   :  { %1256 = vadd.xlane.f32.xlu2 %v1255_v5 }
 0xe71   :  { %v1263_v20 = vpop.permute.xlu0 %1262 }
 0xe72   :  { %1283 = vmatpush.msrb.mxu2 %v1263_v20 }
 0xe73   :  { %1181 = vmax.xlane.f32.xlu1 %v1180_v59 }
 0xe79   :  { %v1194_v34 = vpop.permute.xlu0 %1193 }
 0xe7a   :  { %1214 = vmatpush.msrb.mxu1 %v1194_v34 }
 0xe7c   :  { %1306 = vmatpush.msra.mxu1 %v2222_v50 }
 0xe81   :  { %v1428_v61 = vpop.permute.xlu0 %1427 }
 0xe84   :  { %1377 = vrot.lane.b32.xlu2 %v2823_v42, %s2431_s14 }
 0xe8c   :  { %1429 = vrot.lane.b32.xlu2 %v2823_v42, %s2427_s24 }
 0xead   :  { %v1147_v62 = vpop.f32.mrf.mxu2 }
 0xeae   :  { %v2897_v30 = vadd.f32 %v1147_v62, %v1120_v40  ;;  %v2223_v40 = vld [vmem:[%s3128_s3 + $0x30] sm:$0xff] }
 0xede   :  { %v1372_v36 = vpop.xlane.xlu1 %1371 }
 0xedf   :  { %2355 = vrcp.f32 %v1372_v36  ;;  %v1257_v37 = vpop.xlane.xlu2 %1256 }
 0xee0   :  { %2357 = vrcp.f32 %v1257_v37 }
 0xee5   :  { %v2356_v38 = vpop.eup %2355 }
 0xee6   :  { %v2358_v26 = vpop.eup %2357  ;;  %v1374_v41 = vmul.f32 %v2356_v38, %v2352_v29  ;;  %v1182_v4 = vpop.xlane.xlu1 %1181 }
 0xee7   :  { %v1259_v43 = vmul.f32 %v2358_v26, %v2354_v31  ;;  %v1183_v44 = vsub.f32 %v1179_v33, %v1182_v4  ;;  %v1378_v45 = vpop.permute.xlu2 %1377  ;;  %v2972_v26 = vld [vmem:[%s3128_s3 + $0x38] sm:$0xff] }
 0xee8   :  { %2252 = vst.msk [vmem:[%s3133_s8 + $0x30] sm:$0xff] %vm87_vm1, %v1374_v41  ;;  %1398 = vmatpush.msra.mxu2 %v1378_v45 }
 0xee9   :  { %2246 = vst.msk [vmem:[%s3133_s8 + $0x28] sm:$0xff] %vm87_vm1, %v1259_v43  ;;  %v1184_v46 = vmul.f32 1.442695, %v1183_v44  ;;  %2247 = vmatmul.msk.f32.vlgmr.msrb.gmra.mxu2 %vm87_vm1, %v1259_v43 }
 0xeea   :  { %1514 = vmatpush.msrb.mxu2 %v2972_v26 }
 0xeeb   :  { %2359 = vpow2.f32 %v1184_v46 }
 0xeef   :  { %v1430_v47 = vpop.permute.xlu2 %1429 }
 0xef0   :  { %2255 = vmatpush.xpose.msk.msra.mxu3 %vm87_vm1, %v1430_v47 }
 0xef1   :  { %v2360_v48 = vpop.eup %2359  ;;  %2253 = vmatmul.msk.f32.vlgmr.msra.gmra.mxu2 %vm87_vm1, %v1374_v41 }
 0xef2   :  { %v1186_v49 = vsel %vm87_vm1, %v2360_v48, 0.0 }
 0xef3   :  { %1187 = vadd.xlane.f32.xlu1 %v1186_v49 }
 0xf0c   :  { %1522 = vrot.lane.b32.xlu1 %v2897_v30, %s2424_s18 }
 0xf14   :  { %1563 = vrot.lane.b32.xlu1 %v2897_v30, %s2428_s25 }
 0xf66   :  { %v1188_v51 = vpop.xlane.xlu1 %1187 }
 0xf67   :  { %2361 = vrcp.f32 %v1188_v51 }
 0xf6c   :  { %v1285_v54 = vpop.f32.mrf.mxu2 }
 0xf6d   :  { %v2362_v52 = vpop.eup %2361 }
 0xf6e   :  { %v1190_v53 = vmul.f32 %v2362_v52, %v2360_v48 }
 0xf70   :  { %2242 = vst.msk [vmem:[%s3133_s8 + $0x20] sm:$0xff] %vm87_vm1, %v1190_v53  ;;  %2243 = vmatmul.msk.f32.vlgmr.msrb.gmra.mxu1 %vm87_vm1, %v1190_v53 }
 0xf71   :  { %1421 = vmatpush.msrb.mxu1 %v2223_v40 }
 0xf74   :  { %v1400_v0 = vpop.f32.mrf.mxu2 }
 0xf78   :  { %2248 = vmatmul.msk.f32.vlgmr.msra.gmra.mxu1 %vm87_vm1, %v1285_v54 }
 0xf7e   :  { %v1523_v56 = vpop.permute.xlu1 %1522 }
 0xf7f   :  { %2261 = vmatpush.xpose.msk.msra.mxu1 %vm87_vm1, %v1523_v56 }
 0xf80   :  { %2254 = vmatmul.msk.f32.vlgmr.msrb.gmra.mxu1 %vm87_vm1, %v1400_v0 }
 0xf83   :  { %1676 = vmatpush.msrb.mxu1 %v2222_v50 }
 0xf86   :  { %v1564_v60 = vpop.permute.xlu1 %1563 }
 0xf88   :  { %2262 = vmatmul.msk.f32.vlgmr.msra.gmra.mxu1 %vm87_vm1, %v2897_v30 }
 0xf89   :  { %1791 = vmatpush.msra.mxu1 %v2223_v40 }
 0xfed   :  { %v1216_v57 = vpop.f32.mrf.mxu1 }
 0xfee   :  { %2249 = vmatmul.msk.f32.vlgmr.msrb.gmra.mxu3 %vm87_vm1, %v1216_v57 }
 0xfef   :  { %1584 = vmatpush.msrb.mxu3 %v1564_v60 }
 0xff5   :  { %v2920_v63 = vpop.f32.mrf.mxu1 }
 0xff6   :  { %2256 = vmatmul.msk.f32.vlgmr.msra.gmra.mxu3 %vm87_vm1, %v1428_v61 }
 0xff7   :  { %1699 = vmatpush.msra.mxu3 %v2221_v23 }
 0xffd   :  { %v2923_v1 = vpop.f32.mrf.mxu1 }
0x1005   :  { %v1545_v2 = vpop.f32.mrf.mxu1 }
0x1006   :  { %v1548_v3 = vmul.f32 0.35355338, %v1545_v2  ;;  %v1892_v2 = vperm.slane %v2818_v8, 1 }
0x1008   :  { %v1549_v7 = vadd.f32 %v2928_v6, %v1548_v3 }
0x100a   :  { %v1550_v10 = vsel %vm87_vm1, %v1549_v7, -inf }
0x100b   :  { %1551 = vmax.xlane.f32.xlu2 %v1550_v10 }
0x1071   :  { %v2932_v11 = vpop.f32.mrf.mxu3 }
0x1072   :  { %v1332_v40 = vadd.f32 %v2932_v11, %v2920_v63 }
0x1074   :  { %v1426_v0 = vadd.f32 %v2923_v1, %v1332_v40 }
0x1079   :  { %v1452_v12 = vpop.f32.mrf.mxu3 }
0x107a   :  { %v1455_v15 = vmul.f32 0.35355338, %v1452_v12 }
0x107c   :  { %v1456_v16 = vadd.f32 %v2851_v58, %v1455_v15 }
0x107e   :  { %v1552_v18 = vpop.xlane.xlu2 %1551  ;;  %v1457_v19 = vsel %vm87_vm1, %v1456_v16, -inf }
0x107f   :  { %v1553_v14 = vsub.f32 %v1549_v7, %v1552_v18  ;;  %1458 = vmax.xlane.f32.xlu1 %v1457_v19 }
0x1081   :  { %v1554_v21 = vmul.f32 1.442695, %v1553_v14 }
0x1083   :  { %2363 = vpow2.f32 %v1554_v21 }
0x1089   :  { %v2364_v9 = vpop.eup %2363 }
0x108a   :  { %v1556_v22 = vsel %vm87_vm1, %v2364_v9, 0.0 }
0x108b   :  { %1557 = vadd.xlane.f32.xlu0 %v1556_v22 }
0x1098   :  { %1589 = vrot.lane.b32.xlu1 %v2897_v30, %s2423_s17 }
0x109f   :  { %1470 = vrot.lane.b32.xlu0 %v2823_v42, %s2433_s9 }
0x10a7   :  { %1799 = vrot.lane.b32.xlu0 %v2897_v30, %s2427_s24 }
0x10af   :  { %1797 = vrot.lane.b32.xlu0 %v2897_v30, %s2432_s15 }
0x10b7   :  { %1704 = vrot.lane.b32.xlu0 %v2897_v30, %s2426_s23 }
0x10f2   :  { %v1459_v58 = vpop.xlane.xlu1 %1458 }
0x10f3   :  { %v1460_v17 = vsub.f32 %v1456_v16, %v1459_v58 }
0x10f5   :  { %v1461_v13 = vmul.f32 1.442695, %v1460_v17 }
0x10f7   :  { %2365 = vpow2.f32 %v1461_v13 }
0x10fd   :  { %v2366_v24 = vpop.eup %2365 }
0x10fe   :  { %v1558_v25 = vpop.xlane.xlu0 %1557  ;;  %v1463_v29 = vsel %vm87_vm1, %v2366_v24, 0.0 }
0x10ff   :  { %2367 = vrcp.f32 %v1558_v25  ;;  %1464 = vadd.xlane.f32.xlu2 %v1463_v29 }
0x1105   :  { %v2368_v42 = vpop.eup %2367 }
0x1106   :  { %v1560_v31 = vmul.f32 %v2368_v42, %v2364_v9 }
0x1108   :  { %2263 = vst.msk [vmem:[%s3133_s8 + $0x60] sm:$0xff] %vm87_vm1, %v1560_v31  ;;  %2264 = vmatmul.msk.f32.vlgmr.msrb.gmra.mxu3 %vm87_vm1, %v1560_v31 }
0x110a   :  { %v1590_v36 = vpop.permute.xlu1 %1589 }
0x1111   :  { %v1471_v32 = vpop.permute.xlu0 %1470 }
0x1112   :  { %1491 = vmatpush.msra.mxu0 %v1471_v32 }
0x1117   :  { %1591 = vrot.lane.b32.xlu2 %v2897_v30, %s2425_s19 }
0x1119   :  { %v1800_v28 = vpop.permute.xlu0 %1799 }
0x111a   :  { %2276 = vmatpush.xpose.msk.msrb.mxu3 %vm87_vm1, %v1800_v28 }
0x111f   :  { %1706 = vrot.lane.b32.xlu2 %v2897_v30, %s2430_s27 }
0x1121   :  { %v1798_v34 = vpop.permute.xlu0 %1797 }
0x1129   :  { %v1705_v37 = vpop.permute.xlu0 %1704 }
0x1172   :  { %v1465_v5 = vpop.xlane.xlu2 %1464 }
0x1173   :  { %2369 = vrcp.f32 %v1465_v5 }
0x1179   :  { %v2370_v33 = vpop.eup %2369 }
0x117a   :  { %v1467_v20 = vmul.f32 %v2370_v33, %v2366_v24  ;;  %v1592_v59 = vpop.permute.xlu2 %1591 }
0x117b   :  { %2265 = vmatpush.xpose.msk.msrb.mxu0 %vm87_vm1, %v1592_v59 }
0x117c   :  { %2257 = vst.msk [vmem:[%s3133_s8 + $0x38] sm:$0xff] %vm87_vm1, %v1467_v20  ;;  %2258 = vmatmul.msk.f32.vlgmr.msra.gmra.mxu0 %vm87_vm1, %v1467_v20 }
0x1182   :  { %v1707_v23 = vpop.permute.xlu2 %1706 }
0x1183   :  { %2271 = vmatpush.xpose.msk.msra.mxu0 %vm87_vm1, %v1707_v23 }
0x1184   :  { %2266 = vmatmul.msk.f32.vlgmr.msrb.gmra.mxu0 %vm87_vm1, %v1590_v36 }
0x118b   :  { %v1586_v38 = vpop.f32.mrf.mxu3 }
0x118c   :  { %2270 = vmatmul.msk.f32.vlgmr.msra.gmra.mxu3 %vm87_vm1, %v1586_v38  ;;  %2272 = vmatmul.msk.f32.vlgmr.msra.gmra.mxu0 %vm87_vm1, %v1705_v37  ;;  %v2228_v38 = vld [vmem:[%s3129_s4 + $0x38] sm:$0xff] }
0x1194   :  { %2277 = vmatmul.msk.f32.vlgmr.msrb.gmra.mxu3 %vm87_vm1, %v1798_v34 }
0x11f9   :  { %v1493_v41 = vpop.f32.mrf.mxu0 }
0x11fa   :  { %2259 = vmatmul.msk.f32.vlgmr.msrb.gmra.mxu2 %vm87_vm1, %v1493_v41 }
0x1201   :  { %v1614_v4 = vpop.f32.mrf.mxu0 }
0x1202   :  { %v1617_v43 = vmul.f32 0.35355338, %v1614_v4 }
0x1204   :  { %v1618_v44 = vadd.f32 %v2928_v6, %v1617_v43  ;;  %v2227_v43 = vld [vmem:[%s3129_s4 + $0x30] sm:$0xff] }
0x1206   :  { %v1619_v45 = vsel %vm87_vm1, %v1618_v44, -inf }
0x1207   :  { %1620 = vmax.xlane.f32.xlu2 %v1619_v45  ;;  %v2225_v45 = vld [vmem:[%s3129_s4 + $0x20] sm:$0xff] }
0x1209   :  { %v1729_v46 = vpop.f32.mrf.mxu0 }
0x120a   :  { %v1732_v47 = vmul.f32 0.35355338, %v1729_v46 }
0x120c   :  { %v1733_v48 = vadd.f32 %v2928_v6, %v1732_v47 }
0x120e   :  { %v1734_v49 = vsel %vm87_vm1, %v1733_v48, -inf }
0x120f   :  { %v2980_v62 = vpop.f32.mrf.mxu3  ;;  %1735 = vmax.xlane.f32.xlu1 %v1734_v49 }
0x1217   :  { %v1822_v50 = vpop.f32.mrf.mxu3 }
0x1218   :  { %v1825_v51 = vmul.f32 0.35355338, %v1822_v50 }
0x121a   :  { %v1826_v52 = vadd.f32 %v2928_v6, %v1825_v51  ;;  %v1939_v51 = vperm.slane %v2818_v8, 4 }
0x121c   :  { %v1827_v53 = vsel %vm87_vm1, %v1826_v52, -inf }
0x121d   :  { %1828 = vmax.xlane.f32.xlu0 %v1827_v53 }
0x1231   :  { %1632 = vrot.lane.b32.xlu0 %v2897_v30, %s2429_s26 }
0x127a   :  { %v1621_v54 = vpop.xlane.xlu2 %1620 }
0x127b   :  { %v1622_v56 = vsub.f32 %v1618_v44, %v1621_v54  ;;  %v1942_v54 = vperm.slane %v2818_v8, 5 }
0x127d   :  { %v1623_v57 = vmul.f32 1.442695, %v1622_v56  ;;  %v1516_v60 = vpop.f32.mrf.mxu2 }
0x127e   :  { %v1519_v61 = vadd.f32 %v1516_v60, %v1426_v0 }
0x127f   :  { %2371 = vpow2.f32 %v1623_v57 }
0x1280   :  { %v1890_v3 = vadd.f32 %v1519_v61, %v2811_v39 }
0x1282   :  { %v1736_v6 = vpop.xlane.xlu1 %1735  ;;  %v1893_v7 = vadd.f32 %v1892_v2, %v1890_v3 }
0x1283   :  { %v1737_v10 = vsub.f32 %v1733_v48, %v1736_v6 }
0x1284   :  { %v1895_v12 = vsel %vm53_vm0, %v1893_v7, 0.0 }
0x1285   :  { %v2372_v63 = vpop.eup %2371  ;;  %v1738_v11 = vmul.f32 1.442695, %v1737_v10  ;;  %1896 = vadd.xlane.f32.xlu0 %v1895_v12 }
0x1286   :  { %v1625_v1 = vsel %vm87_vm1, %v2372_v63, 0.0 }
0x1287   :  { %2373 = vpow2.f32 %v1738_v11  ;;  %1626 = vadd.xlane.f32.xlu2 %v1625_v1 }
0x128d   :  { %v2374_v15 = vpop.eup %2373 }
0x128e   :  { %v1740_v16 = vsel %vm87_vm1, %v2374_v15, 0.0 }
0x128f   :  { %1741 = vadd.xlane.f32.xlu1 %v1740_v16 }
0x1290   :  { %v1829_v18 = vpop.xlane.xlu0 %1828 }
0x1291   :  { %v1830_v39 = vsub.f32 %v1826_v52, %v1829_v18 }
0x1293   :  { %v1831_v19 = vmul.f32 1.442695, %v1830_v39  ;;  %v2235_v39 = vld [vmem:[%s3130_s5 + $0x70] sm:$0xff] }
0x1295   :  { %2375 = vpow2.f32 %v1831_v19 }
0x129b   :  { %v2376_v14 = vpop.eup %2375 }
0x129c   :  { %v1833_v21 = vsel %vm87_vm1, %v2376_v14, 0.0 }
0x129d   :  { %1834 = vadd.xlane.f32.xlu2 %v1833_v21  ;;  %v2234_v21 = vld [vmem:[%s3130_s5 + $0x68] sm:$0xff] }
0x12a3   :  { %v1633_v9 = vpop.permute.xlu0 %1632 }
0x12a4   :  { %1653 = vmatpush.msra.mxu2 %v1633_v9 }
0x12a8   :  { %1747 = vrot.lane.b32.xlu1 %v2897_v30, %s2431_s14 }
0x12b5   :  { %1840 = vrot.lane.b32.xlu2 %v2897_v30, %s2433_s9  ;;  %s2153_s9 = sshll.u32 %s3132_s7, 4  ;;  %s2154_s9 = int_to_ptr.hbm [resolvable:$true] %s2153_s9 }
0x12f8   :  { %v1897_v22 = vpop.xlane.xlu0 %1896 }
0x12f9   :  { %v1901_v58 = vmul.f32 %v1897_v22, %v2685_v35 }
0x12fa   :  { %v1627_v17 = vpop.xlane.xlu2 %1626 }
0x12fb   :  { %v1903_v13 = vsub.f32 %v1893_v7, %v1901_v58  ;;  %2377 = vrcp.f32 %v1627_v17  ;;  %v1945_v7 = vperm.slane %v2818_v8, 2  ;;  %v2233_v58 = vld [vmem:[%s3130_s5 + $0x60] sm:$0xff] }
0x12fd   :  { %v1905_v24 = vmul.f32 %v1903_v13, %v1903_v13 }
0x12ff   :  { %v1907_v25 = vsel %vm53_vm0, %v1905_v24, 0.0 }
0x1300   :  { %1908 = vadd.xlane.f32.xlu2 %v1907_v25 }
0x1301   :  { %v2378_v29 = vpop.eup %2377 }
0x1302   :  { %v1629_v42 = vmul.f32 %v2378_v29, %v2372_v63  ;;  %v1742_v31 = vpop.xlane.xlu1 %1741  ;;  %v2231_v29 = vld [vmem:[%s3130_s5 + $0x50] sm:$0xff] }
0x1303   :  { %2379 = vrcp.f32 %v1742_v31  ;;  %v2230_v31 = vld [vmem:[%s3130_s5 + $0x48] sm:$0xff] }
0x1304   :  { %2267 = vst.msk [vmem:[%s3133_s8 + $0x68] sm:$0xff] %vm87_vm1, %v1629_v42  ;;  %2268 = vmatmul.msk.f32.vlgmr.msra.gmra.mxu2 %vm87_vm1, %v1629_v42 }
0x1309   :  { %v2380_v30 = vpop.eup %2379 }
0x130a   :  { %v1744_v32 = vmul.f32 %v2380_v30, %v2374_v15 }
0x130c   :  { %2273 = vst.msk [vmem:[%s3133_s8 + $0x70] sm:$0xff] %vm87_vm1, %v1744_v32 }
0x1310   :  { %v1835_v28 = vpop.xlane.xlu2 %1834 }
0x1311   :  { %2381 = vrcp.f32 %v1835_v28 }
0x1317   :  { %v2382_v5 = vpop.eup %2381 }
0x1318   :  { %v1837_v33 = vmul.f32 %v2382_v5, %v2376_v14  ;;  %v1841_v20 = vpop.permute.xlu2 %1840 }
0x1319   :  { %1861 = vmatpush.msrb.mxu0 %v1841_v20 }
0x131a   :  { %2278 = vst.msk [vmem:[%s3133_s8 + $0x78] sm:$0xff] %vm87_vm1, %v1837_v33  ;;  %v1748_v59 = vpop.permute.xlu1 %1747  ;;  %2279 = vmatmul.msk.f32.vlgmr.msrb.gmra.mxu0 %vm87_vm1, %v1837_v33 }
0x131b   :  { %1768 = vmatpush.msrb.mxu2 %v1748_v59 }
0x131c   :  { %2274 = vmatmul.msk.f32.vlgmr.msrb.gmra.mxu2 %vm87_vm1, %v1744_v32  ;;  %v2229_v32 = vld [vmem:[%s3130_s5 + $0x40] sm:$0xff] }
0x131d   :  { %1884 = vmatpush.msra.mxu2 %v2972_v26  ;;  %v2226_v26 = vld [vmem:[%s3129_s4 + $0x28] sm:$0xff] }
0x1373   :  { %v1909_v34 = vpop.xlane.xlu2 %1908 }
0x1374   :  { %v1913_v23 = vmul.f32 %v1909_v34, %v2685_v35 }
0x1376   :  { %v1915_v36 = vadd.f32 1e-06, %v1913_v23 }
0x1378   :  { %2383 = vrsqrt.f32 %v1915_v36  ;;  %vm1923_vm12 = vweird.f32 %v1915_v36 }
0x137e   :  { %v2384_v37 = vpop.eup %2383 }
0x137f   :  { %v1918_v41 = vmul.f32 %v2384_v37, %v1915_v36  ;;  %vm1924_vm11 = vweird.f32 %v2384_v37 }
0x1380   :  { %vm1925_vm13 = vmor %vm1923_vm12, %vm1924_vm11 }
0x1381   :  { %v1919_v44 = vmul.f32 %v2384_v37, %v1918_v41 }
0x1383   :  { %v1920_v46 = vmul.f32 0.5, %v1919_v44 }
0x1385   :  { %v1921_v47 = vsub.f32 1.5, %v1920_v46 }
0x1387   :  { %v1655_v4 = vpop.f32.mrf.mxu2  ;;  %v1922_v48 = vmul.f32 %v2384_v37, %v1921_v47 }
0x1388   :  { %2269 = vmatmul.msk.f32.vlgmr.msrb.gmra.mxu1 %vm87_vm1, %v1655_v4 }
0x1389   :  { %1964 = vmatpush.msrb.mxu1 %v2228_v38  ;;  %v1926_v50 = vsel %vm1925_vm13, %v2384_v37, %v1922_v48 }
0x138a   :  { %v1937_v52 = vmul.f32 %v1926_v50, %v1903_v13  ;;  %v2232_v13 = vld [vmem:[%s3130_s5 + $0x58] sm:$0xff] }
0x138b   :  { %1965 = vmatpush.msrb.mxu1 %v2227_v43 }
0x138c   :  { %v1940_v40 = vmul.f32 %v1939_v51, %v1937_v52 }
0x138d   :  { %1966 = vmatpush.msrb.mxu1 %v2226_v26 }
0x138e   :  { %v3041_v56 = vadd.f32 %v1942_v54, %v1940_v40 }
0x138f   :  { %1967 = vmatpush.msrb.mxu1 %v2225_v45 }
0x1397   :  { %v1863_v49 = vpop.f32.mrf.mxu0 }
0x1398   :  { %2280 = vmatmul.msk.f32.vlgmr.msra.gmra.mxu2 %vm87_vm1, %v1863_v49 }
0x139f   :  { %v1770_v53 = vpop.f32.mrf.mxu2 }
0x13a0   :  { %2275 = vmatmul.msk.f32.vlgmr.msra.gmra.mxu1 %vm87_vm1, %v1770_v53 }
0x13a8   :  { %2281 = vmatmul.msk.f32.vlgmr.msrb.gmra.mxu1 %vm53_vm0, %v3041_v56 }
0x1405   :  { %v1678_v0 = vpop.f32.mrf.mxu1 }
0x1406   :  { %v1702_v57 = vadd.f32 %v2980_v62, %v1678_v0 }
0x141b   :  { %v1886_v3 = vpop.f32.mrf.mxu2 }
0x141d   :  { %v1793_v60 = vpop.f32.mrf.mxu1 }
0x141e   :  { %v1796_v61 = vadd.f32 %v1793_v60, %v1702_v57 }
0x1420   :  { %v1889_v6 = vadd.f32 %v1886_v3, %v1796_v61 }
0x1422   :  { %v1891_v10 = vadd.f32 %v1889_v6, %v2868_v55  ;;  %v2236_v55 = vld [vmem:[%s3130_s5 + $0x78] sm:$0xff]  ;;  %s2436_s5 = smov [#allocation2]  }
0x1423   :  { %2078 = vmatpush.msra.mxu3 %v2236_v55  ;;  %s2151_s26 = sshll.u32 %s2436_s5, 4  ;;  %s2152_s26 = int_to_ptr.vmem [resolvable:$true] %s2151_s26 }
0x1424   :  { %v3050_v12 = vadd.f32 %v1892_v2, %v1891_v10  ;;  %v2063_v10 = vperm.slane %v2818_v8, 3 }
0x1425   :  { %v1969_v63 = vpop.f32.mrf.mxu1  ;;  %2079 = vmatpush.msra.mxu3 %v2235_v39 }
0x1426   :  { %v1970_v11 = vadd.f32 %v1969_v63, %v1945_v7  ;;  %v1898_v1 = vsel %vm53_vm0, %v3050_v12, 0.0 }
0x1427   :  { %1899 = vadd.xlane.f32.xlu1 %v1898_v1  ;;  %2080 = vmatpush.msra.mxu3 %v2234_v21 }
0x1428   :  { %v1977_v62 = vmul.f32 %v1970_v11, %v2736_v27  ;;  %v1975_v53 = vmul.f32 0.5, %v1970_v11 }
0x1429   :  { %2081 = vmatpush.msra.mxu3 %v2233_v58 }
0x142a   :  { %v1979_v15 = vmul.f32 %v1977_v62, %v1977_v62 }
0x142b   :  { %2082 = vmatpush.msra.mxu3 %v2232_v13 }
0x142c   :  { %v1980_v16 = vmin.f32 %v1979_v15, 16.0 }
0x142d   :  { %2083 = vmatpush.msra.mxu3 %v2231_v29 }
0x142e   :  { %v1981_v18 = vmul.f32 2.1237322e-06, %v1980_v16  ;;  %v1992_v2 = vmul.f32 3.8918573e-05, %v1980_v16 }
0x142f   :  { %2084 = vmatpush.msra.mxu3 %v2230_v31 }
0x1430   :  { %v1982_v19 = vadd.f32 0.00028619796, %v1981_v18  ;;  %v1993_v14 = vadd.f32 0.001143296, %v1992_v2 }
0x1431   :  { %2085 = vmatpush.msra.mxu3 %v2229_v32 }
0x1432   :  { %v1983_v9 = vmul.f32 %v1982_v19, %v1980_v16  ;;  %v1994_v22 = vmul.f32 %v1993_v14, %v1980_v16 }
0x1434   :  { %v1995_v17 = vadd.f32 0.014752088, %v1994_v22  ;;  %v1984_v24 = vadd.f32 0.0036580483, %v1983_v9 }
0x1436   :  { %v1996_v25 = vmul.f32 %v1995_v17, %v1980_v16  ;;  %v1985_v30 = vmul.f32 %v1984_v24, %v1980_v16 }
0x1438   :  { %v1997_v42 = vadd.f32 0.112945676, %v1996_v25  ;;  %v1986_v33 = vadd.f32 0.05243302, %v1985_v30 }
0x143a   :  { %v1998_v28 = vmul.f32 %v1997_v42, %v1980_v16  ;;  %v1987_v34 = vmul.f32 %v1986_v33, %v1980_v16 }
0x143c   :  { %v1999_v5 = vadd.f32 0.4994258, %v1998_v28  ;;  %v1988_v23 = vadd.f32 0.18741608, %v1987_v34 }
0x143e   :  { %v2000_v20 = vmul.f32 %v1999_v5, %v1980_v16  ;;  %v1989_v37 = vmul.f32 %v1988_v23, %v1980_v16 }
0x1440   :  { %v2001_v59 = vadd.f32 1.0, %v2000_v20  ;;  %v1990_v43 = vadd.f32 1.1283791, %v1989_v37 }
0x1442   :  { %2385 = vrcp.f32 %v2001_v59  ;;  %v2013_v4 = vand.u32 2147483648, %v2001_v59  ;;  %v2011_v44 = vand.u32 2147483647, %v2001_v59  ;;  %vm2007_vm15 = vweird.f32 %v2001_v59 }
0x1443   :  { %v1991_v47 = vmul.f32 %v1990_v43, %v1977_v62 }
0x1444   :  { %v2014_v46 = vor.u32 1.1754944e-38, %v2013_v4  ;;  %vm2012_vm3 = vcmp.eq.f32.partialorder %v2011_v44, 8.507059e+37 }
0x1448   :  { %v2386_v36 = vpop.eup %2385 }
0x1449   :  { %v2003_v38 = vmul.f32 %v2386_v36, %v2001_v59  ;;  %vm2008_vm1 = vweird.f32 %v2386_v36 }
0x144a   :  { %vm2009_vm2 = vmor %vm2007_vm15, %vm2008_vm1 }
0x144b   :  { %v2004_v41 = vsub.f32 1.0, %v2003_v38 }
0x144d   :  { %v2005_v26 = vmul.f32 %v2386_v36, %v2004_v41 }
0x144f   :  { %v2006_v45 = vadd.f32 %v2386_v36, %v2005_v26 }
0x1451   :  { %v2010_v48 = vsel %vm2009_vm2, %v2386_v36, %v2006_v45 }
0x1452   :  { %v2015_v49 = vsel %vm2012_vm3, %v2014_v46, %v2010_v48 }
0x1453   :  { %v2016_v50 = vmul.f32 %v2015_v49, %v1991_v47 }
0x1455   :  { %v2283_v52 = vclamps-f32 %v2016_v50, 1.0 }
0x1457   :  { %v2059_v40 = vadd.f32 1.0, %v2283_v52 }
0x1459   :  { %v2061_v0 = vmul.f32 %v2059_v40, %v1975_v53 }
0x145b   :  { %2285 = vmatmul.msk.f32.vlgmr.msra.gmra.mxu3 %vm1012_vm14, %v2061_v0 }
0x149a   :  { %v1900_v57 = vpop.xlane.xlu1 %1899 }
0x149b   :  { %v1902_v60 = vmul.f32 %v1900_v57, %v2685_v35 }
0x149d   :  { %v1904_v61 = vsub.f32 %v3050_v12, %v1902_v60 }
0x149f   :  { %v1906_v3 = vmul.f32 %v1904_v61, %v1904_v61 }
0x14a1   :  { %v1910_v6 = vsel %vm53_vm0, %v1906_v3, 0.0 }
0x14a2   :  { %1911 = vadd.xlane.f32.xlu0 %v1910_v6 }
0x14de   :  { %v2087_v63 = vpop.f32.mrf.mxu3 }
0x14df   :  { %v2088_v1 = vadd.f32 %v2087_v63, %v2063_v10 }
0x14e1   :  { %v2093_v11 = vadd.f32 %v2088_v1, %v3041_v56 }
0x14e3   :  { %v2095_v62 = vsel %vm53_vm0, %v2093_v11, 0.0 }
0x14e4   :  { %2096 = vadd.xlane.f32.xlu0 %v2095_v62 }
0x1515   :  { %v1912_v15 = vpop.xlane.xlu0 %1911 }
0x1516   :  { %v1914_v16 = vmul.f32 %v1912_v15, %v2685_v35 }
0x1518   :  { %v1916_v55 = vadd.f32 1e-06, %v1914_v16 }
0x151a   :  { %2387 = vrsqrt.f32 %v1916_v55  ;;  %vm1933_vm5 = vweird.f32 %v1916_v55 }
0x1520   :  { %v2388_v12 = vpop.eup %2387 }
0x1521   :  { %v1928_v18 = vmul.f32 %v2388_v12, %v1916_v55  ;;  %vm1934_vm4 = vweird.f32 %v2388_v12 }
0x1522   :  { %vm1935_vm6 = vmor %vm1933_vm5, %vm1934_vm4 }
0x1523   :  { %v1929_v2 = vmul.f32 %v2388_v12, %v1928_v18 }
0x1525   :  { %v1930_v39 = vmul.f32 0.5, %v1929_v2 }
0x1527   :  { %v1931_v19 = vsub.f32 1.5, %v1930_v39 }
0x1529   :  { %v1932_v14 = vmul.f32 %v2388_v12, %v1931_v19  ;;  %v2139_v19 = vperm.slane %v2818_v8, 6 }
0x152b   :  { %v1936_v21 = vsel %vm1935_vm6, %v2388_v12, %v1932_v14 }
0x152c   :  { %v1938_v9 = vmul.f32 %v1936_v21, %v1904_v61 }
0x152e   :  { %v1941_v56 = vmul.f32 %v1939_v51, %v1938_v9  ;;  %v2142_v9 = vperm.slane %v2818_v8, 7 }
0x1530   :  { %v3095_v22 = vadd.f32 %v1942_v54, %v1941_v56 }
0x1532   :  { %2282 = vmatmul.msk.f32.gmra.mxu1 %vm53_vm0, %v3095_v22 }
0x1557   :  { %v2097_v58 = vpop.xlane.xlu0 %2096 }
0x1558   :  { %v2101_v17 = vmul.f32 %v2097_v58, %v2685_v35 }
0x155a   :  { %v3100_v13 = vsub.f32 %v2093_v11, %v2101_v17 }
0x155c   :  { %v2105_v24 = vmul.f32 %v3100_v13, %v3100_v13 }
0x155e   :  { %v2107_v25 = vsel %vm53_vm0, %v2105_v24, 0.0 }
0x155f   :  { %2108 = vadd.xlane.f32.xlu2 %v2107_v25 }
0x15af   :  { %v1972_v29 = vpop.f32.mrf.mxu1 }
0x15b0   :  { %v1973_v51 = vadd.f32 %v1972_v29, %v1945_v7 }
0x15b2   :  { %v1978_v54 = vmul.f32 %v1973_v51, %v2736_v27  ;;  %v1976_v16 = vmul.f32 0.5, %v1973_v51 }
0x15b4   :  { %v2019_v42 = vmul.f32 %v1978_v54, %v1978_v54 }
0x15b6   :  { %v2020_v31 = vmin.f32 %v2019_v42, 16.0 }
0x15b8   :  { %v2021_v30 = vmul.f32 2.1237322e-06, %v2020_v31  ;;  %v2032_v32 = vmul.f32 3.8918573e-05, %v2020_v31 }
0x15ba   :  { %v2022_v28 = vadd.f32 0.00028619796, %v2021_v30  ;;  %v2033_v5 = vadd.f32 0.001143296, %v2032_v32 }
0x15bc   :  { %v2023_v33 = vmul.f32 %v2022_v28, %v2020_v31  ;;  %v2034_v20 = vmul.f32 %v2033_v5, %v2020_v31 }
0x15be   :  { %v2024_v59 = vadd.f32 0.0036580483, %v2023_v33  ;;  %v2035_v34 = vadd.f32 0.014752088, %v2034_v20 }
0x15c0   :  { %v2036_v23 = vmul.f32 %v2035_v34, %v2020_v31  ;;  %v2025_v36 = vmul.f32 %v2024_v59, %v2020_v31 }
0x15c2   :  { %v2037_v37 = vadd.f32 0.112945676, %v2036_v23  ;;  %v2026_v41 = vadd.f32 0.05243302, %v2025_v36 }
0x15c4   :  { %v2038_v38 = vmul.f32 %v2037_v37, %v2020_v31  ;;  %v2027_v7 = vmul.f32 %v2026_v41, %v2020_v31 }
0x15c6   :  { %v2039_v4 = vadd.f32 0.4994258, %v2038_v38  ;;  %v2028_v27 = vadd.f32 0.18741608, %v2027_v7 }
0x15c8   :  { %v2040_v43 = vmul.f32 %v2039_v4, %v2020_v31  ;;  %v2029_v45 = vmul.f32 %v2028_v27, %v2020_v31 }
0x15ca   :  { %v2041_v26 = vadd.f32 1.0, %v2040_v43  ;;  %v2030_v52 = vadd.f32 1.1283791, %v2029_v45 }
0x15cc   :  { %2389 = vrcp.f32 %v2041_v26  ;;  %v2053_v53 = vand.u32 2147483648, %v2041_v26  ;;  %v2051_v0 = vand.u32 2147483647, %v2041_v26  ;;  %vm2047_vm8 = vweird.f32 %v2041_v26 }
0x15cd   :  { %v2031_v61 = vmul.f32 %v2030_v52, %v1978_v54 }
0x15ce   :  { %v2054_v60 = vor.u32 1.1754944e-38, %v2053_v53  ;;  %vm2052_vm10 = vcmp.eq.f32.partialorder %v2051_v0, 8.507059e+37 }
0x15d2   :  { %v2390_v44 = vpop.eup %2389  ;;  %v2109_v46 = vpop.xlane.xlu2 %2108 }
0x15d3   :  { %v2043_v47 = vmul.f32 %v2390_v44, %v2041_v26  ;;  %v2113_v48 = vmul.f32 %v2109_v46, %v2685_v35  ;;  %vm2048_vm7 = vweird.f32 %v2390_v44 }
0x15d4   :  { %vm2049_vm9 = vmor %vm2047_vm8, %vm2048_vm7 }
0x15d5   :  { %v2044_v49 = vsub.f32 1.0, %v2043_v47  ;;  %v2115_v50 = vadd.f32 1e-06, %v2113_v48 }
0x15d7   :  { %v2045_v40 = vmul.f32 %v2390_v44, %v2044_v49  ;;  %2391 = vrsqrt.f32 %v2115_v50  ;;  %vm2123_vm12 = vweird.f32 %v2115_v50 }
0x15d9   :  { %v2046_v57 = vadd.f32 %v2390_v44, %v2045_v40 }
0x15db   :  { %v2050_v3 = vsel %vm2049_vm9, %v2390_v44, %v2046_v57 }
0x15dc   :  { %v2055_v6 = vsel %vm2052_vm10, %v2054_v60, %v2050_v3 }
0x15dd   :  { %v2392_v63 = vpop.eup %2391  ;;  %v2056_v1 = vmul.f32 %v2055_v6, %v2031_v61 }
0x15de   :  { %v2118_v11 = vmul.f32 %v2392_v63, %v2115_v50  ;;  %vm2124_vm11 = vweird.f32 %v2392_v63 }
0x15df   :  { %v2284_v62 = vclamps-f32 %v2056_v1, 1.0  ;;  %vm2125_vm13 = vmor %vm2123_vm12, %vm2124_vm11 }
0x15e0   :  { %v2119_v15 = vmul.f32 %v2392_v63, %v2118_v11 }
0x15e1   :  { %v2060_v55 = vadd.f32 1.0, %v2284_v62 }
0x15e2   :  { %v2120_v12 = vmul.f32 0.5, %v2119_v15 }
0x15e3   :  { %v2062_v18 = vmul.f32 %v2060_v55, %v1976_v16 }
0x15e4   :  { %v2121_v2 = vsub.f32 1.5, %v2120_v12 }
0x15e5   :  { %2286 = vmatmul.msk.f32.gmra.mxu3 %vm1012_vm14, %v2062_v18 }
0x15e6   :  { %v2122_v39 = vmul.f32 %v2392_v63, %v2121_v2 }
0x15e8   :  { %v2126_v14 = vsel %vm2125_vm13, %v2392_v63, %v2122_v39 }
0x15e9   :  { %v2137_v21 = vmul.f32 %v2126_v14, %v3100_v13 }
0x15eb   :  { %v2140_v56 = vmul.f32 %v2139_v19, %v2137_v21 }
0x15ed   :  { %v2143_v58 = vadd.f32 %v2142_v9, %v2140_v56 }
0x15ef   :  { %2145 = vst.msk [vmem:[#allocation2] sm:$0xff] %vm53_vm0, %v2143_v58 }
0x1668   :  { %v2090_v17 = vpop.f32.mrf.mxu3 }
0x1669   :  { %v2091_v24 = vadd.f32 %v2090_v17, %v2063_v10 }
0x166b   :  { %v2094_v25 = vadd.f32 %v2091_v24, %v3095_v22 }
0x166d   :  { %v2098_v29 = vsel %vm53_vm0, %v2094_v25, 0.0 }
0x166e   :  { %2099 = vadd.xlane.f32.xlu1 %v2098_v29 }
0x16e1   :  { %v2100_v51 = vpop.xlane.xlu1 %2099 }
0x16e2   :  { %v2102_v54 = vmul.f32 %v2100_v51, %v2685_v35 }
0x16e4   :  { %v2104_v42 = vsub.f32 %v2094_v25, %v2102_v54 }
0x16e6   :  { %v2106_v13 = vmul.f32 %v2104_v42, %v2104_v42 }
0x16e8   :  { %v2110_v31 = vsel %vm53_vm0, %v2106_v13, 0.0 }
0x16e9   :  { %2111 = vadd.xlane.f32.xlu0 %v2110_v31 }
0x175c   :  { %v2112_v30 = vpop.xlane.xlu0 %2111 }
0x175d   :  { %v2114_v32 = vmul.f32 %v2112_v30, %v2685_v35 }
0x175f   :  { %v2116_v28 = vadd.f32 1e-06, %v2114_v32 }
0x1761   :  { %2393 = vrsqrt.f32 %v2116_v28  ;;  %vm2133_vm1 = vweird.f32 %v2116_v28 }
0x1767   :  { %v2394_v8 = vpop.eup %2393 }
0x1768   :  { %v2128_v10 = vmul.f32 %v2394_v8, %v2116_v28  ;;  %vm2134_vm14 = vweird.f32 %v2394_v8 }
0x1769   :  { %vm2135_vm15 = vmor %vm2133_vm1, %vm2134_vm14 }
0x176a   :  { %v2129_v5 = vmul.f32 %v2394_v8, %v2128_v10 }
0x176c   :  { %v2130_v22 = vmul.f32 0.5, %v2129_v5 }
0x176e   :  { %v2131_v33 = vsub.f32 1.5, %v2130_v22 }
0x1770   :  { %v2132_v20 = vmul.f32 %v2394_v8, %v2131_v33 }
0x1772   :  { %v2136_v59 = vsel %vm2135_vm15, %v2394_v8, %v2132_v20 }
0x1773   :  { %v2138_v34 = vmul.f32 %v2136_v59, %v2104_v42 }
0x1775   :  { %v2141_v35 = vmul.f32 %v2139_v19, %v2138_v34 }
0x1777   :  { %v2144_v23 = vadd.f32 %v2142_v9, %v2141_v35 }
0x1779   :  { %2146 = vst.msk [vmem:[#allocation2 + $0x8] sm:$0xff] %vm53_vm0, %v2144_v23 }
0x177a   :  { %2159 = dma.vmem_to_hbm [thread:$0]  %s2152_s26, 256, %s2154_s9, [#allocation3], %s2437_s6, %s2437_s6, %s2438_s22  }
0x177b   :  { %2421 = dma.done.wait [#allocation3], 256  }
0x177c   :  { %2422 = vsyncadd [#allocation3], 4294967040 }
0x177d   :  { %2168 = vsyncpa [#allocation3], 1 }

</bundles_post_ra>
